<compile_context>
chip_gen: v7x
topology: tpu7x:2x2x1
jax: 0.10.0
libtpu: 0.0.40
codegen_flags: <defaults>
</compile_context>

<pallas_src>
import functools

import jax
import jax.numpy as jnp
from jax.experimental import pallas as pl
from jax.experimental.pallas import tpu as pltpu

BN_EPS = 1e-5


# ----------------------------- Pallas kernel --------------------------------

def _bottleneck_kernel(x_ref, xu_ref, xd_ref, w1_ref, b1_ref, w2_ref, b2_ref,
                       w3_ref, b3_ref, o_ref, y1h_ref, col_ref, *, W, pad):
    """Fused Bottleneck for one row-band of TBW = tb*W pixels of one image.

    x_ref  : (1, TBW, Cin)  main band (also the residual)
    xu_ref : (1, W, Cin)    image row just above the band (clamped at image top)
    xd_ref : (1, W, Cin)    image row just below the band (clamped at bottom)
    w1_ref : (Cin, P)       conv1 weights, BN1 scale folded in
    w2_ref : (9*P, P)       conv2 im2col weights, (kh, kw, cin) row order, BN2 folded
    w3_ref : (P, Cout)      conv3 weights, BN3 scale folded in
    b*_ref : (1, C) f32     folded BN biases
    o_ref  : (1, TBW, Cout) output
    y1h_ref: (TBW + 2*pad, P)  y1 plus one halo image row and zero guard rows
    col_ref: (TBW, 9*P)        im2col patch matrix for the single conv2 dot
    """
    P = y1h_ref.shape[1]
    TBW = x_ref.shape[1]
    cdt = w1_ref.dtype
    band = pl.program_id(1)
    nband = pl.num_programs(1)

    x = x_ref[0]                                           # (TBW, Cin)
    w1 = w1_ref[...]
    b1 = b1_ref[...]

    # --- conv1 (1x1) + bn1 + relu: main band + the two halo image rows -------
    y1 = jnp.maximum(jnp.dot(x, w1, preferred_element_type=jnp.float32) + b1, 0.0)
    y1h_ref[pl.ds(pad, TBW), :] = y1.astype(cdt)

    up_ok = jnp.where(band > 0, 1.0, 0.0)          # halo above is zero at image top
    yu = jnp.maximum(
        jnp.dot(xu_ref[0], w1, preferred_element_type=jnp.float32) + b1, 0.0)
    y1h_ref[pl.ds(pad - W, W), :] = (yu * up_ok).astype(cdt)

    dn_ok = jnp.where(band < nband - 1, 1.0, 0.0)  # halo below zero at image bottom
    yd = jnp.maximum(
        jnp.dot(xd_ref[0], w1, preferred_element_type=jnp.float32) + b1, 0.0)
    y1h_ref[pl.ds(pad + TBW, W), :] = (yd * dn_ok).astype(cdt)

    # Guard rows must be zero: corner taps of (masked) border pixels read them.
    g = pad - W
    y1h_ref[pl.ds(0, g), :] = jnp.zeros((g, P), cdt)
    y1h_ref[pl.ds(pad + TBW + W, g), :] = jnp.zeros((g, P), cdt)

    # --- conv2 (3x3, stride 1, pad 1) as ONE im2col matmul, K = 9*P ----------
    # Bands start on an image-row boundary, so the in-row position is i % W.
    ww = jax.lax.broadcasted_iota(jnp.int32, (TBW, 1), 0) % W
    left_ok = (ww > 0).astype(cdt)          # kw = -1 tap exists
    right_ok = (ww < W - 1).astype(cdt)     # kw = +1 tap exists

    for kh in range(3):                      # static 3-iteration unroll
        row0 = pad + (kh - 1) * W            # 8-aligned base slice for this kh
        c0 = 3 * kh * P
        col_ref[:, c0:c0 + P] = y1h_ref[pl.ds(row0 - 1, TBW), :] * left_ok
        col_ref[:, c0 + P:c0 + 2 * P] = y1h_ref[pl.ds(row0, TBW), :]
        col_ref[:, c0 + 2 * P:c0 + 3 * P] = y1h_ref[pl.ds(row0 + 1, TBW), :] * right_ok

    y2 = jnp.dot(col_ref[...], w2_ref[...], preferred_element_type=jnp.float32)
    y2 = jnp.maximum(y2 + b2_ref[...], 0.0).astype(cdt)

    # --- conv3 (1x1) + bn3 + residual add (x tile already in VMEM) + relu ----
    y3 = jnp.dot(y2, w3_ref[...], preferred_element_type=jnp.float32)
    y3 = y3 + b3_ref[...] + x.astype(jnp.float32)
    o_ref[0] = jnp.maximum(y3, 0.0).astype(o_ref.dtype)


# ----------------------------- helpers ---------------------------------------

def _fold_bn(gamma, beta, mean, var):
    s = gamma / jnp.sqrt(var + BN_EPS)
    b = beta - mean * s
    return (s.reshape(1, -1).astype(jnp.float32),
            b.reshape(1, -1).astype(jnp.float32))


# ----------------------------- public wrapper --------------------------------

def bottleneck_forward(x_nchw, params, compute_dtype=jnp.bfloat16,
                       out_dtype=None, row_block=512,
                       vmem_step_cap=12 * 1024 * 1024):
    """Bottleneck forward (stride=1, downsample=None). x_nchw: (N, Cin, H, W)."""
    N, Cin, H, W = x_nchw.shape
    P = params["w1"].shape[0]            # planes
    Cout = params["w3"].shape[0]         # planes * expansion
    if Cout != Cin:
        raise NotImplementedError("downsample branch not implemented")
    if W % 8 != 0:
        raise NotImplementedError("W must be a multiple of 8 for this layout")
    out_dtype = compute_dtype if out_dtype is None else out_dtype
    M = H * W
    pad = ((W + 1 + 7) // 8) * 8         # halo + guard rows, 8-aligned offsets
    bpe = jnp.dtype(compute_dtype).itemsize
    obpe = jnp.dtype(out_dtype).itemsize

    # Per-grid-step VMEM need, counting the 2x double-buffer on every operand.
    def vmem_need(tbw):
        dbuf = 2
        x_in = dbuf * (tbw + 2 * W) * Cin * bpe
        wgt = dbuf * ((Cin * P + 9 * P * P + P * Cout) * bpe + (2 * P + Cout) * 4)
        o_out = dbuf * tbw * Cout * obpe
        scr = (tbw + 2 * pad) * P * bpe + tbw * 9 * P * bpe
        live = tbw * (P + 2 * Cout) * 4          # f32 intermediates headroom
        return x_in + wgt + o_out + scr + live

    # Pick the largest band (in image rows) that divides H, stays under the
    # target flattened-row count, and fits the per-step VMEM cap.
    tb_target = max(1, row_block // W)
    tb = 0
    for d in range(1, H + 1):
        if H % d == 0 and d <= tb_target and vmem_need(d * W) <= vmem_step_cap:
            tb = d
    if tb == 0:
        raise NotImplementedError("one image row exceeds the VMEM cap")
    TBW = tb * W
    nb = H // tb
    est = vmem_need(TBW)
    vmem_limit = int(min(max(2 * est, 32 * 1024 * 1024), 100 * 1024 * 1024))

    # NCHW -> (N, H*W, C) once. TODO(synk): in a residual stack keep activations
    # NHWC across blocks so these transposes disappear entirely.
    xc = jnp.transpose(x_nchw, (0, 2, 3, 1)).reshape(N, M, Cin).astype(compute_dtype)

    # Fold eval-mode BN into the conv weights (one-time XLA ops, outside kernel).
    s1, b1 = _fold_bn(params["g1"], params["be1"], params["m1"], params["v1"])
    s2, b2 = _fold_bn(params["g2"], params["be2"], params["m2"], params["v2"])
    s3, b3 = _fold_bn(params["g3"], params["be3"], params["m3"], params["v3"])
    w1 = (params["w1"].reshape(P, Cin).T * s1).astype(compute_dtype)            # (Cin, P)
    w2f = (jnp.transpose(params["w2"], (2, 3, 1, 0)).reshape(9 * P, P)
           * s2).astype(compute_dtype)                                          # (9P, P)
    w3 = (params["w3"].reshape(Cout, P).T * s3).astype(compute_dtype)           # (P, Cout)

    kernel = functools.partial(_bottleneck_kernel, W=W, pad=pad)
    out3d = pl.pallas_call(
        kernel,
        out_shape=jax.ShapeDtypeStruct((N, M, Cout), out_dtype),
        grid=(N, nb),
        in_specs=[
            # main band (also the residual)
            pl.BlockSpec((1, TBW, Cin), lambda n, b: (n, b, 0)),
            # one image row above / below the band (clamped; zeroed in-kernel
            # at the image top / bottom)
            pl.BlockSpec((1, W, Cin),
                         lambda n, b: (n, jnp.maximum(b * tb - 1, 0), 0)),
            pl.BlockSpec((1, W, Cin),
                         lambda n, b: (n, jnp.minimum((b + 1) * tb, H - 1), 0)),
            pl.BlockSpec((Cin, P), lambda n, b: (0, 0)),         # w1
            pl.BlockSpec((1, P), lambda n, b: (0, 0)),           # b1
            pl.BlockSpec((9 * P, P), lambda n, b: (0, 0)),       # w2 (im2col)
            pl.BlockSpec((1, P), lambda n, b: (0, 0)),           # b2
            pl.BlockSpec((P, Cout), lambda n, b: (0, 0)),        # w3
            pl.BlockSpec((1, Cout), lambda n, b: (0, 0)),        # b3
        ],
        out_specs=pl.BlockSpec((1, TBW, Cout), lambda n, b: (n, b, 0)),
        scratch_shapes=[
            pltpu.VMEM((TBW + 2 * pad, P), compute_dtype),       # halo'd y1
            pltpu.VMEM((TBW, 9 * P), compute_dtype),             # im2col patches
        ],
        compiler_params=pltpu.CompilerParams(
            dimension_semantics=("parallel", "parallel"),
            vmem_limit_bytes=vmem_limit),
    )(xc, xc, xc, w1, b1, w2f, b2, w3, b3)

    return jnp.transpose(out3d.reshape(N, H, W, Cout), (0, 3, 1, 2))


# ----------------------------- reference (plain JAX) -------------------------

def _bn_ref(x, g, b, m, v):
    return (x - m[None, :, None, None]) / jnp.sqrt(v[None, :, None, None] + BN_EPS) \
        * g[None, :, None, None] + b[None, :, None, None]


def bottleneck_ref(x, p):
    dn = ("NCHW", "OIHW", "NCHW")
    prec = jax.lax.Precision.HIGHEST
    out = jax.lax.conv_general_dilated(x, p["w1"], (1, 1), "VALID",
                                       dimension_numbers=dn, precision=prec)
    out = jax.nn.relu(_bn_ref(out, p["g1"], p["be1"], p["m1"], p["v1"]))
    out = jax.lax.conv_general_dilated(out, p["w2"], (1, 1), ((1, 1), (1, 1)),
                                       dimension_numbers=dn, precision=prec)
    out = jax.nn.relu(_bn_ref(out, p["g2"], p["be2"], p["m2"], p["v2"]))
    out = jax.lax.conv_general_dilated(out, p["w3"], (1, 1), "VALID",
                                       dimension_numbers=dn, precision=prec)
    out = _bn_ref(out, p["g3"], p["be3"], p["m3"], p["v3"])
    return jax.nn.relu(out + x)


# ----------------------------- main ------------------------------------------

if __name__ == "__main__":
    key = jax.random.PRNGKey(0)
    N, planes, expansion = 2, 64, 4
    inplanes = planes * expansion          # 256: lane-dense channels
    H, W = 16, 16

    ks = jax.random.split(key, 16)
    params = {
        # conv weights, PyTorch OIHW shapes
        "w1": 0.1 * jax.random.normal(ks[0], (planes, inplanes, 1, 1), jnp.float32),
        "w2": 0.1 * jax.random.normal(ks[1], (planes, planes, 3, 3), jnp.float32),
        "w3": 0.1 * jax.random.normal(ks[2], (planes * expansion, planes, 1, 1), jnp.float32),
        # bn1
        "g1": 1.0 + 0.1 * jax.random.normal(ks[3], (planes,), jnp.float32),
        "be1": 0.1 * jax.random.normal(ks[4], (planes,), jnp.float32),
        "m1": 0.05 * jax.random.normal(ks[5], (planes,), jnp.float32),
        "v1": 1.0 + 0.1 * jax.random.uniform(ks[6], (planes,), jnp.float32),
        # bn2
        "g2": 1.0 + 0.1 * jax.random.normal(ks[7], (planes,), jnp.float32),
        "be2": 0.1 * jax.random.normal(ks[8], (planes,), jnp.float32),
        "m2": 0.05 * jax.random.normal(ks[9], (planes,), jnp.float32),
        "v2": 1.0 + 0.1 * jax.random.uniform(ks[10], (planes,), jnp.float32),
        # bn3
        "g3": 1.0 + 0.1 * jax.random.normal(ks[11], (planes * expansion,), jnp.float32),
        "be3": 0.1 * jax.random.normal(ks[12], (planes * expansion,), jnp.float32),
        "m3": 0.05 * jax.random.normal(ks[13], (planes * expansion,), jnp.float32),
        "v3": 1.0 + 0.1 * jax.random.uniform(ks[14], (planes * expansion,), jnp.float32),
    }

    x = jax.random.normal(ks[15], (N, inplanes, H, W), jnp.float32)

    ref = jax.block_until_ready(bottleneck_ref(x, params))

    # f32 compute + f32 out, one whole image per step: strict numerical check.
    out = jax.block_until_ready(
        bottleneck_forward(x, params, compute_dtype=jnp.float32))
    assert out.shape == (N, inplanes, H, W)
    err = float(jnp.max(jnp.abs(out.astype(jnp.float32) - ref)))
    assert err < 3e-3, f"f32 path error too large: {err}"

    # f32 compute, forced 2 row-bands per image: exercises the halo/banding path.
    out = jax.block_until_ready(
        bottleneck_forward(x, params, compute_dtype=jnp.float32, row_block=128))
    err = float(jnp.max(jnp.abs(out.astype(jnp.float32) - ref)))
    assert err < 3e-3, f"f32 banded path error too large: {err}"

    # bf16 compute + bf16 output (default performance config).
    out = jax.block_until_ready(bottleneck_forward(x, params))
    assert out.shape == (N, inplanes, H, W) and out.dtype == jnp.bfloat16
    err = float(jnp.max(jnp.abs(out.astype(jnp.float32) - ref)))
    assert err < 0.35, f"bf16 path error too large: {err}"

    # bf16 compute, forced row-banding.
    out = jax.block_until_ready(bottleneck_forward(x, params, row_block=128))
    err = float(jnp.max(jnp.abs(out.astype(jnp.float32) - ref)))
    assert err < 0.35, f"bf16 banded path error too large: {err}"

    print("KERNEL_OK")
</pallas_src>

<mosaic_0001>
module attributes {stable_mosaic.version = 11 : i64} {
  func.func @_bottleneck_kernel(%arg0: i32, %arg1: i32, %arg2: memref<1x256x256xf32, #tpu.memory_space<vmem>>, %arg3: memref<1x16x256xf32, #tpu.memory_space<vmem>>, %arg4: memref<1x16x256xf32, #tpu.memory_space<vmem>>, %arg5: memref<256x64xf32, #tpu.memory_space<vmem>>, %arg6: memref<1x64xf32, #tpu.memory_space<vmem>>, %arg7: memref<576x64xf32, #tpu.memory_space<vmem>>, %arg8: memref<1x64xf32, #tpu.memory_space<vmem>>, %arg9: memref<64x256xf32, #tpu.memory_space<vmem>>, %arg10: memref<1x256xf32, #tpu.memory_space<vmem>>, %arg11: memref<1x256x256xf32, #tpu.memory_space<vmem>>, %arg12: memref<304x64xf32, #tpu.memory_space<vmem>>, %arg13: memref<256x576xf32, #tpu.memory_space<vmem>>) attributes {dimension_semantics = [#tpu.dimension_semantics<parallel>, #tpu.dimension_semantics<parallel>], iteration_bounds = array<i64: 2, 1>, scalar_prefetch = 0 : i64, scratch_operands = 2 : i64, tpu.core_type = #tpu.core_type<tc>, window_params = [{transform_indices = @transform_0, window_bounds = array<i64: 1, 256, 256>}, {transform_indices = @transform_1, window_bounds = array<i64: 1, 16, 256>}, {transform_indices = @transform_2, window_bounds = array<i64: 1, 16, 256>}, {pipeline_mode = #tpu.pipeline_mode<synchronous>, transform_indices = @transform_3, window_bounds = array<i64: 256, 64>}, {pipeline_mode = #tpu.pipeline_mode<synchronous>, transform_indices = @transform_4, window_bounds = array<i64: 1, 64>}, {pipeline_mode = #tpu.pipeline_mode<synchronous>, transform_indices = @transform_5, window_bounds = array<i64: 576, 64>}, {pipeline_mode = #tpu.pipeline_mode<synchronous>, transform_indices = @transform_6, window_bounds = array<i64: 1, 64>}, {pipeline_mode = #tpu.pipeline_mode<synchronous>, transform_indices = @transform_7, window_bounds = array<i64: 64, 256>}, {pipeline_mode = #tpu.pipeline_mode<synchronous>, transform_indices = @transform_8, window_bounds = array<i64: 1, 256>}, {transform_indices = @transform_9, window_bounds = array<i64: 1, 256, 256>}]} {
    %c0 = arith.constant 0 : index
    %c0_0 = arith.constant 0 : index
    %c0_1 = arith.constant 0 : index
    %0 = vector.load %arg2[%c0, %c0_0, %c0_1] : memref<1x256x256xf32, #tpu.memory_space<vmem>>, vector<1x256x256xf32>
    %1 = vector.shape_cast %0 : vector<1x256x256xf32> to vector<256x256xf32>
    %c0_2 = arith.constant 0 : index
    %c0_3 = arith.constant 0 : index
    %2 = vector.load %arg5[%c0_2, %c0_3] : memref<256x64xf32, #tpu.memory_space<vmem>>, vector<256x64xf32>
    %c0_4 = arith.constant 0 : index
    %c0_5 = arith.constant 0 : index
    %3 = vector.load %arg6[%c0_4, %c0_5] : memref<1x64xf32, #tpu.memory_space<vmem>>, vector<1x64xf32>
    %cst = arith.constant dense<0.000000e+00> : vector<256x64xf32>
    %4 = tpu.matmul %1, %2, %cst {dimension_numbers = #tpu.dot_dimension_numbers<[1], [0], [0], [1], [0, 0, 1, 1], [], []>} : vector<256x256xf32>, vector<256x64xf32>, vector<256x64xf32> -> vector<256x64xf32>
    %5 = vector.broadcast %3 : vector<1x64xf32> to vector<256x64xf32>
    %6 = arith.addf %4, %5 : vector<256x64xf32>
    %cst_6 = arith.constant 0.000000e+00 : f32
    %7 = vector.broadcast %cst_6 : f32 to vector<256x64xf32>
    %8 = arith.maximumf %6, %7 : vector<256x64xf32>
    %c24 = arith.constant 24 : index
    %c0_7 = arith.constant 0 : index
    %9 = vector.load %arg12[%c24, %c0_7] : memref<304x64xf32, #tpu.memory_space<vmem>>, vector<256x64xf32>
    tpu.vector_store %arg12[%c24, %c0_7], %8 {strides = array<i32>} : memref<304x64xf32, #tpu.memory_space<vmem>>, vector<256x64xf32>,
    %c0_i32 = arith.constant 0 : i32
    %10 = arith.cmpi sgt, %arg1, %c0_i32 : i32
    %cst_8 = arith.constant 1.000000e+00 : f32
    %cst_9 = arith.constant 0.000000e+00 : f32
    %11 = arith.select %10, %cst_8, %cst_9 : f32
    %c0_10 = arith.constant 0 : index
    %c0_11 = arith.constant 0 : index
    %c0_12 = arith.constant 0 : index
    %12 = vector.load %arg3[%c0_10, %c0_11, %c0_12] : memref<1x16x256xf32, #tpu.memory_space<vmem>>, vector<1x16x256xf32>
    %13 = vector.shape_cast %12 : vector<1x16x256xf32> to vector<16x256xf32>
    %cst_13 = arith.constant dense<0.000000e+00> : vector<16x64xf32>
    %14 = tpu.matmul %13, %2, %cst_13 {dimension_numbers = #tpu.dot_dimension_numbers<[1], [0], [0], [1], [0, 0, 1, 1], [], []>} : vector<16x256xf32>, vector<256x64xf32>, vector<16x64xf32> -> vector<16x64xf32>
    %15 = vector.broadcast %3 : vector<1x64xf32> to vector<16x64xf32>
    %16 = arith.addf %14, %15 : vector<16x64xf32>
    %cst_14 = arith.constant 0.000000e+00 : f32
    %17 = vector.broadcast %cst_14 : f32 to vector<16x64xf32>
    %18 = arith.maximumf %16, %17 : vector<16x64xf32>
    %19 = vector.broadcast %11 : f32 to vector<16x64xf32>
    %20 = arith.mulf %18, %19 : vector<16x64xf32>
    %c8 = arith.constant 8 : index
    %c0_15 = arith.constant 0 : index
    %21 = vector.load %arg12[%c8, %c0_15] : memref<304x64xf32, #tpu.memory_space<vmem>>, vector<16x64xf32>
    tpu.vector_store %arg12[%c8, %c0_15], %20 {strides = array<i32>} : memref<304x64xf32, #tpu.memory_space<vmem>>, vector<16x64xf32>,
    %c0_i32_16 = arith.constant 0 : i32
    %22 = arith.cmpi slt, %arg1, %c0_i32_16 : i32
    %cst_17 = arith.constant 1.000000e+00 : f32
    %cst_18 = arith.constant 0.000000e+00 : f32
    %23 = arith.select %22, %cst_17, %cst_18 : f32
    %c0_19 = arith.constant 0 : index
    %c0_20 = arith.constant 0 : index
    %c0_21 = arith.constant 0 : index
    %24 = vector.load %arg4[%c0_19, %c0_20, %c0_21] : memref<1x16x256xf32, #tpu.memory_space<vmem>>, vector<1x16x256xf32>
    %25 = vector.shape_cast %24 : vector<1x16x256xf32> to vector<16x256xf32>
    %cst_22 = arith.constant dense<0.000000e+00> : vector<16x64xf32>
    %26 = tpu.matmul %25, %2, %cst_22 {dimension_numbers = #tpu.dot_dimension_numbers<[1], [0], [0], [1], [0, 0, 1, 1], [], []>} : vector<16x256xf32>, vector<256x64xf32>, vector<16x64xf32> -> vector<16x64xf32>
    %27 = vector.broadcast %3 : vector<1x64xf32> to vector<16x64xf32>
    %28 = arith.addf %26, %27 : vector<16x64xf32>
    %cst_23 = arith.constant 0.000000e+00 : f32
    %29 = vector.broadcast %cst_23 : f32 to vector<16x64xf32>
    %30 = arith.maximumf %28, %29 : vector<16x64xf32>
    %31 = vector.broadcast %23 : f32 to vector<16x64xf32>
    %32 = arith.mulf %30, %31 : vector<16x64xf32>
    %c280 = arith.constant 280 : index
    %c0_24 = arith.constant 0 : index
    %33 = vector.load %arg12[%c280, %c0_24] : memref<304x64xf32, #tpu.memory_space<vmem>>, vector<16x64xf32>
    tpu.vector_store %arg12[%c280, %c0_24], %32 {strides = array<i32>} : memref<304x64xf32, #tpu.memory_space<vmem>>, vector<16x64xf32>,
    %cst_25 = arith.constant 0.000000e+00 : f32
    %34 = vector.broadcast %cst_25 : f32 to vector<8x64xf32>
    %c0_26 = arith.constant 0 : index
    %c0_27 = arith.constant 0 : index
    %35 = vector.load %arg12[%c0_26, %c0_27] : memref<304x64xf32, #tpu.memory_space<vmem>>, vector<8x64xf32>
    tpu.vector_store %arg12[%c0_26, %c0_27], %34 {strides = array<i32>} : memref<304x64xf32, #tpu.memory_space<vmem>>, vector<8x64xf32>,
    %cst_28 = arith.constant 0.000000e+00 : f32
    %36 = vector.broadcast %cst_28 : f32 to vector<8x64xf32>
    %c296 = arith.constant 296 : index
    %c0_29 = arith.constant 0 : index
    %37 = vector.load %arg12[%c296, %c0_29] : memref<304x64xf32, #tpu.memory_space<vmem>>, vector<8x64xf32>
    tpu.vector_store %arg12[%c296, %c0_29], %36 {strides = array<i32>} : memref<304x64xf32, #tpu.memory_space<vmem>>, vector<8x64xf32>,
    %38 = tpu.iota {dimensions = array<i32: 0>} : vector<256x1xi32>
    %c16_i32 = arith.constant 16 : i32
    %c0_i32_30 = arith.constant 0 : i32
    %39 = arith.cmpi eq, %c16_i32, %c0_i32_30 : i32
    %c1_i32 = arith.constant 1 : i32
    %40 = arith.select %39, %c1_i32, %c16_i32 : i32
    %41 = vector.broadcast %40 : i32 to vector<256x1xi32>
    %42 = arith.remsi %38, %41 : vector<256x1xi32>
    %c0_i32_31 = arith.constant 0 : i32
    %43 = vector.broadcast %c0_i32_31 : i32 to vector<256x1xi32>
    %44 = arith.cmpi ne, %42, %43 : vector<256x1xi32>
    %c0_i32_32 = arith.constant 0 : i32
    %45 = vector.broadcast %c0_i32_32 : i32 to vector<256x1xi32>
    %46 = arith.cmpi slt, %42, %45 : vector<256x1xi32>
    %c0_i32_33 = arith.constant 0 : i32
    %47 = arith.cmpi slt, %40, %c0_i32_33 : i32
    %48 = vector.broadcast %47 : i1 to vector<256x1xi1>
    %49 = vector.broadcast %48 : vector<256x1xi1> to vector<256x1xi1>
    %50 = arith.xori %46, %49 : vector<256x1xi1>
    %51 = arith.andi %50, %44 : vector<256x1xi1>
    %52 = vector.broadcast %40 : i32 to vector<256x1xi32>
    %53 = arith.addi %42, %52 : vector<256x1xi32>
    %54 = arith.select %51, %53, %42 : vector<256x1xi1>, vector<256x1xi32>
    %c0_i32_34 = arith.constant 0 : i32
    %55 = vector.broadcast %c0_i32_34 : i32 to vector<256x1xi32>
    %56 = arith.cmpi sgt, %54, %55 : vector<256x1xi32>
    %57 = arith.extui %56 : vector<256x1xi1> to vector<256x1xi32>
    %58 = arith.sitofp %57 : vector<256x1xi32> to vector<256x1xf32>
    %c15_i32 = arith.constant 15 : i32
    %59 = vector.broadcast %c15_i32 : i32 to vector<256x1xi32>
    %60 = arith.cmpi slt, %54, %59 : vector<256x1xi32>
    %61 = arith.extui %60 : vector<256x1xi1> to vector<256x1xi32>
    %62 = arith.sitofp %61 : vector<256x1xi32> to vector<256x1xf32>
    %c7 = arith.constant 7 : index
    %c0_35 = arith.constant 0 : index
    %63 = vector.load %arg12[%c7, %c0_35] : memref<304x64xf32, #tpu.memory_space<vmem>>, vector<256x64xf32>
    %64 = vector.broadcast %58 : vector<256x1xf32> to vector<256x64xf32>
    %65 = arith.mulf %63, %64 : vector<256x64xf32>
    %c0_36 = arith.constant 0 : index
    %c0_37 = arith.constant 0 : index
    %66 = vector.load %arg13[%c0_36, %c0_37] : memref<256x576xf32, #tpu.memory_space<vmem>>, vector<256x64xf32>
    tpu.vector_store %arg13[%c0_36, %c0_37], %65 {strides = array<i32>} : memref<256x576xf32, #tpu.memory_space<vmem>>, vector<256x64xf32>,
    %c8_38 = arith.constant 8 : index
    %c0_39 = arith.constant 0 : index
    %67 = vector.load %arg12[%c8_38, %c0_39] : memref<304x64xf32, #tpu.memory_space<vmem>>, vector<256x64xf32>
    %c0_40 = arith.constant 0 : index
    %c64 = arith.constant 64 : index
    %68 = vector.load %arg13[%c0_40, %c64] : memref<256x576xf32, #tpu.memory_space<vmem>>, vector<256x64xf32>
    tpu.vector_store %arg13[%c0_40, %c64], %67 {strides = array<i32>} : memref<256x576xf32, #tpu.memory_space<vmem>>, vector<256x64xf32>,
    %c9 = arith.constant 9 : index
    %c0_41 = arith.constant 0 : index
    %69 = vector.load %arg12[%c9, %c0_41] : memref<304x64xf32, #tpu.memory_space<vmem>>, vector<256x64xf32>
    %70 = vector.broadcast %62 : vector<256x1xf32> to vector<256x64xf32>
    %71 = arith.mulf %69, %70 : vector<256x64xf32>
    %c0_42 = arith.constant 0 : index
    %c128 = arith.constant 128 : index
    %72 = vector.load %arg13[%c0_42, %c128] : memref<256x576xf32, #tpu.memory_space<vmem>>, vector<256x64xf32>
    tpu.vector_store %arg13[%c0_42, %c128], %71 {strides = array<i32>} : memref<256x576xf32, #tpu.memory_space<vmem>>, vector<256x64xf32>,
    %c23 = arith.constant 23 : index
    %c0_43 = arith.constant 0 : index
    %73 = vector.load %arg12[%c23, %c0_43] : memref<304x64xf32, #tpu.memory_space<vmem>>, vector<256x64xf32>
    %74 = vector.broadcast %58 : vector<256x1xf32> to vector<256x64xf32>
    %75 = arith.mulf %73, %74 : vector<256x64xf32>
    %c0_44 = arith.constant 0 : index
    %c192 = arith.constant 192 : index
    %76 = vector.load %arg13[%c0_44, %c192] : memref<256x576xf32, #tpu.memory_space<vmem>>, vector<256x64xf32>
    tpu.vector_store %arg13[%c0_44, %c192], %75 {strides = array<i32>} : memref<256x576xf32, #tpu.memory_space<vmem>>, vector<256x64xf32>,
    %c24_45 = arith.constant 24 : index
    %c0_46 = arith.constant 0 : index
    %77 = vector.load %arg12[%c24_45, %c0_46] : memref<304x64xf32, #tpu.memory_space<vmem>>, vector<256x64xf32>
    %c0_47 = arith.constant 0 : index
    %c256 = arith.constant 256 : index
    %78 = vector.load %arg13[%c0_47, %c256] : memref<256x576xf32, #tpu.memory_space<vmem>>, vector<256x64xf32>
    tpu.vector_store %arg13[%c0_47, %c256], %77 {strides = array<i32>} : memref<256x576xf32, #tpu.memory_space<vmem>>, vector<256x64xf32>,
    %c25 = arith.constant 25 : index
    %c0_48 = arith.constant 0 : index
    %79 = vector.load %arg12[%c25, %c0_48] : memref<304x64xf32, #tpu.memory_space<vmem>>, vector<256x64xf32>
    %80 = vector.broadcast %62 : vector<256x1xf32> to vector<256x64xf32>
    %81 = arith.mulf %79, %80 : vector<256x64xf32>
    %c0_49 = arith.constant 0 : index
    %c320 = arith.constant 320 : index
    %82 = vector.load %arg13[%c0_49, %c320] : memref<256x576xf32, #tpu.memory_space<vmem>>, vector<256x64xf32>
    tpu.vector_store %arg13[%c0_49, %c320], %81 {strides = array<i32>} : memref<256x576xf32, #tpu.memory_space<vmem>>, vector<256x64xf32>,
    %c39 = arith.constant 39 : index
    %c0_50 = arith.constant 0 : index
    %83 = vector.load %arg12[%c39, %c0_50] : memref<304x64xf32, #tpu.memory_space<vmem>>, vector<256x64xf32>
    %84 = vector.broadcast %58 : vector<256x1xf32> to vector<256x64xf32>
    %85 = arith.mulf %83, %84 : vector<256x64xf32>
    %c0_51 = arith.constant 0 : index
    %c384 = arith.constant 384 : index
    %86 = vector.load %arg13[%c0_51, %c384] : memref<256x576xf32, #tpu.memory_space<vmem>>, vector<256x64xf32>
    tpu.vector_store %arg13[%c0_51, %c384], %85 {strides = array<i32>} : memref<256x576xf32, #tpu.memory_space<vmem>>, vector<256x64xf32>,
    %c40 = arith.constant 40 : index
    %c0_52 = arith.constant 0 : index
    %87 = vector.load %arg12[%c40, %c0_52] : memref<304x64xf32, #tpu.memory_space<vmem>>, vector<256x64xf32>
    %c0_53 = arith.constant 0 : index
    %c448 = arith.constant 448 : index
    %88 = vector.load %arg13[%c0_53, %c448] : memref<256x576xf32, #tpu.memory_space<vmem>>, vector<256x64xf32>
    tpu.vector_store %arg13[%c0_53, %c448], %87 {strides = array<i32>} : memref<256x576xf32, #tpu.memory_space<vmem>>, vector<256x64xf32>,
    %c41 = arith.constant 41 : index
    %c0_54 = arith.constant 0 : index
    %89 = vector.load %arg12[%c41, %c0_54] : memref<304x64xf32, #tpu.memory_space<vmem>>, vector<256x64xf32>
    %90 = vector.broadcast %62 : vector<256x1xf32> to vector<256x64xf32>
    %91 = arith.mulf %89, %90 : vector<256x64xf32>
    %c0_55 = arith.constant 0 : index
    %c512 = arith.constant 512 : index
    %92 = vector.load %arg13[%c0_55, %c512] : memref<256x576xf32, #tpu.memory_space<vmem>>, vector<256x64xf32>
    tpu.vector_store %arg13[%c0_55, %c512], %91 {strides = array<i32>} : memref<256x576xf32, #tpu.memory_space<vmem>>, vector<256x64xf32>,
    %c0_56 = arith.constant 0 : index
    %c0_57 = arith.constant 0 : index
    %93 = vector.load %arg13[%c0_56, %c0_57] : memref<256x576xf32, #tpu.memory_space<vmem>>, vector<256x576xf32>
    %c0_58 = arith.constant 0 : index
    %c0_59 = arith.constant 0 : index
    %94 = vector.load %arg7[%c0_58, %c0_59] : memref<576x64xf32, #tpu.memory_space<vmem>>, vector<576x64xf32>
    %cst_60 = arith.constant dense<0.000000e+00> : vector<256x64xf32>
    %95 = tpu.matmul %93, %94, %cst_60 {dimension_numbers = #tpu.dot_dimension_numbers<[1], [0], [0], [1], [0, 0, 1, 1], [], []>} : vector<256x576xf32>, vector<576x64xf32>, vector<256x64xf32> -> vector<256x64xf32>
    %c0_61 = arith.constant 0 : index
    %c0_62 = arith.constant 0 : index
    %96 = vector.load %arg8[%c0_61, %c0_62] : memref<1x64xf32, #tpu.memory_space<vmem>>, vector<1x64xf32>
    %97 = vector.broadcast %96 : vector<1x64xf32> to vector<256x64xf32>
    %98 = arith.addf %95, %97 : vector<256x64xf32>
    %cst_63 = arith.constant 0.000000e+00 : f32
    %99 = vector.broadcast %cst_63 : f32 to vector<256x64xf32>
    %100 = arith.maximumf %98, %99 : vector<256x64xf32>
    %c0_64 = arith.constant 0 : index
    %c0_65 = arith.constant 0 : index
    %101 = vector.load %arg9[%c0_64, %c0_65] : memref<64x256xf32, #tpu.memory_space<vmem>>, vector<64x256xf32>
    %cst_66 = arith.constant dense<0.000000e+00> : vector<256x256xf32>
    %102 = tpu.matmul %100, %101, %cst_66 {dimension_numbers = #tpu.dot_dimension_numbers<[1], [0], [0], [1], [0, 0, 1, 1], [], []>} : vector<256x64xf32>, vector<64x256xf32>, vector<256x256xf32> -> vector<256x256xf32>
    %c0_67 = arith.constant 0 : index
    %c0_68 = arith.constant 0 : index
    %103 = vector.load %arg10[%c0_67, %c0_68] : memref<1x256xf32, #tpu.memory_space<vmem>>, vector<1x256xf32>
    %104 = vector.broadcast %103 : vector<1x256xf32> to vector<256x256xf32>
    %105 = arith.addf %102, %104 : vector<256x256xf32>
    %106 = arith.addf %105, %1 : vector<256x256xf32>
    %cst_69 = arith.constant 0.000000e+00 : f32
    %107 = vector.broadcast %cst_69 : f32 to vector<256x256xf32>
    %108 = arith.maximumf %106, %107 : vector<256x256xf32>
    %c0_70 = arith.constant 0 : index
    %c0_71 = arith.constant 0 : index
    %c0_72 = arith.constant 0 : index
    %109 = vector.load %arg11[%c0_70, %c0_71, %c0_72] : memref<1x256x256xf32, #tpu.memory_space<vmem>>, vector<1x256x256xf32>
    %110 = vector.shape_cast %109 : vector<1x256x256xf32> to vector<256x256xf32>
    %111 = vector.shape_cast %108 : vector<256x256xf32> to vector<1x256x256xf32>
    tpu.vector_store %arg11[%c0_70, %c0_71, %c0_72], %111 {strides = array<i32>} : memref<1x256x256xf32, #tpu.memory_space<vmem>>, vector<1x256x256xf32>,
    return
  }
  func.func @transform_0(%arg0: i32, %arg1: i32) -> (i32, i32, i32) {
    %c0_i32 = arith.constant 0 : i32
    %c0_i32_0 = arith.constant 0 : i32
    return %arg0, %arg1, %c0_i32 : i32, i32, i32
  }
  func.func @transform_1(%arg0: i32, %arg1: i32) -> (i32, i32, i32) {
    %c16_i32 = arith.constant 16 : i32
    %0 = arith.muli %arg1, %c16_i32 : i32
    %c1_i32 = arith.constant 1 : i32
    %1 = arith.subi %0, %c1_i32 : i32
    %c0_i32 = arith.constant 0 : i32
    %2 = arith.maxsi %1, %c0_i32 : i32
    %c0_i32_0 = arith.constant 0 : i32
    %c0_i32_1 = arith.constant 0 : i32
    return %arg0, %2, %c0_i32_0 : i32, i32, i32
  }
  func.func @transform_2(%arg0: i32, %arg1: i32) -> (i32, i32, i32) {
    %c1_i32 = arith.constant 1 : i32
    %0 = arith.addi %arg1, %c1_i32 : i32
    %c16_i32 = arith.constant 16 : i32
    %1 = arith.muli %0, %c16_i32 : i32
    %c15_i32 = arith.constant 15 : i32
    %2 = arith.minsi %1, %c15_i32 : i32
    %c0_i32 = arith.constant 0 : i32
    %c0_i32_0 = arith.constant 0 : i32
    return %arg0, %2, %c0_i32 : i32, i32, i32
  }
  func.func @transform_3(%arg0: i32, %arg1: i32) -> (i32, i32) {
    %c0_i32 = arith.constant 0 : i32
    %c0_i32_0 = arith.constant 0 : i32
    %c0_i32_1 = arith.constant 0 : i32
    return %c0_i32, %c0_i32_0 : i32, i32
  }
  func.func @transform_4(%arg0: i32, %arg1: i32) -> (i32, i32) {
    %c0_i32 = arith.constant 0 : i32
    %c0_i32_0 = arith.constant 0 : i32
    %c0_i32_1 = arith.constant 0 : i32
    return %c0_i32, %c0_i32_0 : i32, i32
  }
  func.func @transform_5(%arg0: i32, %arg1: i32) -> (i32, i32) {
    %c0_i32 = arith.constant 0 : i32
    %c0_i32_0 = arith.constant 0 : i32
    %c0_i32_1 = arith.constant 0 : i32
    return %c0_i32, %c0_i32_0 : i32, i32
  }
  func.func @transform_6(%arg0: i32, %arg1: i32) -> (i32, i32) {
    %c0_i32 = arith.constant 0 : i32
    %c0_i32_0 = arith.constant 0 : i32
    %c0_i32_1 = arith.constant 0 : i32
    return %c0_i32, %c0_i32_0 : i32, i32
  }
  func.func @transform_7(%arg0: i32, %arg1: i32) -> (i32, i32) {
    %c0_i32 = arith.constant 0 : i32
    %c0_i32_0 = arith.constant 0 : i32
    %c0_i32_1 = arith.constant 0 : i32
    return %c0_i32, %c0_i32_0 : i32, i32
  }
  func.func @transform_8(%arg0: i32, %arg1: i32) -> (i32, i32) {
    %c0_i32 = arith.constant 0 : i32
    %c0_i32_0 = arith.constant 0 : i32
    %c0_i32_1 = arith.constant 0 : i32
    return %c0_i32, %c0_i32_0 : i32, i32
  }
  func.func @transform_9(%arg0: i32, %arg1: i32) -> (i32, i32, i32) {
    %c0_i32 = arith.constant 0 : i32
    %c0_i32_0 = arith.constant 0 : i32
    return %arg0, %arg1, %c0_i32 : i32, i32, i32
  }
}

</mosaic_0001>

<bundles_post_ra>
// kernel: tpu_custom_call.1
= control target key start
LH: loop header
LB: loop body
LE: loop exit
PB: predicated region body
PF: predicated region fallthrough
CT: control target
= control target key end

     0   :  { %s7981_s0 = inlined_call_operand.vmem [shape: f32[2,256,256], index: 0, kind: input, shape index: {}]   ;;  %s7982_s1 = inlined_call_operand.hbm [shape: f32[2,256,256], index: 1, kind: input, shape index: {}]   ;;  %s7983_s2 = inlined_call_operand.hbm [shape: f32[2,256,256], index: 2, kind: input, shape index: {}]   ;;  %s7984_s3 = inlined_call_operand.vmem [shape: f32[256,64], index: 3, kind: input, shape index: {}]   ;;  %s7985_s4 = inlined_call_operand.vmem [shape: f32[1,64], index: 4, kind: input, shape index: {}]   ;;  %s7986_s5 = inlined_call_operand.vmem [shape: f32[576,64], index: 5, kind: input, shape index: {}]   ;;  %s7987_s6 = inlined_call_operand.vmem [shape: f32[1,64], index: 6, kind: input, shape index: {}]   ;;  %s7988_s7 = inlined_call_operand.vmem [shape: f32[64,256], index: 7, kind: input, shape index: {}]   ;;  %s7989_s8 = inlined_call_operand.vmem [shape: f32[1,256], index: 8, kind: input, shape index: {}]   ;;  %s7990_s9 = inlined_call_operand.hbm [shape: f32[2,256,256], index: 9, kind: output, shape index: {}]  }
   0x1   :  { %8003 = sst [smem:[#allocation17_spill]] %s7982_s1 }
   0x2   :  { %14 = vsyncpa [#allocation5], 0 }
   0x3   :  { %16 = vsyncpa [#allocation5 + $0x1], 0 }
   0x4   :  { %17 = vsyncpa [#allocation8], 0 }
   0x5   :  { %19 = vsyncpa [#allocation8 + $0x1], 0 }
   0x6   :  { %20 = vsyncpa [#allocation6], 0 }
   0x7   :  { %22 = vsyncpa [#allocation6 + $0x1], 0  ;;  %s5704_s30 = smov 0   ;;  %s5706_s10 = smov 0  }
   0x8   :  { %s5708_s11 = smov 0   ;;  %s5710_s12 = smov 0  }
   0x9   :  { %s5712_s13 = smov 0   ;;  %s5714_s14 = smov 0  }
   0xa LB: > { %8004 = sst [smem:[#allocation13_spill]] %s5630_s11  ;;  %s4716_s15 = sadd.s32 4294967295, %s5642_s14   ;;  %s5642_s14 = sphi %s5714_s14, %s28_s14   ;;  %s5638_s13 = sphi %s5712_s13, %s8091_s13   ;;  %s5634_s12 = sphi %s5710_s12, %s8090_s12   ;;  %s5630_s11 = sphi %s5708_s11, %s8086_s11   ;;  %s5626_s10 = sphi %s5706_s10, %s8089_s10   ;;  %s5622_s30 = sphi %s5704_s30, %s8088_s30  }
   0xb   : > { %s4717_s16 = sadd.s32 4294967294, %s5642_s14   ;;  %s40_s17 = sadd.s32 1, %s5638_s13 }
   0xc   : > { %s85_s18 = sadd.s32 1, %s5630_s11  ;;  %p42_p0 = scmp.ge.s32.totalorder %s40_s17, 2 }
   0xd   : > { %p92_p1 = scmp.ne.s32.totalorder %s5630_s11, %s5626_s10  ;;  %p93_p2 = scmp.eq.s32.totalorder %s5642_s14, 0 }
   0xe   : > { %p98_p3 = scmp.ne.s32.totalorder %s5626_s10, %s5622_s30  ;;  %s8093_s17 = smov (%p42_p0, %s40_s17), 0 }
   0xf   : > { %8005 = sst [smem:[#allocation14_spill]] %s8093_s17  ;;  %p5745_p4 = por %p93_p2, %p92_p1 }
  0x10   : > { %p99_p5 = scmp.eq.s32.totalorder %s4716_s15, 0  ;;  %s80_s20 = ssub.s32 %s5638_s13, %s8093_s17 }
  0x11   : > { %p286_p6 = scmp.eq.s32.totalorder %s4716_s15, 1  ;;  %p83_p7 = scmp.eq.s32.totalorder %s80_s20, 0 }
  0x12   : > { %p5751_p8 = por %p99_p5, %p98_p3  ;;  %p292_p10 = scmp.eq.s32.totalorder %s4717_s16, 1 }
  0x13   : > { %p5755_p9 = por %p286_p6, %p92_p1  ;;  %p5374_p13 = scmp.lt.s32.totalorder %s5642_s14, 2 }
  0x14   : > { %s8007_s21 = scalar_select %p5751_p8, 1, 0 }
  0x15   : > { %s8008_s22 = scalar_select %p5755_p9, 1, 0 }
  0x16   : > { %s5760_s23 = scalar_select %p83_p7, %s5630_s11, %s85_s18  }
  0x17   : > { %p5762_p11 = por %p292_p10, %p98_p3  ;;  %s5769_s25 = sand.u32 1, %s5630_s11  }
  0x18   : > { %8009 = sst [smem:[#allocation15_spill]] %s5760_s23  ;;  %s7991_s26 = sshll.u32 %s5769_s25, 5 }
  0x19   : > { %s8010_s24 = scalar_select %p5762_p11, 1, 0 }
  0x1a   : > { %s7992_s27 = sshll.u32 %s5638_s13, 13  ;;  %s8012_s1 = sld [smem:[#allocation17_spill]] }
  0x1b   : > { %8011 = sst [smem:[#allocation16_spill]] %s8010_s24  ;;  %s348_s16 = scalar_lea.vmem [#allocation4], %s7991_s26 }
  0x1c   : > { %s362_s18 = sshll.u32 %s348_s16, 4  ;;  %p5786_p0 = pnand %p5374_p13, %p5745_p4  ;;  %s5782_s18 = int_to_ptr.vmem [resolvable:$true] %s362_s18 }
  0x1e   : > { %p5498_p3 = pneg %p5786_p0 }
  0x20   : > { %s5778_s15 = scalar_lea.hbm %s8012_s1, %s7992_s27  ;;  %s5501_s19 = scalar_lea.hbm %s8012_s1, 16384 }
  0x21   : > { %s5496_s29 = scalar_lea.hbm %s5778_s15, 512  ;;  %p5502_p4 = scmp.lt.u32.totalorder %s5778_s15, %s8012_s1 }
  0x22   : > { %p5497_p2 = scmp.ne.s32.totalorder %s5778_s15, %s5496_s29  ;;  %p5503_p7 = scmp.lt.u32.totalorder %s5501_s19, %s5496_s29 }
  0x23   : > { %p5505_p13 = scmp.lt.u32.totalorder %s5496_s29, %s5778_s15 }
  0x24   : > { %p5499_p5 = pnand %p5498_p3, %p5497_p2  ;;  %p5504_p10 = por %p5503_p7, %p5502_p4 }
  0x26   : > { %p5500_p6 = pneg %p5499_p5  ;;  %p5506_p12 = por %p5505_p13, %p5504_p10 }
  0x28   : > { %p5507_p1 = pnand %p5506_p12, %p5500_p6 }
  0x2a   : > { %5510 = shalt.err (!%p5507_p1)
}
  0x2b   : > { %s5511_s28 = scalar_lea.vmem %s5782_s18, 512  ;;  %s5644_s26 = smov [#allocation4]  }
  0x2c   : > { %p5512_p2 = scmp.ne.s32.totalorder %s5782_s18, %s5511_s28  ;;  %s5516_s16 = sshll.u32 %s5644_s26, 4  ;;  %s5517_s16 = int_to_ptr.vmem [resolvable:$false] %s5516_s16 }
  0x2d   : > { %s5518_s17 = scalar_lea.vmem %s5517_s16, 1024  ;;  %p5519_p9 = scmp.lt.s32.totalorder %s5782_s18, %s5517_s16 }
  0x2e   : > { %p5514_p5 = pnand %p5512_p2, %p5498_p3  ;;  %p5520_p4 = scmp.lt.s32.totalorder %s5518_s17, %s5511_s28 }
  0x30   : > { %p5515_p11 = pneg %p5514_p5  ;;  %p5521_p7 = por %p5520_p4, %p5519_p9 }
  0x32   : > { %p5522_p10 = pnand %p5521_p7, %p5515_p11 }
  0x34   : > { %5525 = shalt.err (!%p5522_p10)
}
  0x35   : > { %s7997_s27 = smov 256   ;;  %s5646_s29 = smov 16  }
  0x36   : > { %s8014_s28 = scalar_lea.sflag [#allocation5], %s5769_s25  ;;  %p398_p9 = scmp.lt.s32.totalorder %s5642_s14, 3 }
  0x37   : > { %5366 = dma.hbm_to_vmem [thread:$0]  (!%p5786_p0), %s5778_s15, 512, %s5782_s18, %s8014_s28, %s7997_s27, %s7997_s27, %s5646_s29  }
  0x38   : > { %s8015_s19 = sshll.u32 %s5638_s13, 13  ;;  %p8016_p11 = scmp.ge.s32.totalorder %s5642_s14, 1 }
  0x39   : > { %s4837_s26 = sadd.s32 7680, %s8015_s19  ;;  %s8018_s11 = sshll.u32 %s5769_s25, 5 }
  0x3a   : > { %p5827_p12 = pnand %p8016_p11, %p398_p9  ;;  %s5834_s23 = scalar_lea.hbm %s7983_s2, %s4837_s26 }
  0x3b   : > { %s376_s24 = scalar_lea.vmem [#allocation7], %s8018_s11  ;;  %s373_s18 = scalar_lea.sflag [#allocation8], %s5769_s25 }
  0x3c   : > { %s390_s15 = sshll.u32 %s376_s24, 4  ;;  %s5526_s28 = scalar_lea.hbm %s5834_s23, 512  ;;  %s5838_s15 = int_to_ptr.vmem [resolvable:$true] %s390_s15 }
  0x3d   : > { %p5527_p1 = scmp.ne.s32.totalorder %s5834_s23, %s5526_s28  ;;  %s5531_s26 = scalar_lea.hbm %s7983_s2, 16384 }
  0x3e   : > { %p5532_p2 = scmp.lt.u32.totalorder %s5834_s23, %s7983_s2  ;;  %p5533_p5 = scmp.lt.u32.totalorder %s5531_s26, %s5526_s28 }
  0x3f   : > { %p5529_p6 = pnand %p5527_p1, %p5498_p3  ;;  %p5535_p7 = scmp.lt.u32.totalorder %s5526_s28, %s5834_s23 }
  0x40   : > { %p5534_p4 = por %p5533_p5, %p5532_p2 }
  0x41   : > { %p5530_p13 = pneg %p5529_p6 }
  0x42   : > { %p5536_p10 = por %p5535_p7, %p5534_p4 }
  0x44   : > { %p5537_p9 = pnand %p5536_p10, %p5530_p13 }
  0x46   : > { %5540 = shalt.err (!%p5537_p9)
}
  0x47   : > { %s5541_s11 = scalar_lea.vmem %s5838_s15, 512  ;;  %s5647_s24 = smov [#allocation7]  }
  0x48   : > { %p5542_p11 = scmp.ne.s32.totalorder %s5838_s15, %s5541_s11  ;;  %s5546_s19 = sshll.u32 %s5647_s24, 4  ;;  %s5547_s19 = int_to_ptr.vmem [resolvable:$false] %s5546_s19 }
  0x49   : > { %s5548_s27 = scalar_lea.vmem %s5547_s19, 1024  ;;  %p5549_p8 = scmp.lt.s32.totalorder %s5838_s15, %s5547_s19 }
  0x4a   : > { %p5544_p1 = pnand %p5542_p11, %p5498_p3  ;;  %p5550_p2 = scmp.lt.s32.totalorder %s5548_s27, %s5541_s11 }
  0x4c   : > { %p5545_p6 = pneg %p5544_p1  ;;  %p5551_p5 = por %p5550_p2, %p5549_p8 }
  0x4e   : > { %p5552_p4 = pnand %p5551_p5, %p5545_p6 }
  0x50   : > { %5555 = shalt.err (!%p5552_p4)
}
  0x51   : > { %s8019_s28 = smov 256   ;;  %402 = sbr.rel (%p5827_p12) target bundleno = 1216 (0x4c0), region = 56 }
  0x52   : > { %5369 = dma.hbm_to_vmem [thread:$0]  (!%p5786_p0), %s5834_s23, 512, %s5838_s15, %s373_s18, %s8019_s28, %s8019_s28, %s5646_s29  }
  0x53   : > { %s5872_s1 = sand.u32 (!%p5827_p12), 1, %s5626_s10   ;;  %p8020_p8 = scmp.ne.s32.totalorder (!%p5827_p12), %s8007_s21, 0 }
  0x54   : > { %s4727_s26 = sshll.u32 (!%p5827_p12), %s5872_s1, 5  ;;  %s405_s17 = scalar_lea.sflag (!%p5827_p12), [#allocation5], %s5872_s1 }
  0x55   : > { %s5876_s20 = scalar_lea.vmem (!%p5827_p12), [#allocation4], %s4727_s26 }
  0x58   : > { %5609 = dma.done.wait (%p8020_p8), %s405_s17, 512  }
  0x59   : > { %5611 = vsyncadd (%p8020_p8), %s405_s17, 4294966784  ;;  %s414_s23 = scalar_lea.sflag [#allocation8], %s5872_s1  ;;  %s5883_s25 = scalar_lea.vmem [#allocation7], %s4727_s26 }
  0x5a   : > { %5613 = dma.done.wait (%p8020_p8), %s414_s23, 512  }
  0x5b   : > { %5615 = vsyncadd (%p8020_p8), %s414_s23, 4294966784  ;;  %v7999_v0 = vmov 0.0|0.0   ;;  %p468_p0 = scmp.lt.s32.totalorder %s5634_s12, 1  ;;  %v553_v1 = vld [vmem:[%s7984_s3] sm:$0xff]  ;;  %v554_v2 = vld [vmem:[%s7984_s3 + $0x8] sm:$0xff]  ;;  %vm849_vm0 = vcmask 523264  }
  0x5c   : > { %5021 = vmatprep.subr.bf16.mxu0 %v7999_v0  ;;  %v555_v3 = vld [vmem:[%s7984_s3 + $0x10] sm:$0xff]  ;;  %v5900_v4 = vpack.c.bf16 %v554_v2, %v553_v1  ;;  %v556_v5 = vld [vmem:[%s7984_s3 + $0x18] sm:$0xff]  ;;  %v569_v7 = vld [vmem:[%s7984_s3 + $0x80] sm:$0xff]  ;;  %s5650_s24 = smov 64   ;;  %s4729_s18 = sshll.u32 %s5872_s1, 9 }
  0x5d   : > { %s469_s27 = scalar_select %p468_p0, %s5634_s12, 1  ;;  %v5907_v6 = vpack.c.bf16 %v556_v5, %v555_v3  ;;  %v570_v8 = vld [vmem:[%s7984_s3 + $0x88] sm:$0xff]  ;;  %v557_v9 = vld [vmem:[%s7984_s3 + $0x20] sm:$0xff]  ;;  %v571_v12 = vld [vmem:[%s7984_s3 + $0x90] sm:$0xff] }
  0x5e   : > { %5023 = vmatpush1.bf16.msra.mxu0 %v5900_v4  ;;  %v558_v10 = vld [vmem:[%s7984_s3 + $0x28] sm:$0xff]  ;;  %v5922_v11 = vpack.c.bf16 %v570_v8, %v569_v7  ;;  %v572_v13 = vld [vmem:[%s7984_s3 + $0x98] sm:$0xff]  ;;  %v573_v15 = vld [vmem:[%s7984_s3 + $0xa0] sm:$0xff]  ;;  %s4839_s11 = sshll.u32 %s5634_s12, 13  ;;  %s4566_s12 = scalar_lea.sflag [#allocation6], %s5872_s1 }
  0x5f   : > { %5024 = vmatprep.subr.bf16.mxu0 %v7999_v0  ;;  %v5931_v14 = vpack.c.bf16 %v572_v13, %v571_v12  ;;  %v574_v16 = vld [vmem:[%s7984_s3 + $0xa8] sm:$0xff]  ;;  %s4838_s29 = sshll.u32 %s469_s27, 9  ;;  %v5940_v17 = vpack.c.bf16 %v558_v10, %v557_v9  ;;  %v559_v18 = vld [vmem:[%s7984_s3 + $0x30] sm:$0xff]  ;;  %v560_v19 = vld [vmem:[%s7984_s3 + $0x38] sm:$0xff]  ;;  %s7928_s19 = scalar_lea.hbm %s7990_s9, %s4839_s11 }
  0x60   : > { %5070 = vmatprep.subr.bf16.mxu1 %v5922_v11  ;;  %v5951_v20 = vpack.c.bf16 %v574_v16, %v573_v15  ;;  %v575_v21 = vld [vmem:[%s7984_s3 + $0xb0] sm:$0xff]  ;;  %v576_v22 = vld [vmem:[%s7984_s3 + $0xb8] sm:$0xff]  ;;  %s5962_s17 = scalar_lea.vmem %s7981_s0, %s4838_s29  ;;  %v5966_v24 = vpack.c.bf16 %v560_v19, %v559_v18  ;;  %v561_v25 = vld [vmem:[%s7984_s3 + $0x40] sm:$0xff]  ;;  %s7737_s29 = scalar_lea.vmem [#allocation9], %s4729_s18 }
  0x61   : > { %5072 = vmatpush3.bf16.msra.mxu1 %v5900_v4  ;;  %v885_v23 = vld [vmem:[%s5876_s20 + $0x8] sm:$0xff]  ;;  %v562_v26 = vld [vmem:[%s7984_s3 + $0x48] sm:$0xff]  ;;  %v5977_v27 = vpack.c.bf16 %v576_v22, %v575_v21  ;;  %v577_v29 = vld [vmem:[%s7984_s3 + $0xc0] sm:$0xff]  ;;  %s4582_s27 = sshll.u32 %s7737_s29, 4  ;;  %p8081_p12 = scmp.ne.s32.totalorder %s8008_s22, 0  ;;  %s7930_s27 = int_to_ptr.vmem [resolvable:$true] %s4582_s27 }
  0x62   : > { %5026 = vmatpush1.bf16.msra.mxu0 %v5907_v6  ;;  %5074 = vmatprep.subr.bf16.mxu1 %v5931_v14  ;;  %v490_v28 = vld [vmem:[%s5962_s17 + $0x8] sm:$0xff]  ;;  %v5987_v31 = vpack.c.bf16 %v562_v26, %v561_v25  ;;  %v563_v32 = vld [vmem:[%s7984_s3 + $0x50] sm:$0xff]  ;;  %v564_v33 = vld [vmem:[%s7984_s3 + $0x58] sm:$0xff]  ;;  %s5556_s28 = scalar_lea.vmem %s7930_s27, 8192 }
  0x63   : > { %5027 = vmatprep.subr.bf16.mxu0 %v7999_v0  ;;  %v578_v30 = vld [vmem:[%s7984_s3 + $0xc8] sm:$0xff]  ;;  %952 = vmatprep.mubr.f32.mxu1 %v885_v23  ;;  %v579_v35 = vld [vmem:[%s7984_s3 + $0xd0] sm:$0xff]  ;;  %v580_v36 = vld [vmem:[%s7984_s3 + $0xd8] sm:$0xff]  ;;  %v5037_v37 = vpack.c.bf16 %v564_v33, %v563_v32  ;;  %p5557_p3 = scmp.ne.s32.totalorder %s7930_s27, %s5556_s28 }
  0x64   : > { %656 = vmatprep.mubr.f32.mxu0 %v490_v28  ;;  %v5058_v34 = vpack.c.bf16 %v578_v30, %v577_v29  ;;  %v565_v38 = vld [vmem:[%s7984_s3 + $0x60] sm:$0xff]  ;;  %v566_v39 = vld [vmem:[%s7984_s3 + $0x68] sm:$0xff]  ;;  %v5061_v40 = vpack.c.bf16 %v580_v36, %v579_v35  ;;  %v567_v44 = vld [vmem:[%s7984_s3 + $0x70] sm:$0xff] }
  0x65   : > { %5076 = vmatpush3.bf16.msra.mxu1 %v5907_v6  ;;  %v581_v41 = vld [vmem:[%s7984_s3 + $0xe0] sm:$0xff]  ;;  %v582_v42 = vld [vmem:[%s7984_s3 + $0xe8] sm:$0xff]  ;;  %v5040_v43 = vpack.c.bf16 %v566_v39, %v565_v38  ;;  %v568_v45 = vld [vmem:[%s7984_s3 + $0x78] sm:$0xff]  ;;  %p5558_p13 = pnand %p5557_p3, %p8081_p12 }
  0x66   : > { %5029 = vmatpush1.bf16.msra.mxu0 %v5940_v17  ;;  %5078 = vmatprep.subr.bf16.mxu1 %v5951_v20  ;;  %v5064_v46 = vpack.c.bf16 %v582_v42, %v581_v41  ;;  %v583_v47 = vld [vmem:[%s7984_s3 + $0xf0] sm:$0xff]  ;;  %v584_v48 = vld [vmem:[%s7984_s3 + $0xf8] sm:$0xff]  ;;  %v5043_v49 = vpack.c.bf16 %v568_v45, %v567_v44  ;;  %v887_v52 = vld [vmem:[%s5876_s20 + $0x18] sm:$0xff] }
  0x67   : > { %5030 = vmatprep.subr.bf16.mxu0 %v7999_v0  ;;  %v5067_v50 = vpack.c.bf16 %v584_v48, %v583_v47  ;;  %v884_v51 = vld [vmem:[%s5876_s20] sm:$0xff]  ;;  %v886_v53 = vld [vmem:[%s5876_s20 + $0x10] sm:$0xff]  ;;  %v973_v54 = vld [vmem:[%s5883_s25 + $0x8] sm:$0xff]  ;;  %p5559_p7 = pneg %p5558_p13 }
  0x68   : > { %v489_v55 = vld [vmem:[%s5962_s17] sm:$0xff]  ;;  %v492_v56 = vld [vmem:[%s5962_s17 + $0x18] sm:$0xff]  ;;  %v491_v57 = vld [vmem:[%s5962_s17 + $0x10] sm:$0xff] }
  0x69   : > { %5080 = vmatpush3.bf16.msra.mxu1 %v5940_v17  ;;  %v494_v58 = vld [vmem:[%s5962_s17 + $0x28] sm:$0xff]  ;;  %v972_v59 = vld [vmem:[%s5883_s25] sm:$0xff]  ;;  %v493_v60 = vld [vmem:[%s5962_s17 + $0x20] sm:$0xff] }
  0x6a   : > { %5032 = vmatpush1.bf16.msra.mxu0 %v5966_v24  ;;  %5082 = vmatprep.subr.bf16.mxu1 %v5977_v27  ;;  %v496_v61 = vld [vmem:[%s5962_s17 + $0x38] sm:$0xff]  ;;  %v495_v62 = vld [vmem:[%s5962_s17 + $0x30] sm:$0xff]  ;;  %v498_v63 = vld [vmem:[%s5962_s17 + $0x48] sm:$0xff] }
  0x6b   : > { %5033 = vmatprep.subr.bf16.mxu0 %v7999_v0  ;;  %v497_v1 = vld [vmem:[%s5962_s17 + $0x40] sm:$0xff]  ;;  %v500_v2 = vld [vmem:[%s5962_s17 + $0x58] sm:$0xff]  ;;  %v499_v3 = vld [vmem:[%s5962_s17 + $0x50] sm:$0xff] }
  0x6c   : > { %v501_v5 = vld [vmem:[%s5962_s17 + $0x60] sm:$0xff]  ;;  %v503_v7 = vld [vmem:[%s5962_s17 + $0x70] sm:$0xff]  ;;  %v506_v8 = vld [vmem:[%s5962_s17 + $0x88] sm:$0xff] }
  0x6d   : > { %5084 = vmatpush3.bf16.msra.mxu1 %v5966_v24  ;;  %v505_v9 = vld [vmem:[%s5962_s17 + $0x80] sm:$0xff]  ;;  %v508_v10 = vld [vmem:[%s5962_s17 + $0x98] sm:$0xff]  ;;  %v510_v12 = vld [vmem:[%s5962_s17 + $0xa8] sm:$0xff] }
  0x6e   : > { %5035 = vmatpush1.bf16.msra.mxu0 %v5987_v31  ;;  %5086 = vmatprep.subr.bf16.mxu1 %v5058_v34  ;;  %v509_v13 = vld [vmem:[%s5962_s17 + $0xa0] sm:$0xff]  ;;  %v511_v15 = vld [vmem:[%s5962_s17 + $0xb0] sm:$0xff]  ;;  %v514_v16 = vld [vmem:[%s5962_s17 + $0xc8] sm:$0xff] }
  0x6f   : > { %5036 = vmatprep.subr.bf16.mxu0 %v7999_v0  ;;  %v516_v18 = vld [vmem:[%s5962_s17 + $0xd8] sm:$0xff]  ;;  %v515_v19 = vld [vmem:[%s5962_s17 + $0xd0] sm:$0xff]  ;;  %v517_v21 = vld [vmem:[%s5962_s17 + $0xe0] sm:$0xff] }
  0x70   : > { %v520_v22 = vld [vmem:[%s5962_s17 + $0xf8] sm:$0xff]  ;;  %v519_v23 = vld [vmem:[%s5962_s17 + $0xf0] sm:$0xff]  ;;  %v521_v25 = vld [vmem:[%s5962_s17 + $0x100] sm:$0xff] }
  0x71   : > { %5088 = vmatpush3.bf16.msra.mxu1 %v5987_v31  ;;  %v524_v26 = vld [vmem:[%s5962_s17 + $0x118] sm:$0xff]  ;;  %v526_v28 = vld [vmem:[%s5962_s17 + $0x128] sm:$0xff]  ;;  %v525_v29 = vld [vmem:[%s5962_s17 + $0x120] sm:$0xff] }
  0x72   : > { %5038 = vmatpush1.bf16.msra.mxu0 %v5037_v37  ;;  %5090 = vmatprep.subr.bf16.mxu1 %v5061_v40  ;;  %v528_v30 = vld [vmem:[%s5962_s17 + $0x138] sm:$0xff]  ;;  %v530_v32 = vld [vmem:[%s5962_s17 + $0x148] sm:$0xff]  ;;  %v529_v33 = vld [vmem:[%s5962_s17 + $0x140] sm:$0xff] }
  0x73   : > { %5039 = vmatprep.subr.bf16.mxu0 %v7999_v0  ;;  %v531_v35 = vld [vmem:[%s5962_s17 + $0x150] sm:$0xff]  ;;  %v534_v36 = vld [vmem:[%s5962_s17 + $0x168] sm:$0xff]  ;;  %v533_v38 = vld [vmem:[%s5962_s17 + $0x160] sm:$0xff] }
  0x74   : > { %v536_v39 = vld [vmem:[%s5962_s17 + $0x178] sm:$0xff]  ;;  %v538_v41 = vld [vmem:[%s5962_s17 + $0x188] sm:$0xff]  ;;  %v537_v42 = vld [vmem:[%s5962_s17 + $0x180] sm:$0xff] }
  0x75   : > { %5092 = vmatpush3.bf16.msra.mxu1 %v5037_v37  ;;  %v539_v44 = vld [vmem:[%s5962_s17 + $0x190] sm:$0xff]  ;;  %v542_v45 = vld [vmem:[%s5962_s17 + $0x1a8] sm:$0xff]  ;;  %v544_v47 = vld [vmem:[%s5962_s17 + $0x1b8] sm:$0xff] }
  0x76   : > { %5041 = vmatpush1.bf16.msra.mxu0 %v5040_v43  ;;  %5094 = vmatprep.subr.bf16.mxu1 %v5064_v46  ;;  %v3174_v48 = vld [vmem:[%s7986_s5 + $0x200] sm:$0xff] }
  0x77   : > { %5042 = vmatprep.subr.bf16.mxu0 %v7999_v0 }
  0x79   : > { %5096 = vmatpush3.bf16.msra.mxu1 %v5040_v43 }
  0x7a   : > { %5044 = vmatpush1.bf16.msra.mxu0 %v5043_v49  ;;  %5098 = vmatprep.subr.bf16.mxu1 %v5067_v50 }
  0x7b   : > { %5045 = vmatprep.subr.bf16.mxu0 %v7999_v0 }
  0x7d   : > { %5100 = vmatpush3.bf16.msra.mxu1 %v5043_v49 }
  0x7e   : > { %5047 = vmatpush1.bf16.msra.mxu0 %v5922_v11  ;;  %5102 = vmatprep.subr.bf16.mxu1 %v5922_v11  ;;  %v507_v11 = vld [vmem:[%s5962_s17 + $0x90] sm:$0xff] }
  0x7f   : > { %5048 = vmatprep.subr.bf16.mxu0 %v7999_v0 }
  0x80   : > { %953 = vmatmul.mubr.f32.vlgmr.msra.gmra.mrb[0].mxu1 %v884_v51  ;;  %v543_v51 = vld [vmem:[%s5962_s17 + $0x1b0] sm:$0xff] }
  0x81   : > { %957 = vmatprep.mubr.f32.mxu1 %v887_v52  ;;  %5104 = vmatpush3.bf16.msra.mxu1 %v5900_v4  ;;  %v502_v4 = vld [vmem:[%s5962_s17 + $0x68] sm:$0xff] }
  0x82   : > { %5050 = vmatpush1.bf16.msra.mxu0 %v5931_v14  ;;  %5106 = vmatprep.subr.bf16.mxu1 %v5931_v14  ;;  %v512_v14 = vld [vmem:[%s5962_s17 + $0xb8] sm:$0xff]  ;;  %v546_v52 = vld [vmem:[%s5962_s17 + $0x1c8] sm:$0xff] }
  0x83   : > { %5051 = vmatprep.subr.bf16.mxu0 %v7999_v0 }
  0x84   : > { %958 = vmatmul.mubr.f32.gmra.mrb[2].mxu1 %v886_v53  ;;  %v3176_v53 = vld [vmem:[%s7986_s5 + $0x210] sm:$0xff] }
  0x85   : > { %5108 = vmatpush3.bf16.msra.mxu1 %v5907_v6  ;;  %1040 = vmatprep.mubr.f32.mxu1 %v973_v54  ;;  %v504_v6 = vld [vmem:[%s5962_s17 + $0x78] sm:$0xff] }
  0x86   : > { %5053 = vmatpush1.bf16.msra.mxu0 %v5951_v20  ;;  %5110 = vmatprep.subr.bf16.mxu1 %v5951_v20  ;;  %v518_v20 = vld [vmem:[%s5962_s17 + $0xe8] sm:$0xff]  ;;  %v3177_v54 = vld [vmem:[%s7986_s5 + $0x218] sm:$0xff] }
  0x87   : > { %5054 = vmatprep.subr.bf16.mxu0 %v7999_v0 }
  0x89   : > { %5112 = vmatpush3.bf16.msra.mxu1 %v5940_v17  ;;  %v513_v17 = vld [vmem:[%s5962_s17 + $0xc0] sm:$0xff] }
  0x8a   : > { %5056 = vmatpush1.bf16.msra.mxu0 %v5977_v27  ;;  %5114 = vmatprep.subr.bf16.mxu1 %v5977_v27  ;;  %v523_v27 = vld [vmem:[%s5962_s17 + $0x110] sm:$0xff] }
  0x8b   : > { %5057 = vmatprep.subr.bf16.mxu0 %v7999_v0 }
  0x8d   : > { %5116 = vmatpush3.bf16.msra.mxu1 %v5966_v24  ;;  %v522_v24 = vld [vmem:[%s5962_s17 + $0x108] sm:$0xff] }
  0x8e   : > { %5059 = vmatpush1.bf16.msra.mxu0 %v5058_v34  ;;  %5118 = vmatprep.subr.bf16.mxu1 %v5058_v34  ;;  %v532_v34 = vld [vmem:[%s5962_s17 + $0x158] sm:$0xff] }
  0x8f   : > { %5060 = vmatprep.subr.bf16.mxu0 %v7999_v0 }
  0x91   : > { %5120 = vmatpush3.bf16.msra.mxu1 %v5987_v31  ;;  %v527_v31 = vld [vmem:[%s5962_s17 + $0x130] sm:$0xff] }
  0x92   : > { %5062 = vmatpush1.bf16.msra.mxu0 %v5061_v40  ;;  %5122 = vmatprep.subr.bf16.mxu1 %v5061_v40  ;;  %v535_v40 = vld [vmem:[%s5962_s17 + $0x170] sm:$0xff] }
  0x93   : > { %5063 = vmatprep.subr.bf16.mxu0 %v7999_v0 }
  0x95   : > { %5124 = vmatpush3.bf16.msra.mxu1 %v5037_v37  ;;  %v8001_v37 = vmov 0.0  }
  0x96   : > { %5065 = vmatpush1.bf16.msra.mxu0 %v5064_v46  ;;  %5126 = vmatprep.subr.bf16.mxu1 %v5064_v46  ;;  %1058 = vst.msk [vmem:[#allocation2] sm:$0xff] %vm849_vm0, %v8001_v37  ;;  %1059 = vst.msk [vmem:[#allocation2 + $0x128] sm:$0xff] %vm849_vm0, %v8001_v37  ;;  %v541_v46 = vld [vmem:[%s5962_s17 + $0x1a0] sm:$0xff] }
  0x97   : > { %5066 = vmatprep.subr.bf16.mxu0 %v7999_v0 }
  0x99   : > { %5128 = vmatpush3.bf16.msra.mxu1 %v5040_v43  ;;  %v540_v43 = vld [vmem:[%s5962_s17 + $0x198] sm:$0xff] }
  0x9a   : > { %5068 = vmatpush1.bf16.msra.mxu0 %v5067_v50  ;;  %5130 = vmatprep.subr.bf16.mxu1 %v5067_v50 }
  0x9d   : > { %657 = vmatmul.mubr.f32.vlgmr.msra.gmra.mrb[0].mxu0 %v489_v55  ;;  %5132 = vmatpush3.bf16.msra.mxu1 %v5043_v49  ;;  %v3175_v49 = vld [vmem:[%s7986_s5 + $0x208] sm:$0xff]  ;;  %v5233_v55 = vpack.c.bf16 %v3177_v54, %v3176_v53  ;;  %v3129_v53 = vld [vmem:[%s7986_s5 + $0x98] sm:$0xff] }
  0x9e   : > { %661 = vmatprep.mubr.f32.mxu0 %v492_v56  ;;  %5133 = vmatprep.subr.bf16.mxu1 %v7999_v0  ;;  %v5229_v50 = vpack.c.bf16 %v3175_v49, %v3174_v48  ;;  %v545_v56 = vld [vmem:[%s5962_s17 + $0x1c0] sm:$0xff]  ;;  %v3127_v48 = vld [vmem:[%s7986_s5 + $0x88] sm:$0xff] }
  0xa0   : > { %1041 = vmatmul.mubr.f32.vlgmr.msra.gmra.mrb[4].mxu1 %v972_v59  ;;  %5230 = vmatprep.subr.bf16.mxu0 %v5229_v50  ;;  %v3179_v59 = vld [vmem:[%s7986_s5 + $0x228] sm:$0xff] }
  0xa1   : > { %662 = vmatmul.mubr.f32.gmra.mrb[2].mxu0 %v491_v57  ;;  %v548_v57 = vld [vmem:[%s5962_s17 + $0x1d8] sm:$0xff] }
  0xa2   : > { %666 = vmatprep.mubr.f32.mxu0 %v494_v58  ;;  %5232 = vmatpush3.bf16.msra.mxu0 %v5229_v50  ;;  %v3178_v58 = vld [vmem:[%s7986_s5 + $0x220] sm:$0xff] }
  0xa3   : > { %5234 = vmatprep.subr.bf16.mxu0 %v5233_v55 }
  0xa5   : > { %667 = vmatmul.mubr.f32.gmra.mrb[4].mxu0 %v493_v60  ;;  %v5237_v60 = vpack.c.bf16 %v3179_v59, %v3178_v58  ;;  %v3131_v59 = vld [vmem:[%s7986_s5 + $0xa8] sm:$0xff] }
  0xa6   : > { %671 = vmatprep.mubr.f32.mxu0 %v496_v61  ;;  %5236 = vmatpush3.bf16.msra.mxu0 %v5233_v55  ;;  %v547_v61 = vld [vmem:[%s5962_s17 + $0x1d0] sm:$0xff] }
  0xa7   : > { %5238 = vmatprep.subr.bf16.mxu0 %v5237_v60 }
  0xa9   : > { %672 = vmatmul.mubr.f32.gmra.mrb[6].mxu0 %v495_v62  ;;  %v550_v62 = vld [vmem:[%s5962_s17 + $0x1e8] sm:$0xff] }
  0xaa   : > { %676 = vmatprep.mubr.f32.mxu0 %v498_v63  ;;  %5240 = vmatpush3.bf16.msra.mxu0 %v5237_v60  ;;  %v3180_v63 = vld [vmem:[%s7986_s5 + $0x230] sm:$0xff] }
  0xad   : > { %677 = vmatmul.mubr.f32.gmra.mrb[8].mxu0 %v497_v1  ;;  %v3181_v1 = vld [vmem:[%s7986_s5 + $0x238] sm:$0xff] }
  0xae   : > { %681 = vmatprep.mubr.f32.mxu0 %v500_v2  ;;  %v5241_v2 = vpack.c.bf16 %v3181_v1, %v3180_v63 }
  0xb0   : > { %5242 = vmatprep.subr.bf16.mxu0 %v5241_v2 }
  0xb1   : > { %682 = vmatmul.mubr.f32.gmra.mrb[10].mxu0 %v499_v3  ;;  %v549_v3 = vld [vmem:[%s5962_s17 + $0x1e0] sm:$0xff] }
  0xb2   : > { %686 = vmatprep.mubr.f32.mxu0 %v502_v4  ;;  %v975_v4 = vld [vmem:[%s5883_s25 + $0x18] sm:$0xff]  ;;  %5244 = vmatpush3.bf16.msra.mxu0 %v5241_v2 }
  0xb3   : > { %1045 = vmatprep.mubr.f32.mxu1 %v975_v4  ;;  %v3135_v4 = vld [vmem:[%s7986_s5 + $0xc8] sm:$0xff] }
  0xb5   : > { %687 = vmatmul.mubr.f32.gmra.mrb[12].mxu0 %v501_v5  ;;  %v552_v5 = vld [vmem:[%s5962_s17 + $0x1f8] sm:$0xff] }
  0xb6   : > { %691 = vmatprep.mubr.f32.mxu0 %v504_v6  ;;  %v974_v6 = vld [vmem:[%s5883_s25 + $0x10] sm:$0xff] }
  0xb7   : > { %1046 = vmatmul.mubr.f32.gmra.mrb[6].mxu1 %v974_v6 }
  0xb9   : > { %692 = vmatmul.mubr.f32.gmra.mrb[14].mxu0 %v503_v7  ;;  %v551_v7 = vld [vmem:[%s5962_s17 + $0x1f0] sm:$0xff] }
  0xba   : > { %696 = vmatprep.mubr.f32.mxu0 %v506_v8  ;;  %v3110_v8 = vld [vmem:[%s7986_s5] sm:$0xff] }
  0xbd   : > { %697 = vmatmul.mubr.f32.gmra.mrb[16].mxu0 %v505_v9  ;;  %v3111_v9 = vld [vmem:[%s7986_s5 + $0x8] sm:$0xff] }
  0xbe   : > { %701 = vmatprep.mubr.f32.mxu0 %v508_v10  ;;  %v5134_v10 = vpack.c.bf16 %v3111_v9, %v3110_v8 }
  0xc0   : > { %5135 = vmatpush1.bf16.msra.mxu1 %v5134_v10 }
  0xc1   : > { %702 = vmatmul.mubr.f32.gmra.mrb[18].mxu0 %v507_v11  ;;  %5136 = vmatprep.subr.bf16.mxu1 %v7999_v0  ;;  %v3112_v11 = vld [vmem:[%s7986_s5 + $0x10] sm:$0xff] }
  0xc2   : > { %706 = vmatprep.mubr.f32.mxu0 %v510_v12  ;;  %v3113_v12 = vld [vmem:[%s7986_s5 + $0x18] sm:$0xff] }
  0xc5   : > { %707 = vmatmul.mubr.f32.gmra.mrb[20].mxu0 %v509_v13  ;;  %v5137_v13 = vpack.c.bf16 %v3113_v12, %v3112_v11  ;;  %v3136_v11 = vld [vmem:[%s7986_s5 + $0xd0] sm:$0xff]  ;;  %v3137_v12 = vld [vmem:[%s7986_s5 + $0xd8] sm:$0xff] }
  0xc6   : > { %711 = vmatprep.mubr.f32.mxu0 %v512_v14  ;;  %v3114_v14 = vld [vmem:[%s7986_s5 + $0x20] sm:$0xff] }
  0xc7   : > { %5138 = vmatpush1.bf16.msra.mxu1 %v5137_v13  ;;  %v5173_v13 = vpack.c.bf16 %v3137_v12, %v3136_v11 }
  0xc8   : > { %5139 = vmatprep.subr.bf16.mxu1 %v7999_v0 }
  0xc9   : > { %712 = vmatmul.mubr.f32.gmra.mrb[22].mxu0 %v511_v15  ;;  %v3115_v15 = vld [vmem:[%s7986_s5 + $0x28] sm:$0xff] }
  0xca   : > { %716 = vmatprep.mubr.f32.mxu0 %v514_v16  ;;  %v5140_v16 = vpack.c.bf16 %v3115_v15, %v3114_v14 }
  0xcc   : > { %5141 = vmatpush1.bf16.msra.mxu1 %v5140_v16 }
  0xcd   : > { %717 = vmatmul.mubr.f32.gmra.mrb[24].mxu0 %v513_v17  ;;  %5142 = vmatprep.subr.bf16.mxu1 %v7999_v0  ;;  %v3116_v17 = vld [vmem:[%s7986_s5 + $0x30] sm:$0xff] }
  0xce   : > { %721 = vmatprep.mubr.f32.mxu0 %v516_v18  ;;  %v3117_v18 = vld [vmem:[%s7986_s5 + $0x38] sm:$0xff] }
  0xd1   : > { %722 = vmatmul.mubr.f32.gmra.mrb[26].mxu0 %v515_v19  ;;  %v5143_v19 = vpack.c.bf16 %v3117_v18, %v3116_v17 }
  0xd2   : > { %726 = vmatprep.mubr.f32.mxu0 %v518_v20  ;;  %v3118_v20 = vld [vmem:[%s7986_s5 + $0x40] sm:$0xff] }
  0xd3   : > { %5144 = vmatpush1.bf16.msra.mxu1 %v5143_v19 }
  0xd4   : > { %5145 = vmatprep.subr.bf16.mxu1 %v7999_v0 }
  0xd5   : > { %727 = vmatmul.mubr.f32.gmra.mrb[28].mxu0 %v517_v21  ;;  %v3119_v21 = vld [vmem:[%s7986_s5 + $0x48] sm:$0xff] }
  0xd6   : > { %731 = vmatprep.mubr.f32.mxu0 %v520_v22  ;;  %v5146_v22 = vpack.c.bf16 %v3119_v21, %v3118_v20  ;;  %v3138_v21 = vld [vmem:[%s7986_s5 + $0xe0] sm:$0xff] }
  0xd8   : > { %5147 = vmatpush1.bf16.msra.mxu1 %v5146_v22  ;;  %v3139_v22 = vld [vmem:[%s7986_s5 + $0xe8] sm:$0xff] }
  0xd9   : > { %732 = vmatmul.mubr.f32.gmra.mrb[30].mxu0 %v519_v23  ;;  %5148 = vmatprep.subr.bf16.mxu1 %v7999_v0  ;;  %v3120_v23 = vld [vmem:[%s7986_s5 + $0x50] sm:$0xff] }
  0xda   : > { %736 = vmatprep.mubr.f32.mxu0 %v522_v24  ;;  %v3121_v24 = vld [vmem:[%s7986_s5 + $0x58] sm:$0xff] }
  0xdd   : > { %737 = vmatmul.mubr.f32.gmra.mrb[32].mxu0 %v521_v25  ;;  %v5149_v25 = vpack.c.bf16 %v3121_v24, %v3120_v23  ;;  %v5176_v24 = vpack.c.bf16 %v3139_v22, %v3138_v21 }
  0xde   : > { %741 = vmatprep.mubr.f32.mxu0 %v524_v26 }
  0xdf   : > { %5150 = vmatpush1.bf16.msra.mxu1 %v5149_v25 }
  0xe0   : > { %5151 = vmatprep.subr.bf16.mxu1 %v7999_v0 }
  0xe1   : > { %742 = vmatmul.mubr.f32.gmra.mrb[34].mxu0 %v523_v27  ;;  %v1060_v27 = vlaneseq }
  0xe2   : > { %746 = vmatprep.mubr.f32.mxu0 %v526_v28  ;;  %v6198_v28 = vld [vmem:[%s7985_s4] ss:$0 sm:$0xff] }
  0xe5   : > { %747 = vmatmul.mubr.f32.gmra.mrb[36].mxu0 %v525_v29 }
  0xe6   : > { %751 = vmatprep.mubr.f32.mxu0 %v528_v30  ;;  %v3122_v30 = vld [vmem:[%s7986_s5 + $0x60] sm:$0xff] }
  0xe9   : > { %752 = vmatmul.mubr.f32.gmra.mrb[38].mxu0 %v527_v31  ;;  %v3123_v31 = vld [vmem:[%s7986_s5 + $0x68] sm:$0xff] }
  0xea   : > { %756 = vmatprep.mubr.f32.mxu0 %v530_v32 }
  0xed   : > { %757 = vmatmul.mubr.f32.gmra.mrb[40].mxu0 %v529_v33  ;;  %v5152_v33 = vpack.c.bf16 %v3123_v31, %v3122_v30 }
  0xee   : > { %761 = vmatprep.mubr.f32.mxu0 %v532_v34 }
  0xef   : > { %5153 = vmatpush1.bf16.msra.mxu1 %v5152_v33 }
  0xf0   : > { %5154 = vmatprep.subr.bf16.mxu1 %v7999_v0 }
  0xf1   : > { %762 = vmatmul.mubr.f32.gmra.mrb[42].mxu0 %v531_v35 }
  0xf2   : > { %766 = vmatprep.mubr.f32.mxu0 %v534_v36  ;;  %v6208_v36 = vshrl.u32 %v1060_v27, 7 }
  0xf4   : > { %v1063_v6 = vadd.s32 16, %v6208_v36  ;;  %v1062_v8 = vadd.s32 8, %v6208_v36  ;;  %v1064_v30 = vadd.s32 24, %v6208_v36 }
  0xf5   : > { %767 = vmatmul.mubr.f32.gmra.mrb[44].mxu0 %v533_v38 }
  0xf6   : > { %771 = vmatprep.mubr.f32.mxu0 %v536_v39  ;;  %v3124_v39 = vld [vmem:[%s7986_s5 + $0x70] sm:$0xff]  ;;  %v1111_v15 = vand.u32 15, %v1063_v6  ;;  %v1104_v17 = vand.u32 15, %v1062_v8 }
  0xf8   : > { %vm1479_vm2 = vcmp.gt.s32.totalorder %v1111_v15, 0  ;;  %vm1574_vm3 = vcmp.lt.s32.totalorder %v1104_v17, 15 }
  0xf9   : > { %772 = vmatmul.mubr.f32.gmra.mrb[46].mxu0 %v535_v40  ;;  %v3125_v40 = vld [vmem:[%s7986_s5 + $0x78] sm:$0xff] }
  0xfa   : > { %776 = vmatprep.mubr.f32.mxu0 %v538_v41 }
  0xfd   : > { %777 = vmatmul.mubr.f32.gmra.mrb[48].mxu0 %v537_v42 }
  0xfe   : > { %781 = vmatprep.mubr.f32.mxu0 %v540_v43  ;;  %v5155_v43 = vpack.c.bf16 %v3125_v40, %v3124_v39 }
 0x100   : > { %5156 = vmatpush1.bf16.msra.mxu1 %v5155_v43 }
 0x101   : > { %782 = vmatmul.mubr.f32.gmra.mrb[50].mxu0 %v539_v44  ;;  %5157 = vmatprep.subr.bf16.mxu1 %v7999_v0 }
 0x102   : > { %786 = vmatprep.mubr.f32.mxu0 %v542_v45 }
 0x105   : > { %787 = vmatmul.mubr.f32.gmra.mrb[52].mxu0 %v541_v46  ;;  %v1097_v46 = vand.u32 15, %v6208_v36 }
 0x106   : > { %791 = vmatprep.mubr.f32.mxu0 %v544_v47  ;;  %v3126_v47 = vld [vmem:[%s7986_s5 + $0x80] sm:$0xff] }
 0x107   : > { %v5158_v50 = vpack.c.bf16 %v3127_v48, %v3126_v47  ;;  %vm1477_vm1 = vcmp.gt.s32.totalorder %v1097_v46, 0  ;;  %v1118_v46 = vand.u32 15, %v1064_v30  ;;  %v1069_v30 = vadd.s32 64, %v6208_v36 }
 0x108   : > { %v6236_v55 = vsel %vm1477_vm1, 1.0, %v8001_v37 }
 0x109   : > { %792 = vmatmul.mubr.f32.gmra.mrb[54].mxu0 %v543_v51  ;;  %5159 = vmatpush1.bf16.msra.mxu1 %v5158_v50  ;;  %vm6314_vm5 = vcmp.lt.s32.totalorder %v1118_v46, 15 }
 0x10a   : > { %796 = vmatprep.mubr.f32.mxu0 %v546_v52  ;;  %5160 = vmatprep.subr.bf16.mxu1 %v7999_v0  ;;  %v3128_v52 = vld [vmem:[%s7986_s5 + $0x90] sm:$0xff]  ;;  %v6339_v8 = vsel %vm6314_vm5, 1.0, %v8001_v37 }
 0x10b   : > { %v5161_v54 = vpack.c.bf16 %v3129_v53, %v3128_v52 }
 0x10d   : > { %797 = vmatmul.mubr.f32.gmra.mrb[56].mxu0 %v545_v56  ;;  %5162 = vmatpush1.bf16.msra.mxu1 %v5161_v54 }
 0x10e   : > { %801 = vmatprep.mubr.f32.mxu0 %v548_v57  ;;  %5163 = vmatprep.subr.bf16.mxu1 %v7999_v0  ;;  %v3130_v57 = vld [vmem:[%s7986_s5 + $0xa0] sm:$0xff] }
 0x10f   : > { %v5164_v60 = vpack.c.bf16 %v3131_v59, %v3130_v57 }
 0x111   : > { %802 = vmatmul.mubr.f32.gmra.mrb[58].mxu0 %v547_v61  ;;  %5165 = vmatpush1.bf16.msra.mxu1 %v5164_v60  ;;  %v3132_v61 = vld [vmem:[%s7986_s5 + $0xb0] sm:$0xff] }
 0x112   : > { %806 = vmatprep.mubr.f32.mxu0 %v550_v62  ;;  %v3133_v62 = vld [vmem:[%s7986_s5 + $0xb8] sm:$0xff]  ;;  %5166 = vmatprep.subr.bf16.mxu1 %v7999_v0 }
 0x113   : > { %v5167_v63 = vpack.c.bf16 %v3133_v62, %v3132_v61  ;;  %v1066_v61 = vadd.s32 40, %v6208_v36  ;;  %v1067_v62 = vadd.s32 48, %v6208_v36 }
 0x115   : > { %807 = vmatmul.mubr.f32.gmra.mrb[60].mxu0 %v549_v3  ;;  %5168 = vmatpush1.bf16.msra.mxu1 %v5167_v63  ;;  %v3134_v3 = vld [vmem:[%s7986_s5 + $0xc0] sm:$0xff]  ;;  %v1132_v12 = vand.u32 15, %v1066_v61 }
 0x116   : > { %811 = vmatprep.mubr.f32.mxu0 %v552_v5  ;;  %5169 = vmatprep.subr.bf16.mxu1 %v7999_v0  ;;  %v5170_v5 = vpack.c.bf16 %v3135_v4, %v3134_v3 }
 0x117   : > { %vm6356_vm6 = vcmp.lt.s32.totalorder %v1132_v12, 15 }
 0x119   : > { %812 = vmatmul.mubr.f32.gmra.mrb[62].mxu0 %v551_v7  ;;  %5171 = vmatpush1.bf16.msra.mxu1 %v5170_v5 }
 0x11a   : > { %5172 = vmatprep.subr.bf16.mxu1 %v7999_v0 }
 0x11d   : > { %5174 = vmatpush1.bf16.msra.mxu1 %v5173_v13  ;;  %v1139_v13 = vand.u32 15, %v1067_v62  ;;  %v1070_v62 = vadd.s32 72, %v6208_v36 }
 0x11e   : > { %5175 = vmatprep.subr.bf16.mxu1 %v7999_v0 }
 0x11f   : > { %vm6360_vm7 = vcmp.gt.s32.totalorder %v1139_v13, 0 }
 0x121   : > { %5177 = vmatpush1.bf16.msra.mxu1 %v5176_v24 }
 0x122   : > { %5178 = vmatprep.subr.bf16.mxu1 %v7999_v0 }
 0x153   : > { %v4873_v26 = vpop.f32.mrb[0].mxu1 }
 0x154   : > { %v4874_v29 = vpop.f32.mrb[1].mxu1 }
 0x155   : > { %v4875_v32 = vadd.f32 %v4874_v29, %v4873_v26  ;;  %v1065_v26 = vadd.s32 32, %v6208_v36 }
 0x157   : > { %v955_v34 = vadd.f32 %v4875_v32, %v6198_v28  ;;  %v4876_v35 = vpop.f32.mrb[2].mxu1 }
 0x158   : > { %v4877_v38 = vpop.f32.mrb[3].mxu1 }
 0x159   : > { %v963_v41 = vmax.f32 %v955_v34, 0.0  ;;  %v4878_v42 = vadd.f32 %v4877_v38, %v4876_v35  ;;  %v3140_v34 = vld [vmem:[%s7986_s5 + $0xf0] sm:$0xff]  ;;  %v3141_v35 = vld [vmem:[%s7986_s5 + $0xf8] sm:$0xff]  ;;  %v6294_v38 = vsel %vm1479_vm2, 1.0, %v8001_v37 }
 0x15a   : > { %v5179_v39 = vpack.c.bf16 %v3141_v35, %v3140_v34 }
 0x15b   : > { %v966_v44 = vmul.f32 0.0, %v963_v41  ;;  %v960_v45 = vadd.f32 %v4878_v42, %v6198_v28  ;;  %v6298_v41 = vsel %vm1574_vm3, 1.0, %v8001_v37  ;;  %v1125_v42 = vand.u32 15, %v1065_v26 }
 0x15c   : > { %5180 = vmatpush1.bf16.msra.mxu1 %v5179_v39 }
 0x15d   : > { %968 = vst.msk [vmem:[#allocation2 + $0x8] sm:$0xff] %vm849_vm0, %v966_v44  ;;  %v964_v49 = vmax.f32 %v960_v45, 0.0  ;;  %5181 = vmatprep.subr.bf16.mxu1 %v7999_v0  ;;  %vm6309_vm4 = vcmp.gt.s32.totalorder %v1125_v42, 0 }
 0x15e   : > { %v6331_v6 = vsel %vm6309_vm4, 1.0, %v8001_v37 }
 0x15f   : > { %v967_v51 = vmul.f32 0.0, %v964_v49 }
 0x161   : > { %969 = vst.msk [vmem:[#allocation2 + $0x10] sm:$0xff] %vm849_vm0, %v967_v51 }
 0x164   : > { %v1669_v56 = vld [vmem:[#allocation2 + $0x7] sm:$0xff] }
 0x165   : > { %v1701_v58 = vmul.f32 %v6236_v55, %v1669_v56  ;;  %v1765_v5 = vld [vmem:[#allocation2 + $0x8] sm:$0xff] }
 0x167   : > { %1733 = vst.msk [vmem:[#allocation3] sm:$0xff] %vm849_vm0, %v1701_v58 }
 0x168   : > { %v1958_v1 = vld [vmem:[#allocation2 + $0x9] sm:$0xff] }
 0x169   : > { %v1670_v2 = vld [vmem:[#allocation2 + $0xf] sm:$0xff]  ;;  %2022 = vst.msk [vmem:[#allocation3 + $0x8] sm:$0xff] %vm849_vm0, %v1958_v1 }
 0x16a   : > { %1734 = vst.msk [vmem:[#allocation3 + $0x28] sm:$0xff] %vm849_vm0, %v1670_v2  ;;  %v1766_v11 = vld [vmem:[#allocation2 + $0x10] sm:$0xff] }
 0x170   : > { %v658_v7 = vpop.f32.mrb[0].mxu0 }
 0x171   : > { %v659_v9 = vadd.f32 %v6198_v28, %v658_v7  ;;  %v660_v10 = vpop.f32.mrb[1].mxu0 }
 0x173   : > { %v817_v14 = vmax.f32 %v659_v9, 0.0  ;;  %v4911_v20 = vpop.f32.mrb[4].mxu1 }
 0x174   : > { %v663_v16 = vpop.f32.mrb[2].mxu0  ;;  %v4912_v23 = vpop.f32.mrb[5].mxu1 }
 0x175   : > { %850 = vst.msk [vmem:[#allocation2 + $0x18] sm:$0xff] %vm849_vm0, %v817_v14  ;;  %v664_v18 = vadd.f32 %v6198_v28, %v663_v16  ;;  %v665_v19 = vpop.f32.mrb[3].mxu0  ;;  %v4913_v27 = vadd.f32 %v4912_v23, %v4911_v20  ;;  %v1068_v23 = vadd.s32 56, %v6208_v36 }
 0x177   : > { %v818_v25 = vmax.f32 %v664_v18, 0.0  ;;  %v1043_v33 = vadd.f32 %v4913_v27, %v6198_v28 }
 0x178   : > { %v668_v29 = vpop.f32.mrb[4].mxu0 }
 0x179   : > { %851 = vst.msk [vmem:[#allocation2 + $0x20] sm:$0xff] %vm849_vm0, %v818_v25  ;;  %v669_v31 = vadd.f32 %v6198_v28, %v668_v29  ;;  %v670_v32 = vpop.f32.mrb[5].mxu0  ;;  %v1051_v43 = vmax.f32 %v1043_v33, 0.0 }
 0x17b   : > { %v819_v40 = vmax.f32 %v669_v31, 0.0  ;;  %v1054_v52 = vmul.f32 0.0, %v1051_v43  ;;  %v6379_v43 = vsel %vm6356_vm6, 1.0, %v8001_v37 }
 0x17c   : > { %v673_v44 = vpop.f32.mrb[6].mxu0  ;;  %v2054_v45 = vld [vmem:[#allocation2 + $0x17] sm:$0xff] }
 0x17d   : > { %v1959_v47 = vld [vmem:[#allocation2 + $0x11] sm:$0xff]  ;;  %852 = vst.msk [vmem:[#allocation2 + $0x28] sm:$0xff] %vm849_vm0, %v819_v40  ;;  %v674_v48 = vadd.f32 %v6198_v28, %v673_v44  ;;  %v675_v49 = vpop.f32.mrb[7].mxu0  ;;  %v2086_v50 = vmul.f32 %v6236_v55, %v2054_v45  ;;  %v1703_v51 = vmul.f32 %v6294_v38, %v2054_v45  ;;  %1056 = vst.msk [vmem:[#allocation2 + $0x118] sm:$0xff] %vm849_vm0, %v1054_v52  ;;  %v6384_v44 = vsel %vm6360_vm7, 1.0, %v8001_v37 }
 0x17e   : > { %v2278_v53 = vld [vmem:[#allocation2 + $0x18] sm:$0xff]  ;;  %v1991_v54 = vmul.f32 %v6298_v41, %v1959_v47  ;;  %v1146_v45 = vand.u32 15, %v1068_v23 }
 0x17f   : > { %2310 = vst.msk [vmem:[#allocation3 + $0x10] sm:$0xff] %vm849_vm0, %v2278_v53  ;;  %v820_v56 = vmax.f32 %v674_v48, 0.0  ;;  %2150 = vrot.lane.b32.xlu0 %v2086_v50, %s5650_s24  ;;  %1735 = vst.msk [vmem:[#allocation3 + $0x50] sm:$0xff] %vm849_vm0, %v1703_v51  ;;  %v1767_v26 = vld [vmem:[#allocation2 + $0x18] sm:$0xff]  ;;  %v1153_v50 = vand.u32 15, %v1069_v30 }
 0x180   : > { %v678_v58 = vpop.f32.mrb[8].mxu0  ;;  %v2055_v59 = vld [vmem:[#allocation2 + $0x1f] sm:$0xff]  ;;  %2023 = vst.msk [vmem:[#allocation3 + $0x30] sm:$0xff] %vm849_vm0, %v1991_v54  ;;  %vm6403_vm8 = vcmp.lt.s32.totalorder %v1146_v45, 15 }
 0x181   : > { %v6321_v63 = vld [vmem:[#allocation2 + $0x19] sm:$0xff]  ;;  %853 = vst.msk [vmem:[#allocation2 + $0x30] sm:$0xff] %vm849_vm0, %v820_v56  ;;  %v679_v1 = vadd.f32 %v6198_v28, %v678_v58  ;;  %2152 = vrot.lane.b32.xlu1 %v2055_v59, %s5650_s24  ;;  %v680_v2 = vpop.f32.mrb[9].mxu0  ;;  %vm6409_vm9 = vcmp.gt.s32.totalorder %v1153_v50, 0  ;;  %v1073_v50 = vadd.s32 96, %v6208_v36 }
 0x182   : > { %2024 = vst.msk [vmem:[#allocation3 + $0x58] sm:$0xff] %vm849_vm0, %v6321_v63  ;;  %v1672_v3 = vld [vmem:[#allocation2 + $0x1f] sm:$0xff] }
 0x183   : > { %v2279_v4 = vld [vmem:[#allocation2 + $0x20] sm:$0xff]  ;;  %1736 = vst.msk [vmem:[#allocation3 + $0x78] sm:$0xff] %vm849_vm0, %v1672_v3  ;;  %v821_v7 = vmax.f32 %v679_v1, 0.0  ;;  %1829 = vrot.lane.b32.xlu0 %v1765_v5, %s5650_s24 }
 0x184   : > { %2311 = vst.msk [vmem:[#allocation3 + $0x38] sm:$0xff] %vm849_vm0, %v2279_v4  ;;  %v2566_v9 = vld [vmem:[#allocation2 + $0x27] sm:$0xff]  ;;  %v683_v10 = vpop.f32.mrb[10].mxu0 }
 0x185   : > { %v1961_v14 = vld [vmem:[#allocation2 + $0x21] sm:$0xff]  ;;  %v2598_v15 = vmul.f32 %v6236_v55, %v2566_v9  ;;  %854 = vst.msk [vmem:[#allocation2 + $0x38] sm:$0xff] %vm849_vm0, %v821_v7  ;;  %v684_v16 = vadd.f32 %v6198_v28, %v683_v10  ;;  %1831 = vrot.lane.b32.xlu1 %v1766_v11, %s5650_s24  ;;  %v685_v17 = vpop.f32.mrb[11].mxu0  ;;  %v2088_v18 = vmul.f32 %v6294_v38, %v2566_v9  ;;  %v1071_v7 = vadd.s32 80, %v6208_v36 }
 0x186   : > { %v1705_v19 = vmul.f32 %v6331_v6, %v2566_v9  ;;  %v2280_v20 = vld [vmem:[#allocation2 + $0x28] sm:$0xff]  ;;  %v1993_v21 = vmul.f32 %v6339_v8, %v1961_v14  ;;  %v6349_v22 = vmul.f32 %v6298_v41, %v1961_v14  ;;  %v1768_v49 = vld [vmem:[#allocation2 + $0x20] sm:$0xff]  ;;  %v6428_v17 = vsel %vm6403_vm8, 1.0, %v8001_v37 }
 0x187   : > { %2312 = vst.msk [vmem:[#allocation3 + $0x60] sm:$0xff] %vm849_vm0, %v2280_v20  ;;  %2630 = vst.msk [vmem:[#allocation3 + $0x18] sm:$0xff] %vm849_vm0, %v2598_v15  ;;  %v822_v55 = vmax.f32 %v684_v16, 0.0  ;;  %2154 = vrot.lane.b32.xlu0 %v2088_v18, %s5650_s24  ;;  %v1769_v4 = vld [vmem:[#allocation2 + $0x28] sm:$0xff]  ;;  %v6433_v18 = vsel %vm6409_vm9, 1.0, %v8001_v37 }
 0x188   : > { %1737 = vst.msk [vmem:[#allocation3 + $0xa0] sm:$0xff] %vm849_vm0, %v1705_v19  ;;  %v2854_v24 = vld [vmem:[#allocation2 + $0x29] sm:$0xff]  ;;  %v688_v25 = vpop.f32.mrb[12].mxu0  ;;  %2025 = vst.msk [vmem:[#allocation3 + $0x80] sm:$0xff] %vm849_vm0, %v1993_v21  ;;  %v1160_v19 = vand.u32 15, %v1070_v62 }
 0x189   : > { %2918 = vst.msk [vmem:[#allocation3 + $0x20] sm:$0xff] %vm849_vm0, %v2854_v24  ;;  %855 = vst.msk [vmem:[#allocation2 + $0x40] sm:$0xff] %vm849_vm0, %v822_v55  ;;  %v689_v31 = vadd.f32 %v6198_v28, %v688_v25  ;;  %1833 = vrot.lane.b32.xlu1 %v1767_v26, %s5650_s24  ;;  %v690_v32 = vpop.f32.mrb[13].mxu0  ;;  %v6370_v33 = vld [vmem:[#allocation2 + $0x29] sm:$0xff]  ;;  %v1167_v24 = vand.u32 15, %v1071_v7 }
 0x18a   : > { %v1674_v34 = vld [vmem:[#allocation2 + $0x2f] sm:$0xff]  ;;  %2026 = vst.msk [vmem:[#allocation3 + $0xa8] sm:$0xff] %vm849_vm0, %v6370_v33  ;;  %vm6454_vm10 = vcmp.lt.s32.totalorder %v1160_v19, 15 }
 0x18b   : > { %v2057_v35 = vld [vmem:[#allocation2 + $0x2f] sm:$0xff]  ;;  %1738 = vst.msk [vmem:[#allocation3 + $0xc8] sm:$0xff] %vm849_vm0, %v1674_v34  ;;  %v823_v42 = vmax.f32 %v689_v31, 0.0  ;;  %vm6460_vm11 = vcmp.gt.s32.totalorder %v1167_v24, 0 }
 0x18c   : > { %v2567_v39 = vld [vmem:[#allocation2 + $0x2f] sm:$0xff]  ;;  %2156 = vrot.lane.b32.xlu0 %v2057_v35, %s5650_s24  ;;  %v2568_v47 = vld [vmem:[#allocation2 + $0x37] sm:$0xff]  ;;  %v693_v48 = vpop.f32.mrb[14].mxu0 }
 0x18d   : > { %v2281_v40 = vld [vmem:[#allocation2 + $0x30] sm:$0xff]  ;;  %2631 = vst.msk [vmem:[#allocation3 + $0x40] sm:$0xff] %vm849_vm0, %v2567_v39  ;;  %v2600_v52 = vmul.f32 %v6294_v38, %v2568_v47  ;;  %856 = vst.msk [vmem:[#allocation2 + $0x48] sm:$0xff] %vm849_vm0, %v823_v42  ;;  %v694_v53 = vadd.f32 %v6198_v28, %v693_v48  ;;  %1835 = vrot.lane.b32.xlu1 %v1768_v49, %s5650_s24  ;;  %v695_v54 = vpop.f32.mrb[15].mxu0  ;;  %v2090_v56 = vmul.f32 %v6331_v6, %v2568_v47  ;;  %v2282_v58 = vld [vmem:[#allocation2 + $0x38] sm:$0xff] }
 0x18e   : > { %2313 = vst.msk [vmem:[#allocation3 + $0x88] sm:$0xff] %vm849_vm0, %v2281_v40  ;;  %v2855_v46 = vld [vmem:[#allocation2 + $0x31] sm:$0xff]  ;;  %v1707_v59 = vmul.f32 %v6384_v44, %v2568_v47  ;;  %2314 = vst.msk [vmem:[#allocation3 + $0xb0] sm:$0xff] %vm849_vm0, %v2282_v58  ;;  %v1072_v42 = vadd.s32 88, %v6208_v36 }
 0x18f   : > { %v2887_v51 = vmul.f32 %v6298_v41, %v2855_v46  ;;  %v1963_v57 = vld [vmem:[#allocation2 + $0x31] sm:$0xff]  ;;  %2632 = vst.msk [vmem:[#allocation3 + $0x68] sm:$0xff] %vm849_vm0, %v2600_v52  ;;  %v824_v38 = vmax.f32 %v694_v53, 0.0 }
 0x190   : > { %v1995_v60 = vmul.f32 %v6379_v43, %v1963_v57  ;;  %v6397_v61 = vmul.f32 %v6339_v8, %v1963_v57  ;;  %2158 = vrot.lane.b32.xlu0 %v2090_v56, %s5650_s24  ;;  %v2856_v1 = vld [vmem:[#allocation2 + $0x39] sm:$0xff]  ;;  %v698_v2 = vpop.f32.mrb[16].mxu0  ;;  %v2954_v3 = vld [vmem:[#allocation3 + $0x20] sm:$0xff]  ;;  %1739 = vst.msk [vmem:[#allocation3 + $0xf0] sm:$0xff] %vm849_vm0, %v1707_v59  ;;  %v1174_v41 = vand.u32 15, %v1072_v42 }
 0x191   : > { %2919 = vst.msk [vmem:[#allocation3 + $0x48] sm:$0xff] %vm849_vm0, %v2887_v51  ;;  %2920 = vst.msk [vmem:[#allocation3 + $0x70] sm:$0xff] %vm849_vm0, %v2856_v1  ;;  %v699_v9 = vadd.f32 %v6198_v28, %v698_v2  ;;  %4973 = vmatprep.mubr.msk.f32.mxu0 %vm849_vm0, %v2954_v3  ;;  %1837 = vrot.lane.b32.xlu1 %v1769_v4, %s5650_s24  ;;  %v700_v10 = vpop.f32.mrb[17].mxu0  ;;  %v2059_v11 = vld [vmem:[#allocation2 + $0x3f] sm:$0xff]  ;;  %v1770_v23 = vld [vmem:[#allocation2 + $0x30] sm:$0xff]  ;;  %v1181_v4 = vand.u32 15, %v1073_v50 }
 0x192   : > { %2027 = vst.msk [vmem:[#allocation3 + $0xd0] sm:$0xff] %vm849_vm0, %v1995_v60  ;;  %857 = vst.msk [vmem:[#allocation2 + $0x50] sm:$0xff] %vm849_vm0, %v824_v38  ;;  %v6420_v12 = vld [vmem:[#allocation2 + $0x39] sm:$0xff]  ;;  %v6479_v60 = vsel %vm6454_vm10, 1.0, %v8001_v37  ;;  %v6484_v38 = vsel %vm6460_vm11, 1.0, %v8001_v37  ;;  %vm6505_vm12 = vcmp.lt.s32.totalorder %v1174_v41, 15 }
 0x193   : > { %2028 = vst.msk [vmem:[#allocation3 + $0xf8] sm:$0xff] %vm849_vm0, %v6420_v12  ;;  %v1676_v13 = vld [vmem:[#allocation2 + $0x3f] sm:$0xff]  ;;  %v825_v16 = vmax.f32 %v699_v9, 0.0  ;;  %vm6511_vm13 = vcmp.gt.s32.totalorder %v1181_v4, 0 }
 0x194   : > { %v2569_v14 = vld [vmem:[#allocation2 + $0x3f] sm:$0xff]  ;;  %2160 = vrot.lane.b32.xlu0 %v2059_v11, %s5650_s24  ;;  %1740 = vst.msk [vmem:[#allocation3 + $0x118] sm:$0xff] %vm849_vm0, %v1676_v13  ;;  %v2570_v21 = vld [vmem:[#allocation2 + $0x47] sm:$0xff]  ;;  %v703_v55 = vpop.f32.mrb[18].mxu0  ;;  %v6535_v40 = vsel %vm6511_vm13, 1.0, %v8001_v37 }
 0x195   : > { %v2283_v15 = vld [vmem:[#allocation2 + $0x40] sm:$0xff]  ;;  %2633 = vst.msk [vmem:[#allocation3 + $0x90] sm:$0xff] %vm849_vm0, %v2569_v14  ;;  %v2602_v26 = vmul.f32 %v6331_v6, %v2570_v21  ;;  %858 = vst.msk [vmem:[#allocation2 + $0x58] sm:$0xff] %vm849_vm0, %v825_v16  ;;  %v704_v27 = vadd.f32 %v6198_v28, %v703_v55  ;;  %1839 = vrot.lane.b32.xlu1 %v1770_v23, %s5650_s24  ;;  %v705_v29 = vpop.f32.mrb[19].mxu0  ;;  %v2092_v30 = vmul.f32 %v6384_v44, %v2570_v21  ;;  %v2284_v32 = vld [vmem:[#allocation2 + $0x48] sm:$0xff] }
 0x196   : > { %2315 = vst.msk [vmem:[#allocation3 + $0xd8] sm:$0xff] %vm849_vm0, %v2283_v15  ;;  %v2857_v20 = vld [vmem:[#allocation2 + $0x41] sm:$0xff]  ;;  %v1709_v35 = vmul.f32 %v6433_v18, %v2570_v21  ;;  %2316 = vst.msk [vmem:[#allocation3 + $0x100] sm:$0xff] %vm849_vm0, %v2284_v32  ;;  %v1771_v48 = vld [vmem:[#allocation2 + $0x38] sm:$0xff]  ;;  %v1074_v21 = vadd.s32 104, %v6208_v36 }
 0x197   : > { %v2889_v25 = vmul.f32 %v6339_v8, %v2857_v20  ;;  %v1965_v31 = vld [vmem:[#allocation2 + $0x41] sm:$0xff]  ;;  %2634 = vst.msk [vmem:[#allocation3 + $0xb8] sm:$0xff] %vm849_vm0, %v2602_v26  ;;  %v826_v6 = vmax.f32 %v704_v27, 0.0  ;;  %v1075_v27 = vadd.s32 112, %v6208_v36 }
 0x198   : > { %v2959_v34 = vld [vmem:[#allocation3 + $0x48] sm:$0xff]  ;;  %v1997_v39 = vmul.f32 %v6428_v17, %v1965_v31  ;;  %v6447_v8 = vmul.f32 %v6379_v43, %v1965_v31  ;;  %2162 = vrot.lane.b32.xlu0 %v2092_v30, %s5650_s24  ;;  %v708_v46 = vpop.f32.mrb[20].mxu0  ;;  %v2964_v47 = vld [vmem:[#allocation3 + $0x70] sm:$0xff]  ;;  %1741 = vst.msk [vmem:[#allocation3 + $0x140] sm:$0xff] %vm849_vm0, %v1709_v35  ;;  %v1188_v42 = vand.u32 15, %v1074_v21 }
 0x199   : > { %2921 = vst.msk [vmem:[#allocation3 + $0x98] sm:$0xff] %vm849_vm0, %v2889_v25  ;;  %4974 = vmatmul.mubr.msk.f32.vlgmr.msra.gmra.mrb[64].mxu0 %vm849_vm0, %v2959_v34  ;;  %v2858_v45 = vld [vmem:[#allocation2 + $0x49] sm:$0xff]  ;;  %859 = vst.msk [vmem:[#allocation2 + $0x60] sm:$0xff] %vm849_vm0, %v826_v6  ;;  %v709_v51 = vadd.f32 %v6198_v28, %v708_v46  ;;  %1841 = vrot.lane.b32.xlu1 %v1771_v48, %s5650_s24  ;;  %v710_v52 = vpop.f32.mrb[21].mxu0  ;;  %v1772_v3 = vld [vmem:[#allocation2 + $0x40] sm:$0xff]  ;;  %v6530_v6 = vsel %vm6505_vm12, 1.0, %v8001_v37 }
 0x19a   : > { %2029 = vst.msk [vmem:[#allocation3 + $0x120] sm:$0xff] %vm849_vm0, %v1997_v39  ;;  %2922 = vst.msk [vmem:[#allocation3 + $0xc0] sm:$0xff] %vm849_vm0, %v2858_v45  ;;  %4976 = vmatprep.mubr.msk.f32.mxu0 %vm849_vm0, %v2964_v47  ;;  %v2061_v53 = vld [vmem:[#allocation2 + $0x4f] sm:$0xff]  ;;  %v1195_v49 = vand.u32 15, %v1075_v27  ;;  %vm6556_vm14 = vcmp.lt.s32.totalorder %v1188_v42, 15 }
 0x19b   : > { %v6471_v54 = vld [vmem:[#allocation2 + $0x49] sm:$0xff]  ;;  %v827_v59 = vmax.f32 %v709_v51, 0.0  ;;  %v6581_v20 = vsel %vm6556_vm14, 1.0, %v8001_v37 }
 0x19c   : > { %2030 = vst.msk [vmem:[#allocation3 + $0x148] sm:$0xff] %vm849_vm0, %v6471_v54  ;;  %v1678_v56 = vld [vmem:[#allocation2 + $0x4f] sm:$0xff]  ;;  %2164 = vrot.lane.b32.xlu0 %v2061_v53, %s5650_s24  ;;  %v2572_v1 = vld [vmem:[#allocation2 + $0x57] sm:$0xff]  ;;  %v713_v2 = vpop.f32.mrb[22].mxu0  ;;  %vm6562_vm15 = vcmp.gt.s32.totalorder %v1195_v49, 0  ;;  %v1078_v49 = vadd.s32 136, %v6208_v36 }
 0x19d   : > { %v2571_v57 = vld [vmem:[#allocation2 + $0x4f] sm:$0xff]  ;;  %1742 = vst.msk [vmem:[#allocation3 + $0x168] sm:$0xff] %vm849_vm0, %v1678_v56  ;;  %v2604_v7 = vmul.f32 %v6384_v44, %v2572_v1  ;;  %860 = vst.msk [vmem:[#allocation2 + $0x68] sm:$0xff] %vm849_vm0, %v827_v59  ;;  %v714_v9 = vadd.f32 %v6198_v28, %v713_v2  ;;  %1843 = vrot.lane.b32.xlu1 %v1772_v3, %s5650_s24  ;;  %v715_v10 = vpop.f32.mrb[23].mxu0  ;;  %v2094_v11 = vmul.f32 %v6433_v18, %v2572_v1  ;;  %v2286_v14 = vld [vmem:[#allocation2 + $0x58] sm:$0xff] }
 0x19e   : > { %v2285_v58 = vld [vmem:[#allocation2 + $0x50] sm:$0xff]  ;;  %2635 = vst.msk [vmem:[#allocation3 + $0xe0] sm:$0xff] %vm849_vm0, %v2571_v57  ;;  %v1711_v16 = vmul.f32 %v6484_v38, %v2572_v1  ;;  %2318 = vst.msk [vmem:[#allocation3 + $0x150] sm:$0xff] %vm849_vm0, %v2286_v14  ;;  %v1773_v25 = vld [vmem:[#allocation2 + $0x48] sm:$0xff]  ;;  %v1076_v2 = vadd.s32 120, %v6208_v36  ;;  %v1077_v10 = vadd.s32 128, %v6208_v36 }
 0x19f   : > { %2317 = vst.msk [vmem:[#allocation3 + $0x128] sm:$0xff] %vm849_vm0, %v2285_v58  ;;  %v2859_v62 = vld [vmem:[#allocation2 + $0x51] sm:$0xff]  ;;  %2636 = vst.msk [vmem:[#allocation3 + $0x108] sm:$0xff] %vm849_vm0, %v2604_v7  ;;  %v828_v44 = vmax.f32 %v714_v9, 0.0  ;;  %v6586_v21 = vsel %vm6562_vm15, 1.0, %v8001_v37 }
 0x1a0   : > { %v2891_v5 = vmul.f32 %v6379_v43, %v2859_v62  ;;  %v1967_v13 = vld [vmem:[#allocation2 + $0x51] sm:$0xff]  ;;  %v2969_v15 = vld [vmem:[#allocation3 + $0x98] sm:$0xff]  ;;  %2166 = vrot.lane.b32.xlu0 %v2094_v11, %s5650_s24  ;;  %v2860_v55 = vld [vmem:[#allocation2 + $0x59] sm:$0xff]  ;;  %v718_v23 = vpop.f32.mrb[24].mxu0  ;;  %1743 = vst.msk [vmem:[#allocation3 + $0x190] sm:$0xff] %vm849_vm0, %v1711_v16  ;;  %v1209_v27 = vand.u32 15, %v1077_v10 }
 0x1a1   : > { %v1999_v19 = vmul.f32 %v6479_v60, %v1967_v13  ;;  %v6498_v43 = vmul.f32 %v6428_v17, %v1967_v13  ;;  %4977 = vmatmul.mubr.msk.f32.gmra.mrb[66].mxu0 %vm849_vm0, %v2969_v15  ;;  %v2974_v24 = vld [vmem:[#allocation3 + $0xc0] sm:$0xff]  ;;  %2924 = vst.msk [vmem:[#allocation3 + $0x110] sm:$0xff] %vm849_vm0, %v2860_v55  ;;  %861 = vst.msk [vmem:[#allocation2 + $0x70] sm:$0xff] %vm849_vm0, %v828_v44  ;;  %v719_v29 = vadd.f32 %v6198_v28, %v718_v23  ;;  %v720_v30 = vpop.f32.mrb[25].mxu0  ;;  %v6522_v31 = vld [vmem:[#allocation2 + $0x59] sm:$0xff] }
 0x1a2   : > { %2923 = vst.msk [vmem:[#allocation3 + $0xe8] sm:$0xff] %vm849_vm0, %v2891_v5  ;;  %4979 = vmatprep.mubr.msk.f32.mxu0 %vm849_vm0, %v2974_v24  ;;  %1845 = vrot.lane.b32.xlu1 %v1773_v25, %s5650_s24  ;;  %v2063_v32 = vld [vmem:[#allocation2 + $0x5f] sm:$0xff]  ;;  %2032 = vst.msk [vmem:[#allocation3 + $0x198] sm:$0xff] %vm849_vm0, %v6522_v31  ;;  %v1774_v48 = vld [vmem:[#allocation2 + $0x50] sm:$0xff]  ;;  %v1202_v55 = vand.u32 15, %v1076_v2  ;;  %vm6613_vm2 = vcmp.gt.s32.totalorder %v1209_v27, 0 }
 0x1a3   : > { %2031 = vst.msk [vmem:[#allocation3 + $0x170] sm:$0xff] %vm849_vm0, %v1999_v19  ;;  %v1680_v34 = vld [vmem:[#allocation2 + $0x5f] sm:$0xff]  ;;  %v829_v39 = vmax.f32 %v719_v29, 0.0 }
 0x1a4   : > { %v2287_v35 = vld [vmem:[#allocation2 + $0x60] sm:$0xff]  ;;  %2168 = vrot.lane.b32.xlu0 %v2063_v32, %s5650_s24  ;;  %1744 = vst.msk [vmem:[#allocation3 + $0x1b8] sm:$0xff] %vm849_vm0, %v1680_v34  ;;  %2637 = vst.msk [vmem:[#allocation3 + $0x130] sm:$0xff] %vm849_vm0, %v1680_v34  ;;  %v723_v47 = vpop.f32.mrb[26].mxu0  ;;  %v2288_v58 = vld [vmem:[#allocation2 + $0x68] sm:$0xff]  ;;  %vm6607_vm1 = vcmp.lt.s32.totalorder %v1202_v55, 15 }
 0x1a5   : > { %2319 = vst.msk [vmem:[#allocation3 + $0x178] sm:$0xff] %vm849_vm0, %v2287_v35  ;;  %v2861_v45 = vld [vmem:[#allocation2 + $0x61] sm:$0xff]  ;;  %862 = vst.msk [vmem:[#allocation2 + $0x78] sm:$0xff] %vm849_vm0, %v829_v39  ;;  %v724_v52 = vadd.f32 %v6198_v28, %v723_v47  ;;  %v725_v53 = vpop.f32.mrb[27].mxu0  ;;  %v1775_v7 = vld [vmem:[#allocation2 + $0x58] sm:$0xff] }
 0x1a6   : > { %v2574_v46 = vld [vmem:[#allocation2 + $0x67] sm:$0xff]  ;;  %v2893_v50 = vmul.f32 %v6428_v17, %v2861_v45  ;;  %1847 = vrot.lane.b32.xlu1 %v1774_v48, %s5650_s24  ;;  %2320 = vst.msk [vmem:[#allocation3 + $0x1a0] sm:$0xff] %vm849_vm0, %v2288_v58 }
 0x1a7   : > { %v2606_v51 = vmul.f32 %v6433_v18, %v2574_v46  ;;  %v2096_v56 = vmul.f32 %v6484_v38, %v2574_v46  ;;  %v1969_v57 = vld [vmem:[#allocation2 + $0x61] sm:$0xff]  ;;  %v1713_v41 = vmul.f32 %v6535_v40, %v2574_v46  ;;  %v830_v18 = vmax.f32 %v724_v52, 0.0 }
 0x1a8   : > { %v2001_v62 = vmul.f32 %v6530_v6, %v1969_v57  ;;  %v6549_v17 = vmul.f32 %v6479_v60, %v1969_v57  ;;  %2925 = vst.msk [vmem:[#allocation3 + $0x138] sm:$0xff] %vm849_vm0, %v2893_v50  ;;  %v2862_v3 = vld [vmem:[#allocation2 + $0x69] sm:$0xff]  ;;  %v728_v4 = vpop.f32.mrb[28].mxu0  ;;  %v2984_v5 = vld [vmem:[#allocation3 + $0x110] sm:$0xff]  ;;  %v1079_v57 = vadd.s32 144, %v6208_v36 }
 0x1a9   : > { %v2979_v59 = vld [vmem:[#allocation3 + $0xe8] sm:$0xff]  ;;  %2638 = vst.msk [vmem:[#allocation3 + $0x158] sm:$0xff] %vm849_vm0, %v2606_v51  ;;  %2170 = vrot.lane.b32.xlu0 %v2096_v56, %s5650_s24  ;;  %1745 = vst.msk [vmem:[#allocation3 + $0x1e0] sm:$0xff] %vm849_vm0, %v1713_v41  ;;  %v729_v11 = vadd.f32 %v6198_v28, %v728_v4  ;;  %v730_v13 = vpop.f32.mrb[29].mxu0  ;;  %v6573_v14 = vld [vmem:[#allocation2 + $0x69] sm:$0xff]  ;;  %v6637_v4 = vsel %vm6613_vm2, 1.0, %v8001_v37 }
 0x1aa   : > { %4980 = vmatmul.mubr.msk.f32.gmra.mrb[68].mxu0 %vm849_vm0, %v2979_v59  ;;  %2033 = vst.msk [vmem:[#allocation3 + $0x1c0] sm:$0xff] %vm849_vm0, %v2001_v62  ;;  %2926 = vst.msk [vmem:[#allocation3 + $0x160] sm:$0xff] %vm849_vm0, %v2862_v3  ;;  %1849 = vrot.lane.b32.xlu1 %v1775_v7, %s5650_s24  ;;  %v2065_v15 = vld [vmem:[#allocation2 + $0x6f] sm:$0xff]  ;;  %v1776_v26 = vld [vmem:[#allocation2 + $0x60] sm:$0xff]  ;;  %v6632_v3 = vsel %vm6607_vm1, 1.0, %v8001_v37  ;;  %v1223_v13 = vand.u32 15, %v1079_v57 }
 0x1ab   : > { %863 = vst.msk [vmem:[#allocation2 + $0x80] sm:$0xff] %vm849_vm0, %v830_v18  ;;  %4982 = vmatprep.mubr.msk.f32.mxu0 %vm849_vm0, %v2984_v5  ;;  %2034 = vst.msk [vmem:[#allocation3 + $0x1e8] sm:$0xff] %vm849_vm0, %v6573_v14  ;;  %v1682_v16 = vld [vmem:[#allocation2 + $0x6f] sm:$0xff]  ;;  %v831_v44 = vmax.f32 %v729_v11, 0.0  ;;  %v1216_v5 = vand.u32 15, %v1078_v49  ;;  %vm1925_vm2 = vcmask 1048064  }
 0x1ac   : > { %v2289_v19 = vld [vmem:[#allocation2 + $0x70] sm:$0xff]  ;;  %1746 = vst.msk [vmem:[#allocation3 + $0x208] sm:$0xff] %vm849_vm0, %v1682_v16  ;;  %2639 = vst.msk [vmem:[#allocation3 + $0x180] sm:$0xff] %vm849_vm0, %v1682_v16  ;;  %v733_v25 = vpop.f32.mrb[30].mxu0  ;;  %v2290_v42 = vld [vmem:[#allocation2 + $0x78] sm:$0xff]  ;;  %vm6664_vm4 = vcmp.gt.s32.totalorder %v1223_v13, 0 }
 0x1ad   : > { %2172 = vrot.lane.b32.xlu0 %v2065_v15, %s5650_s24  ;;  %2321 = vst.msk [vmem:[#allocation3 + $0x1c8] sm:$0xff] %vm849_vm0, %v2289_v19  ;;  %v2863_v23 = vld [vmem:[#allocation2 + $0x71] sm:$0xff]  ;;  %864 = vst.msk [vmem:[#allocation2 + $0x88] sm:$0xff] %vm849_vm0, %v831_v44  ;;  %v734_v32 = vadd.f32 %v6198_v28, %v733_v25  ;;  %v735_v34 = vpop.f32.mrb[31].mxu0  ;;  %v1777_v53 = vld [vmem:[#allocation2 + $0x68] sm:$0xff]  ;;  %vm6658_vm3 = vcmp.lt.s32.totalorder %v1216_v5, 15 }
 0x1ae   : > { %v2576_v24 = vld [vmem:[#allocation2 + $0x77] sm:$0xff]  ;;  %v2895_v29 = vmul.f32 %v6479_v60, %v2863_v23  ;;  %1851 = vrot.lane.b32.xlu1 %v1776_v26, %s5650_s24  ;;  %2322 = vst.msk [vmem:[#allocation3 + $0x1f0] sm:$0xff] %vm849_vm0, %v2290_v42 }
 0x1af   : > { %v2608_v30 = vmul.f32 %v6484_v38, %v2576_v24  ;;  %v2098_v35 = vmul.f32 %v6535_v40, %v2576_v24  ;;  %v1971_v39 = vld [vmem:[#allocation2 + $0x71] sm:$0xff]  ;;  %v2989_v45 = vld [vmem:[#allocation3 + $0x138] sm:$0xff]  ;;  %v1715_v46 = vmul.f32 %v6586_v21, %v2576_v24  ;;  %v832_v38 = vmax.f32 %v734_v32, 0.0 }
 0x1b0   : > { %v2003_v47 = vmul.f32 %v6581_v20, %v1971_v39  ;;  %v6600_v60 = vmul.f32 %v6530_v6, %v1971_v39  ;;  %2927 = vst.msk [vmem:[#allocation3 + $0x188] sm:$0xff] %vm849_vm0, %v2895_v29  ;;  %4983 = vmatmul.mubr.msk.f32.gmra.mrb[70].mxu0 %vm849_vm0, %v2989_v45  ;;  %v738_v51 = vpop.f32.mrb[32].mxu0  ;;  %v1778_v11 = vld [vmem:[#allocation2 + $0x70] sm:$0xff]  ;;  %v1779_v39 = vld [vmem:[#allocation2 + $0x78] sm:$0xff]  ;;  %v1081_v45 = vadd.s32 160, %v6208_v36 }
 0x1b1   : > { %2640 = vst.msk [vmem:[#allocation3 + $0x1a8] sm:$0xff] %vm849_vm0, %v2608_v30  ;;  %2174 = vrot.lane.b32.xlu0 %v2098_v35, %s5650_s24  ;;  %v2994_v52 = vld [vmem:[#allocation3 + $0x160] sm:$0xff]  ;;  %1747 = vst.msk [vmem:[#allocation3 + $0x230] sm:$0xff] %vm849_vm0, %v1715_v46  ;;  %v739_v58 = vadd.f32 %v6198_v28, %v738_v51  ;;  %v740_v59 = vpop.f32.mrb[33].mxu0  ;;  %v1080_v30 = vadd.s32 152, %v6208_v36 }
 0x1b2   : > { %v2864_v50 = vld [vmem:[#allocation2 + $0x79] sm:$0xff]  ;;  %2035 = vst.msk [vmem:[#allocation3 + $0x210] sm:$0xff] %vm849_vm0, %v2003_v47  ;;  %865 = vst.msk [vmem:[#allocation2 + $0x90] sm:$0xff] %vm849_vm0, %v832_v38  ;;  %4985 = vmatprep.mubr.msk.f32.mxu0 %vm849_vm0, %v2994_v52  ;;  %1853 = vrot.lane.b32.xlu1 %v1777_v53, %s5650_s24  ;;  %v6688_v52 = vsel %vm6664_vm4, 1.0, %v8001_v37 }
 0x1b3   : > { %2928 = vst.msk [vmem:[#allocation3 + $0x1b0] sm:$0xff] %vm849_vm0, %v2864_v50  ;;  %v6624_v41 = vld [vmem:[#allocation2 + $0x79] sm:$0xff]  ;;  %v833_v2 = vmax.f32 %v739_v58, 0.0  ;;  %v1230_v53 = vand.u32 15, %v1080_v30 }
 0x1b4   : > { %v2067_v62 = vld [vmem:[#allocation2 + $0x7f] sm:$0xff]  ;;  %2036 = vst.msk [vmem:[#allocation3 + $0x238] sm:$0xff] %vm849_vm0, %v6624_v41  ;;  %v2578_v9 = vld [vmem:[#allocation2 + $0x87] sm:$0xff]  ;;  %v743_v10 = vpop.f32.mrb[34].mxu0 }
 0x1b5   : > { %v1684_v18 = vld [vmem:[#allocation2 + $0x7f] sm:$0xff]  ;;  %2176 = vrot.lane.b32.xlu0 %v2067_v62, %s5650_s24  ;;  %v2610_v16 = vmul.f32 %v6535_v40, %v2578_v9  ;;  %866 = vst.msk [vmem:[#allocation2 + $0x98] sm:$0xff] %vm849_vm0, %v833_v2  ;;  %v744_v19 = vadd.f32 %v6198_v28, %v743_v10  ;;  %v745_v44 = vpop.f32.mrb[35].mxu0  ;;  %v2100_v55 = vmul.f32 %v6586_v21, %v2578_v9  ;;  %v2292_v24 = vld [vmem:[#allocation2 + $0x88] sm:$0xff]  ;;  %v1237_v62 = vand.u32 15, %v1081_v45 }
 0x1b6   : > { %v2291_v1 = vld [vmem:[#allocation2 + $0x80] sm:$0xff]  ;;  %1748 = vst.msk [vmem:[#allocation3 + $0x258] sm:$0xff] %vm849_vm0, %v1684_v18  ;;  %2641 = vst.msk [vmem:[#allocation3 + $0x1d0] sm:$0xff] %vm849_vm0, %v1684_v18  ;;  %1855 = vrot.lane.b32.xlu1 %v1778_v11, %s5650_s24  ;;  %v1717_v26 = vmul.f32 %v6637_v4, %v2578_v9  ;;  %vm6717_vm5 = vcmp.lt.s32.totalorder %v1230_v53, 15  ;;  %v1082_v44 = vadd.s32 168, %v6208_v36 }
 0x1b7   : > { %2323 = vst.msk [vmem:[#allocation3 + $0x218] sm:$0xff] %vm849_vm0, %v2291_v1  ;;  %v2865_v7 = vld [vmem:[#allocation2 + $0x81] sm:$0xff]  ;;  %v2999_v25 = vld [vmem:[#allocation3 + $0x188] sm:$0xff]  ;;  %2324 = vst.msk [vmem:[#allocation3 + $0x240] sm:$0xff] %vm849_vm0, %v2292_v24  ;;  %v834_v40 = vmax.f32 %v744_v19, 0.0  ;;  %vm6723_vm6 = vcmp.gt.s32.totalorder %v1237_v62, 0 }
 0x1b8   : > { %v2897_v15 = vmul.f32 %v6530_v6, %v2865_v7  ;;  %v1973_v23 = vld [vmem:[#allocation2 + $0x81] sm:$0xff]  ;;  %2642 = vst.msk [vmem:[#allocation3 + $0x1f8] sm:$0xff] %vm849_vm0, %v2610_v16  ;;  %4986 = vmatmul.mubr.msk.f32.gmra.mrb[72].mxu0 %vm849_vm0, %v2999_v25  ;;  %v748_v34 = vpop.f32.mrb[36].mxu0  ;;  %1749 = vst.msk [vmem:[#allocation3 + $0x280] sm:$0xff] %vm849_vm0, %v1717_v26  ;;  %v6699_v2 = vld [vmem:[%s7985_s4] ss:$0 sm:$0xff] }
 0x1b9   : > { %v2005_v27 = vmul.f32 %v6632_v3, %v1973_v23  ;;  %v6651_v6 = vmul.f32 %v6581_v20, %v1973_v23  ;;  %2178 = vrot.lane.b32.xlu0 %v2100_v55, %s5650_s24  ;;  %v2866_v32 = vld [vmem:[#allocation2 + $0x89] sm:$0xff]  ;;  %867 = vst.msk [vmem:[#allocation2 + $0xa0] sm:$0xff] %vm849_vm0, %v834_v40  ;;  %v749_v46 = vadd.f32 %v6198_v28, %v748_v34  ;;  %v750_v47 = vpop.f32.mrb[37].mxu0  ;;  %v6683_v28 = vsel %vm6658_vm3, 1.0, %v8001_v37  ;;  %v1780_v59 = vld [vmem:[#allocation2 + $0x80] sm:$0xff] }
 0x1ba   : > { %2929 = vst.msk [vmem:[#allocation3 + $0x1d8] sm:$0xff] %vm849_vm0, %v2897_v15  ;;  %v3004_v35 = vld [vmem:[#allocation3 + $0x1b0] sm:$0xff]  ;;  %2930 = vst.msk [vmem:[#allocation3 + $0x200] sm:$0xff] %vm849_vm0, %v2866_v32  ;;  %1857 = vrot.lane.b32.xlu1 %v1779_v39, %s5650_s24  ;;  %v6675_v38 = vld [vmem:[#allocation2 + $0x89] sm:$0xff]  ;;  %v6746_v42 = vsel %vm6717_vm5, 1.0, %v8001_v37  ;;  %v6751_v45 = vsel %vm6723_vm6, 1.0, %v8001_v37 }
 0x1bb   : > { %2037 = vst.msk [vmem:[#allocation3 + $0x260] sm:$0xff] %vm849_vm0, %v2005_v27  ;;  %4988 = vmatprep.mubr.msk.f32.mxu0 %vm849_vm0, %v3004_v35  ;;  %v2069_v48 = vld [vmem:[#allocation2 + $0x8f] sm:$0xff]  ;;  %2038 = vst.msk [vmem:[#allocation3 + $0x288] sm:$0xff] %vm849_vm0, %v6675_v38  ;;  %v835_v51 = vmax.f32 %v749_v46, 0.0  ;;  %v1083_v27 = vadd.s32 176, %v6208_v36  ;;  %v1244_v46 = vand.u32 15, %v1082_v44 }
 0x1bc   : > { %v1686_v49 = vld [vmem:[#allocation2 + $0x8f] sm:$0xff]  ;;  %v2580_v57 = vld [vmem:[#allocation2 + $0x97] sm:$0xff]  ;;  %v753_v58 = vpop.f32.mrb[38].mxu0  ;;  %v1085_v44 = vadd.s32 192, %v6208_v36 }
 0x1bd   : > { %v2293_v50 = vld [vmem:[#allocation2 + $0x90] sm:$0xff]  ;;  %2180 = vrot.lane.b32.xlu0 %v2069_v48, %s5650_s24  ;;  %1750 = vst.msk [vmem:[#allocation3 + $0x2a8] sm:$0xff] %vm849_vm0, %v1686_v49  ;;  %2643 = vst.msk [vmem:[#allocation3 + $0x220] sm:$0xff] %vm849_vm0, %v1686_v49  ;;  %v2612_v1 = vmul.f32 %v6586_v21, %v2580_v57  ;;  %v754_v5 = vadd.f32 %v6699_v2, %v753_v58  ;;  %v755_v7 = vpop.f32.mrb[39].mxu0  ;;  %v2102_v9 = vmul.f32 %v6637_v4, %v2580_v57  ;;  %v6704_v11 = vld [vmem:[#allocation2 + $0x98] sm:$0xff] }
 0x1be   : > { %2325 = vst.msk [vmem:[#allocation3 + $0x268] sm:$0xff] %vm849_vm0, %v2293_v50  ;;  %v2867_v56 = vld [vmem:[#allocation2 + $0x91] sm:$0xff]  ;;  %868 = vst.msk [vmem:[#allocation2 + $0xa8] sm:$0xff] %vm849_vm0, %v835_v51  ;;  %1859 = vrot.lane.b32.xlu1 %v1780_v59, %s5650_s24  ;;  %v1719_v21 = vmul.f32 %v6688_v52, %v2580_v57  ;;  %v1781_v25 = vld [vmem:[#allocation2 + $0x88] sm:$0xff]  ;;  %v1251_v51 = vand.u32 15, %v1083_v27  ;;  %vm6774_vm7 = vcmp.lt.s32.totalorder %v1244_v46, 15 }
 0x1bf   : > { %v2899_v18 = vmul.f32 %v6581_v20, %v2867_v56  ;;  %v1975_v10 = vld [vmem:[#allocation2 + $0x91] sm:$0xff]  ;;  %2326 = vst.msk [vmem:[#allocation3 + $0x290] sm:$0xff] %vm849_vm0, %v6704_v11  ;;  %2644 = vst.msk [vmem:[#allocation3 + $0x248] sm:$0xff] %vm849_vm0, %v2612_v1  ;;  %v836_v16 = vmax.f32 %v754_v5, 0.0 }
 0x1c0   : > { %v2007_v13 = vmul.f32 %v6683_v28, %v1975_v10  ;;  %v6709_v15 = vmul.f32 %v6632_v3, %v1975_v10  ;;  %v2868_v55 = vld [vmem:[#allocation2 + $0x99] sm:$0xff]  ;;  %v758_v23 = vpop.f32.mrb[40].mxu0  ;;  %1751 = vst.msk [vmem:[#allocation3 + $0x2d0] sm:$0xff] %vm849_vm0, %v1719_v21  ;;  %v1782_v50 = vld [vmem:[#allocation2 + $0x90] sm:$0xff]  ;;  %v1084_v10 = vadd.s32 184, %v6208_v36  ;;  %vm6780_vm8 = vcmp.gt.s32.totalorder %v1251_v51, 0 }
 0x1c1   : > { %v3009_v20 = vld [vmem:[#allocation3 + $0x1d8] sm:$0xff]  ;;  %2931 = vst.msk [vmem:[#allocation3 + $0x228] sm:$0xff] %vm849_vm0, %v2899_v18  ;;  %2182 = vrot.lane.b32.xlu0 %v2102_v9, %s5650_s24  ;;  %v3014_v24 = vld [vmem:[#allocation3 + $0x200] sm:$0xff]  ;;  %2932 = vst.msk [vmem:[#allocation3 + $0x250] sm:$0xff] %vm849_vm0, %v2868_v55  ;;  %v759_v40 = vadd.f32 %v6699_v2, %v758_v23  ;;  %v760_v29 = vpop.f32.mrb[41].mxu0 }
 0x1c2   : > { %4989 = vmatmul.mubr.msk.f32.gmra.mrb[74].mxu0 %vm849_vm0, %v3009_v20  ;;  %2039 = vst.msk [vmem:[#allocation3 + $0x2b0] sm:$0xff] %vm849_vm0, %v2007_v13  ;;  %869 = vst.msk [vmem:[#allocation2 + $0xb0] sm:$0xff] %vm849_vm0, %v836_v16  ;;  %1861 = vrot.lane.b32.xlu1 %v1781_v25, %s5650_s24  ;;  %v6734_v30 = vld [vmem:[#allocation2 + $0x99] sm:$0xff]  ;;  %v6803_v29 = vsel %vm6774_vm7, 1.0, %v8001_v37 }
 0x1c3   : > { %4991 = vmatprep.mubr.msk.f32.mxu0 %vm849_vm0, %v3014_v24  ;;  %v6736_v32 = vld [vmem:[#allocation2 + $0xa0] sm:$0xff]  ;;  %2040 = vst.msk [vmem:[#allocation3 + $0x2d8] sm:$0xff] %vm849_vm0, %v6734_v30  ;;  %v837_v39 = vmax.f32 %v759_v40, 0.0  ;;  %v1783_v16 = vld [vmem:[#allocation2 + $0x98] sm:$0xff] }
 0x1c4   : > { %v2071_v34 = vld [vmem:[#allocation2 + $0x9f] sm:$0xff]  ;;  %2327 = vst.msk [vmem:[#allocation3 + $0x2b8] sm:$0xff] %vm849_vm0, %v6736_v32  ;;  %v763_v49 = vpop.f32.mrb[42].mxu0 }
 0x1c5   : > { %v1688_v35 = vld [vmem:[#allocation2 + $0x9f] sm:$0xff]  ;;  %2184 = vrot.lane.b32.xlu0 %v2071_v34, %s5650_s24  ;;  %v2582_v48 = vld [vmem:[#allocation2 + $0xa7] sm:$0xff]  ;;  %870 = vst.msk [vmem:[#allocation2 + $0xb8] sm:$0xff] %vm849_vm0, %v837_v39  ;;  %v764_v57 = vadd.f32 %v6699_v2, %v763_v49  ;;  %v765_v58 = vpop.f32.mrb[43].mxu0  ;;  %v6808_v34 = vsel %vm6780_vm8, 1.0, %v8001_v37  ;;  %v1265_v49 = vand.u32 15, %v1085_v44 }
 0x1c6   : > { %1752 = vst.msk [vmem:[#allocation3 + $0x2f8] sm:$0xff] %vm849_vm0, %v1688_v35  ;;  %2645 = vst.msk [vmem:[#allocation3 + $0x270] sm:$0xff] %vm849_vm0, %v1688_v35  ;;  %v2869_v47 = vld [vmem:[#allocation2 + $0xa1] sm:$0xff]  ;;  %v2614_v56 = vmul.f32 %v6637_v4, %v2582_v48  ;;  %1863 = vrot.lane.b32.xlu1 %v1782_v50, %s5650_s24  ;;  %v2104_v59 = vmul.f32 %v6688_v52, %v2582_v48  ;;  %v1721_v5 = vmul.f32 %v6751_v45, %v2582_v48 }
 0x1c7   : > { %v2901_v53 = vmul.f32 %v6632_v3, %v2869_v47  ;;  %v1977_v62 = vld [vmem:[#allocation2 + $0xa1] sm:$0xff]  ;;  %v838_v4 = vmax.f32 %v764_v57, 0.0  ;;  %v1258_v35 = vand.u32 15, %v1084_v10  ;;  %vm6837_vm10 = vcmp.gt.s32.totalorder %v1265_v49, 0 }
 0x1c8   : > { %v6761_v18 = vld [vmem:[#allocation2 + $0xa8] sm:$0xff]  ;;  %v3019_v1 = vld [vmem:[#allocation3 + $0x228] sm:$0xff]  ;;  %v2009_v7 = vmul.f32 %v6746_v42, %v1977_v62  ;;  %v6766_v3 = vmul.f32 %v6683_v28, %v1977_v62  ;;  %2646 = vst.msk [vmem:[#allocation3 + $0x298] sm:$0xff] %vm849_vm0, %v2614_v56  ;;  %v768_v21 = vpop.f32.mrb[44].mxu0  ;;  %v3024_v13 = vld [vmem:[#allocation3 + $0x250] sm:$0xff] }
 0x1c9   : > { %2328 = vst.msk [vmem:[#allocation3 + $0x2e0] sm:$0xff] %vm849_vm0, %v6761_v18  ;;  %2933 = vst.msk [vmem:[#allocation3 + $0x278] sm:$0xff] %vm849_vm0, %v2901_v53  ;;  %4992 = vmatmul.mubr.msk.f32.gmra.mrb[76].mxu0 %vm849_vm0, %v3019_v1  ;;  %2186 = vrot.lane.b32.xlu0 %v2104_v59, %s5650_s24  ;;  %v2870_v20 = vld [vmem:[#allocation2 + $0xa9] sm:$0xff]  ;;  %v769_v55 = vadd.f32 %v6699_v2, %v768_v21  ;;  %v770_v23 = vpop.f32.mrb[45].mxu0  ;;  %v1784_v48 = vld [vmem:[#allocation2 + $0xa0] sm:$0xff]  ;;  %vm6831_vm9 = vcmp.lt.s32.totalorder %v1258_v35, 15 }
 0x1ca   : > { %1753 = vst.msk [vmem:[#allocation3 + $0x320] sm:$0xff] %vm849_vm0, %v1721_v5  ;;  %2041 = vst.msk [vmem:[#allocation3 + $0x300] sm:$0xff] %vm849_vm0, %v2009_v7  ;;  %4994 = vmatprep.mubr.msk.f32.mxu0 %vm849_vm0, %v3024_v13  ;;  %1865 = vrot.lane.b32.xlu1 %v1783_v16, %s5650_s24  ;;  %v6791_v24 = vld [vmem:[#allocation2 + $0xa9] sm:$0xff]  ;;  %v1087_v16 = vadd.s32 208, %v6208_v36  ;;  %v6860_v35 = vsel %vm6831_vm9, 1.0, %v8001_v37 }
 0x1cb   : > { %2934 = vst.msk [vmem:[#allocation3 + $0x2a0] sm:$0xff] %vm849_vm0, %v2870_v20  ;;  %871 = vst.msk [vmem:[#allocation2 + $0xc0] sm:$0xff] %vm849_vm0, %v838_v4  ;;  %v6793_v25 = vld [vmem:[#allocation2 + $0xb0] sm:$0xff]  ;;  %v839_v40 = vmax.f32 %v769_v55, 0.0  ;;  %v1086_v4 = vadd.s32 200, %v6208_v36  ;;  %v1785_v21 = vld [vmem:[#allocation2 + $0xa8] sm:$0xff] }
 0x1cc   : > { %v2073_v26 = vld [vmem:[#allocation2 + $0xaf] sm:$0xff]  ;;  %2042 = vst.msk [vmem:[#allocation3 + $0x328] sm:$0xff] %vm849_vm0, %v6791_v24  ;;  %2329 = vst.msk [vmem:[#allocation3 + $0x308] sm:$0xff] %vm849_vm0, %v6793_v25  ;;  %v2584_v46 = vld [vmem:[#allocation2 + $0xb7] sm:$0xff]  ;;  %v773_v47 = vpop.f32.mrb[46].mxu0 }
 0x1cd   : > { %v1690_v27 = vld [vmem:[#allocation2 + $0xaf] sm:$0xff]  ;;  %2188 = vrot.lane.b32.xlu0 %v2073_v26, %s5650_s24  ;;  %v2616_v51 = vmul.f32 %v6688_v52, %v2584_v46  ;;  %872 = vst.msk [vmem:[#allocation2 + $0xc8] sm:$0xff] %vm849_vm0, %v839_v40  ;;  %v774_v53 = vadd.f32 %v6699_v2, %v773_v47  ;;  %v775_v56 = vpop.f32.mrb[47].mxu0  ;;  %v2106_v57 = vmul.f32 %v6751_v45, %v2584_v46  ;;  %v6818_v59 = vld [vmem:[#allocation2 + $0xb8] sm:$0xff] }
 0x1ce   : > { %1754 = vst.msk [vmem:[#allocation3 + $0x348] sm:$0xff] %vm849_vm0, %v1690_v27  ;;  %2647 = vst.msk [vmem:[#allocation3 + $0x2c0] sm:$0xff] %vm849_vm0, %v1690_v27  ;;  %v2871_v39 = vld [vmem:[#allocation2 + $0xb1] sm:$0xff]  ;;  %1867 = vrot.lane.b32.xlu1 %v1784_v48, %s5650_s24  ;;  %v1723_v1 = vmul.f32 %v6808_v34, %v2584_v46  ;;  %v1272_v46 = vand.u32 15, %v1086_v4 }
 0x1cf   : > { %v2903_v50 = vmul.f32 %v6683_v28, %v2871_v39  ;;  %v1979_v58 = vld [vmem:[#allocation2 + $0xb1] sm:$0xff]  ;;  %2330 = vst.msk [vmem:[#allocation3 + $0x330] sm:$0xff] %vm849_vm0, %v6818_v59  ;;  %2648 = vst.msk [vmem:[#allocation3 + $0x2e8] sm:$0xff] %vm849_vm0, %v2616_v51  ;;  %v840_v52 = vmax.f32 %v774_v53, 0.0  ;;  %v6865_v39 = vsel %vm6837_vm10, 1.0, %v8001_v37  ;;  %v1279_v51 = vand.u32 15, %v1087_v16 }
 0x1d0   : > { %v3029_v62 = vld [vmem:[#allocation3 + $0x278] sm:$0xff]  ;;  %v2011_v5 = vmul.f32 %v6803_v29, %v1979_v58  ;;  %v6823_v28 = vmul.f32 %v6746_v42, %v1979_v58  ;;  %v778_v10 = vpop.f32.mrb[48].mxu0  ;;  %1755 = vst.msk [vmem:[#allocation3 + $0x370] sm:$0xff] %vm849_vm0, %v1723_v1  ;;  %vm6888_vm11 = vcmp.lt.s32.totalorder %v1272_v46, 15  ;;  %v1787_v16 = vld [vmem:[#allocation2 + $0xb8] sm:$0xff] }
 0x1d1   : > { %2935 = vst.msk [vmem:[#allocation3 + $0x2c8] sm:$0xff] %vm849_vm0, %v2903_v50  ;;  %4995 = vmatmul.mubr.msk.f32.gmra.mrb[78].mxu0 %vm849_vm0, %v3029_v62  ;;  %2190 = vrot.lane.b32.xlu0 %v2106_v57, %s5650_s24  ;;  %873 = vst.msk [vmem:[#allocation2 + $0xd0] sm:$0xff] %vm849_vm0, %v840_v52  ;;  %v779_v19 = vadd.f32 %v6699_v2, %v778_v10  ;;  %v780_v44 = vpop.f32.mrb[49].mxu0  ;;  %v1786_v50 = vld [vmem:[#allocation2 + $0xb0] sm:$0xff]  ;;  %v1088_v10 = vadd.s32 216, %v6208_v36  ;;  %vm6894_vm12 = vcmp.gt.s32.totalorder %v1279_v51, 0 }
 0x1d2   : > { %v2872_v9 = vld [vmem:[#allocation2 + $0xb9] sm:$0xff]  ;;  %v3034_v20 = vld [vmem:[#allocation3 + $0x2a0] sm:$0xff]  ;;  %2043 = vst.msk [vmem:[#allocation3 + $0x350] sm:$0xff] %vm849_vm0, %v2011_v5  ;;  %1869 = vrot.lane.b32.xlu1 %v1785_v21, %s5650_s24  ;;  %v1089_v44 = vadd.s32 224, %v6208_v36  ;;  %v6922_v51 = vsel %vm6894_vm12, 1.0, %v8001_v37 }
 0x1d3   : > { %2936 = vst.msk [vmem:[#allocation3 + $0x2f0] sm:$0xff] %vm849_vm0, %v2872_v9  ;;  %4997 = vmatprep.mubr.msk.f32.mxu0 %vm849_vm0, %v3034_v20  ;;  %v6848_v55 = vld [vmem:[#allocation2 + $0xb9] sm:$0xff]  ;;  %v841_v40 = vmax.f32 %v779_v19, 0.0 }
 0x1d4   : > { %v6850_v23 = vld [vmem:[#allocation2 + $0xc0] sm:$0xff]  ;;  %2044 = vst.msk [vmem:[#allocation3 + $0x378] sm:$0xff] %vm849_vm0, %v6848_v55  ;;  %v783_v49 = vpop.f32.mrb[50].mxu0  ;;  %v6875_v5 = vld [vmem:[#allocation2 + $0xc8] sm:$0xff] }
 0x1d5   : > { %v2075_v26 = vld [vmem:[#allocation2 + $0xbf] sm:$0xff]  ;;  %2331 = vst.msk [vmem:[#allocation3 + $0x358] sm:$0xff] %vm849_vm0, %v6850_v23  ;;  %v2586_v48 = vld [vmem:[#allocation2 + $0xc7] sm:$0xff]  ;;  %874 = vst.msk [vmem:[#allocation2 + $0xd8] sm:$0xff] %vm849_vm0, %v841_v40  ;;  %v784_v57 = vadd.f32 %v6699_v2, %v783_v49  ;;  %v785_v58 = vpop.f32.mrb[51].mxu0 }
 0x1d6   : > { %v1692_v27 = vld [vmem:[#allocation2 + $0xbf] sm:$0xff]  ;;  %2192 = vrot.lane.b32.xlu0 %v2075_v26, %s5650_s24  ;;  %v2618_v56 = vmul.f32 %v6751_v45, %v2586_v48  ;;  %1871 = vrot.lane.b32.xlu1 %v1786_v50, %s5650_s24  ;;  %v2108_v62 = vmul.f32 %v6808_v34, %v2586_v48  ;;  %v1725_v7 = vmul.f32 %v6865_v39, %v2586_v48  ;;  %v6917_v50 = vsel %vm6888_vm11, 1.0, %v8001_v37 }
 0x1d7   : > { %1756 = vst.msk [vmem:[#allocation3 + $0x398] sm:$0xff] %vm849_vm0, %v1692_v27  ;;  %2649 = vst.msk [vmem:[#allocation3 + $0x310] sm:$0xff] %vm849_vm0, %v1692_v27  ;;  %v2873_v47 = vld [vmem:[#allocation2 + $0xc1] sm:$0xff]  ;;  %v842_v45 = vmax.f32 %v784_v57, 0.0 }
 0x1d8   : > { %v2905_v53 = vmul.f32 %v6746_v42, %v2873_v47  ;;  %v1981_v1 = vld [vmem:[#allocation2 + $0xc1] sm:$0xff]  ;;  %v3039_v52 = vld [vmem:[#allocation3 + $0x2c8] sm:$0xff]  ;;  %2332 = vst.msk [vmem:[#allocation3 + $0x380] sm:$0xff] %vm849_vm0, %v6875_v5  ;;  %2650 = vst.msk [vmem:[#allocation3 + $0x338] sm:$0xff] %vm849_vm0, %v2618_v56  ;;  %v788_v21 = vpop.f32.mrb[52].mxu0 }
 0x1d9   : > { %v2013_v4 = vmul.f32 %v6860_v35, %v1981_v1  ;;  %v6880_v42 = vmul.f32 %v6803_v29, %v1981_v1  ;;  %4998 = vmatmul.mubr.msk.f32.gmra.mrb[80].mxu0 %vm849_vm0, %v3039_v52  ;;  %v2874_v20 = vld [vmem:[#allocation2 + $0xc9] sm:$0xff]  ;;  %1757 = vst.msk [vmem:[#allocation3 + $0x3c0] sm:$0xff] %vm849_vm0, %v1725_v7  ;;  %875 = vst.msk [vmem:[#allocation2 + $0xe0] sm:$0xff] %vm849_vm0, %v842_v45  ;;  %v789_v26 = vadd.f32 %v6699_v2, %v788_v21  ;;  %v790_v27 = vpop.f32.mrb[53].mxu0 }
 0x1da   : > { %2937 = vst.msk [vmem:[#allocation3 + $0x318] sm:$0xff] %vm849_vm0, %v2905_v53  ;;  %2194 = vrot.lane.b32.xlu0 %v2108_v62, %s5650_s24  ;;  %v3044_v13 = vld [vmem:[#allocation3 + $0x2f0] sm:$0xff]  ;;  %2938 = vst.msk [vmem:[#allocation3 + $0x340] sm:$0xff] %vm849_vm0, %v2874_v20  ;;  %1873 = vrot.lane.b32.xlu1 %v1787_v16, %s5650_s24  ;;  %v6905_v40 = vld [vmem:[#allocation2 + $0xc9] sm:$0xff]  ;;  %v1286_v53 = vand.u32 15, %v1088_v10  ;;  %v1293_v1 = vand.u32 15, %v1089_v44 }
 0x1db   : > { %2045 = vst.msk [vmem:[#allocation3 + $0x3a0] sm:$0xff] %vm849_vm0, %v2013_v4  ;;  %5000 = vmatprep.mubr.msk.f32.mxu0 %vm849_vm0, %v3044_v13  ;;  %v6907_v46 = vld [vmem:[#allocation2 + $0xd0] sm:$0xff]  ;;  %2046 = vst.msk [vmem:[#allocation3 + $0x3c8] sm:$0xff] %vm849_vm0, %v6905_v40  ;;  %v843_v49 = vmax.f32 %v789_v26, 0.0  ;;  %v1788_v62 = vld [vmem:[#allocation2 + $0xc0] sm:$0xff]  ;;  %v1091_v44 = vadd.s32 240, %v6208_v36 }
 0x1dc   : > { %v2077_v47 = vld [vmem:[#allocation2 + $0xcf] sm:$0xff]  ;;  %2333 = vst.msk [vmem:[#allocation3 + $0x3a8] sm:$0xff] %vm849_vm0, %v6907_v46  ;;  %v2588_v57 = vld [vmem:[#allocation2 + $0xd7] sm:$0xff]  ;;  %v793_v58 = vpop.f32.mrb[54].mxu0  ;;  %vm6945_vm13 = vcmp.lt.s32.totalorder %v1286_v53, 15  ;;  %vm6951_vm14 = vcmp.gt.s32.totalorder %v1293_v1, 0 }
 0x1dd   : > { %v1694_v48 = vld [vmem:[#allocation2 + $0xcf] sm:$0xff]  ;;  %v2620_v7 = vmul.f32 %v6808_v34, %v2588_v57  ;;  %876 = vst.msk [vmem:[#allocation2 + $0xe8] sm:$0xff] %vm849_vm0, %v843_v49  ;;  %v794_v4 = vadd.f32 %v6699_v2, %v793_v58  ;;  %v795_v45 = vpop.f32.mrb[55].mxu0  ;;  %v2110_v9 = vmul.f32 %v6865_v39, %v2588_v57  ;;  %v6932_v20 = vld [vmem:[#allocation2 + $0xd8] sm:$0xff]  ;;  %v1727_v13 = vmul.f32 %v6922_v51, %v2588_v57 }
 0x1de   : > { %2196 = vrot.lane.b32.xlu0 %v2077_v47, %s5650_s24  ;;  %1758 = vst.msk [vmem:[#allocation3 + $0x3e8] sm:$0xff] %vm849_vm0, %v1694_v48  ;;  %2651 = vst.msk [vmem:[#allocation3 + $0x360] sm:$0xff] %vm849_vm0, %v1694_v48  ;;  %v2875_v56 = vld [vmem:[#allocation2 + $0xd1] sm:$0xff]  ;;  %1875 = vrot.lane.b32.xlu1 %v1788_v62, %s5650_s24  ;;  %v1789_v48 = vld [vmem:[#allocation2 + $0xc8] sm:$0xff]  ;;  %v6979_v45 = vsel %vm6951_vm14, 1.0, %v8001_v37 }
 0x1df   : > { %v2907_v52 = vmul.f32 %v6803_v29, %v2875_v56  ;;  %v1983_v10 = vld [vmem:[#allocation2 + $0xd1] sm:$0xff]  ;;  %2334 = vst.msk [vmem:[#allocation3 + $0x3d0] sm:$0xff] %vm849_vm0, %v6932_v20  ;;  %2652 = vst.msk [vmem:[#allocation3 + $0x388] sm:$0xff] %vm849_vm0, %v2620_v7  ;;  %v844_v34 = vmax.f32 %v794_v4, 0.0  ;;  %v1090_v56 = vadd.s32 232, %v6208_v36  ;;  %v6974_v4 = vsel %vm6945_vm13, 1.0, %v8001_v37 }
 0x1e0   : > { %v2015_v16 = vmul.f32 %v6917_v50, %v1983_v10  ;;  %v6937_v29 = vmul.f32 %v6860_v35, %v1983_v10  ;;  %v2876_v26 = vld [vmem:[#allocation2 + $0xd9] sm:$0xff]  ;;  %v798_v27 = vpop.f32.mrb[56].mxu0  ;;  %1759 = vst.msk [vmem:[#allocation3 + $0x410] sm:$0xff] %vm849_vm0, %v1727_v13 }
 0x1e1   : > { %v3049_v21 = vld [vmem:[#allocation3 + $0x318] sm:$0xff]  ;;  %2939 = vst.msk [vmem:[#allocation3 + $0x368] sm:$0xff] %vm849_vm0, %v2907_v52  ;;  %v3054_v47 = vld [vmem:[#allocation3 + $0x340] sm:$0xff]  ;;  %2940 = vst.msk [vmem:[#allocation3 + $0x390] sm:$0xff] %vm849_vm0, %v2876_v26  ;;  %v799_v53 = vadd.f32 %v6699_v2, %v798_v27  ;;  %v800_v57 = vpop.f32.mrb[57].mxu0 }
 0x1e2   : > { %5001 = vmatmul.mubr.msk.f32.gmra.mrb[82].mxu0 %vm849_vm0, %v3049_v21  ;;  %2198 = vrot.lane.b32.xlu0 %v2110_v9, %s5650_s24  ;;  %2047 = vst.msk [vmem:[#allocation3 + $0x3f0] sm:$0xff] %vm849_vm0, %v2015_v16  ;;  %877 = vst.msk [vmem:[#allocation2 + $0xf0] sm:$0xff] %vm849_vm0, %v844_v34  ;;  %v6962_v58 = vld [vmem:[#allocation2 + $0xd9] sm:$0xff]  ;;  %v1307_v9 = vand.u32 15, %v1091_v44  ;;  %v1790_v16 = vld [vmem:[#allocation2 + $0xd0] sm:$0xff]  ;;  %v1300_v34 = vand.u32 15, %v1090_v56 }
 0x1e3   : > { %5003 = vmatprep.mubr.msk.f32.mxu0 %vm849_vm0, %v3054_v47  ;;  %1877 = vrot.lane.b32.xlu1 %v1789_v48, %s5650_s24  ;;  %v6964_v62 = vld [vmem:[#allocation2 + $0xe0] sm:$0xff]  ;;  %2048 = vst.msk [vmem:[#allocation3 + $0x418] sm:$0xff] %vm849_vm0, %v6962_v58  ;;  %v845_v7 = vmax.f32 %v799_v53, 0.0 }
 0x1e4   : > { %v2079_v1 = vld [vmem:[#allocation2 + $0xdf] sm:$0xff]  ;;  %2335 = vst.msk [vmem:[#allocation3 + $0x3f8] sm:$0xff] %vm849_vm0, %v6964_v62  ;;  %v2590_v21 = vld [vmem:[#allocation2 + $0xe7] sm:$0xff]  ;;  %v803_v13 = vpop.f32.mrb[58].mxu0  ;;  %vm7002_vm15 = vcmp.gt.s32.totalorder %v1307_v9, 0  ;;  %vm7008_vm1 = vcmp.lt.s32.totalorder %v1300_v34, 15 }
 0x1e5   : > { %v1696_v52 = vld [vmem:[#allocation2 + $0xdf] sm:$0xff]  ;;  %v2622_v19 = vmul.f32 %v6865_v39, %v2590_v21  ;;  %878 = vst.msk [vmem:[#allocation2 + $0xf8] sm:$0xff] %vm849_vm0, %v845_v7  ;;  %v804_v27 = vadd.f32 %v6699_v2, %v803_v13  ;;  %v805_v44 = vpop.f32.mrb[59].mxu0  ;;  %v2112_v47 = vmul.f32 %v6922_v51, %v2590_v21  ;;  %v6989_v49 = vld [vmem:[#allocation2 + $0xe8] sm:$0xff]  ;;  %v1729_v57 = vmul.f32 %v6979_v45, %v2590_v21 }
 0x1e6   : > { %2200 = vrot.lane.b32.xlu0 %v2079_v1, %s5650_s24  ;;  %1760 = vst.msk [vmem:[#allocation3 + $0x438] sm:$0xff] %vm849_vm0, %v1696_v52  ;;  %2653 = vst.msk [vmem:[#allocation3 + $0x3b0] sm:$0xff] %vm849_vm0, %v1696_v52  ;;  %v2877_v10 = vld [vmem:[#allocation2 + $0xe1] sm:$0xff]  ;;  %v4914_v52 = vpop.f32.mrb[6].mxu1  ;;  %v1092_v7 = vadd.s32 248, %v6208_v36 }
 0x1e7   : > { %v2909_v26 = vmul.f32 %v6860_v35, %v2877_v10  ;;  %1879 = vrot.lane.b32.xlu1 %v1790_v16, %s5650_s24  ;;  %v1985_v48 = vld [vmem:[#allocation2 + $0xe1] sm:$0xff]  ;;  %2336 = vst.msk [vmem:[#allocation3 + $0x420] sm:$0xff] %vm849_vm0, %v6989_v49  ;;  %2654 = vst.msk [vmem:[#allocation3 + $0x3d8] sm:$0xff] %vm849_vm0, %v2622_v19  ;;  %v846_v39 = vmax.f32 %v804_v27, 0.0  ;;  %v1791_v16 = vld [vmem:[#allocation2 + $0xd8] sm:$0xff]  ;;  %v4915_v19 = vpop.f32.mrb[7].mxu1 }
 0x1e8   : > { %v3059_v53 = vld [vmem:[#allocation3 + $0x368] sm:$0xff]  ;;  %v2017_v56 = vmul.f32 %v6974_v4, %v1985_v48  ;;  %v6994_v35 = vmul.f32 %v6917_v50, %v1985_v48  ;;  %v808_v21 = vpop.f32.mrb[60].mxu0  ;;  %v3064_v13 = vld [vmem:[#allocation3 + $0x390] sm:$0xff]  ;;  %1761 = vst.msk [vmem:[#allocation3 + $0x460] sm:$0xff] %vm849_vm0, %v1729_v57 }
 0x1e9   : > { %2941 = vst.msk [vmem:[#allocation3 + $0x3b8] sm:$0xff] %vm849_vm0, %v2909_v26  ;;  %5004 = vmatmul.mubr.msk.f32.gmra.mrb[84].mxu0 %vm849_vm0, %v3059_v53  ;;  %v2878_v10 = vld [vmem:[#allocation2 + $0xe9] sm:$0xff]  ;;  %879 = vst.msk [vmem:[#allocation2 + $0x100] sm:$0xff] %vm849_vm0, %v846_v39  ;;  %v809_v9 = vadd.f32 %v6699_v2, %v808_v21  ;;  %v810_v27 = vpop.f32.mrb[61].mxu0  ;;  %v7025_v53 = vsel %vm7002_vm15, 1.0, %v8001_v37  ;;  %v7035_v39 = vsel %vm7008_vm1, 1.0, %v8001_v37 }
 0x1ea   : > { %2202 = vrot.lane.b32.xlu0 %v2112_v47, %s5650_s24  ;;  %2049 = vst.msk [vmem:[#allocation3 + $0x440] sm:$0xff] %vm849_vm0, %v2017_v56  ;;  %2942 = vst.msk [vmem:[#allocation3 + $0x3e0] sm:$0xff] %vm849_vm0, %v2878_v10  ;;  %5006 = vmatprep.mubr.msk.f32.mxu0 %vm849_vm0, %v3064_v13  ;;  %v7018_v44 = vld [vmem:[#allocation2 + $0xe9] sm:$0xff]  ;;  %v4916_v47 = vadd.f32 %v4915_v19, %v4914_v52  ;;  %v1314_v52 = vand.u32 15, %v1092_v7 }
 0x1eb   : > { %1881 = vrot.lane.b32.xlu1 %v1791_v16, %s5650_s24  ;;  %v7020_v34 = vld [vmem:[#allocation2 + $0xf0] sm:$0xff]  ;;  %2050 = vst.msk [vmem:[#allocation3 + $0x468] sm:$0xff] %vm849_vm0, %v7018_v44  ;;  %v847_v56 = vmax.f32 %v809_v9, 0.0  ;;  %v1792_v16 = vld [vmem:[#allocation2 + $0xe0] sm:$0xff] }
 0x1ec   : > { %v2081_v48 = vld [vmem:[#allocation2 + $0xef] sm:$0xff]  ;;  %2337 = vst.msk [vmem:[#allocation3 + $0x448] sm:$0xff] %vm849_vm0, %v7020_v34  ;;  %v1048_v1 = vadd.f32 %v6699_v2, %v4916_v47  ;;  %v2592_v21 = vld [vmem:[#allocation2 + $0xf7] sm:$0xff]  ;;  %v813_v13 = vpop.f32.mrb[62].mxu0  ;;  %vm7059_vm3 = vcmp.lt.s32.totalorder %v1314_v52, 15 }
 0x1ed   : > { %v1698_v57 = vld [vmem:[#allocation2 + $0xef] sm:$0xff]  ;;  %v2624_v9 = vmul.f32 %v6922_v51, %v2592_v21  ;;  %880 = vst.msk [vmem:[#allocation2 + $0x108] sm:$0xff] %vm849_vm0, %v847_v56  ;;  %v814_v26 = vadd.f32 %v6699_v2, %v813_v13  ;;  %v2114_v27 = vmul.f32 %v6979_v45, %v2592_v21  ;;  %v815_v47 = vpop.f32.mrb[63].mxu0  ;;  %v1731_v0 = vmul.f32 %v7025_v53, %v2592_v21 }
 0x1ee   : > { %2204 = vrot.lane.b32.xlu0 %v2081_v48, %s5650_s24  ;;  %1762 = vst.msk [vmem:[#allocation3 + $0x488] sm:$0xff] %vm849_vm0, %v1698_v57  ;;  %2655 = vst.msk [vmem:[#allocation3 + $0x400] sm:$0xff] %vm849_vm0, %v1698_v57  ;;  %v2879_v10 = vld [vmem:[#allocation2 + $0xf1] sm:$0xff]  ;;  %v1793_v21 = vld [vmem:[#allocation2 + $0xe8] sm:$0xff] }
 0x1ef   : > { %v2911_v19 = vmul.f32 %v6917_v50, %v2879_v10  ;;  %1883 = vrot.lane.b32.xlu1 %v1792_v16, %s5650_s24  ;;  %v1987_v7 = vld [vmem:[#allocation2 + $0xf1] sm:$0xff]  ;;  %v1052_v50 = vmax.f32 %v1048_v1, 0.0  ;;  %2656 = vst.msk [vmem:[#allocation3 + $0x428] sm:$0xff] %vm849_vm0, %v2624_v9  ;;  %v848_v2 = vmax.f32 %v814_v26, 0.0  ;;  %1763 = vst.msk [vmem:[#allocation3 + $0x4b0] sm:$0xff] %vm849_vm0, %v1731_v0  ;;  %v8079_v0 = vmov 0.0  }
 0x1f0   : > { %v7046_v48 = vld [vmem:[#allocation2 + $0xf8] sm:$0xff]  ;;  %v3069_v57 = vld [vmem:[#allocation3 + $0x3b8] sm:$0xff]  ;;  %v2019_v37 = vmul.f32 %v7035_v39, %v1987_v7  ;;  %v7051_v51 = vmul.f32 %v6974_v4, %v1987_v7  ;;  %v1794_v47 = vld [vmem:[#allocation2 + $0xf0] sm:$0xff] }
 0x1f1   : > { %2338 = vst.msk [vmem:[#allocation3 + $0x470] sm:$0xff] %vm849_vm0, %v7046_v48  ;;  %2943 = vst.msk [vmem:[#allocation3 + $0x408] sm:$0xff] %vm849_vm0, %v2911_v19  ;;  %5007 = vmatmul.mubr.msk.f32.gmra.mrb[86].mxu0 %vm849_vm0, %v3069_v57  ;;  %v2880_v1 = vld [vmem:[#allocation2 + $0xf9] sm:$0xff]  ;;  %v3074_v10 = vld [vmem:[#allocation3 + $0x3e0] sm:$0xff]  ;;  %v1055_v13 = vmul.f32 0.0, %v1052_v50  ;;  %v2151_v16 = vpop.permute.xlu0 %2150 }
 0x1f2   : > { %2206 = vrot.lane.b32.xlu0 %v2114_v27, %s5650_s24  ;;  %2051 = vst.msk [vmem:[#allocation3 + $0x490] sm:$0xff] %vm849_vm0, %v2019_v37  ;;  %2944 = vst.msk [vmem:[#allocation3 + $0x430] sm:$0xff] %vm849_vm0, %v2880_v1  ;;  %5009 = vmatprep.mubr.msk.f32.mxu0 %vm849_vm0, %v3074_v10  ;;  %v7069_v52 = vld [vmem:[#allocation2 + $0xf9] sm:$0xff]  ;;  %v7080_v37 = vsel %vm7059_vm3, 1.0, %v8079_v0 }
 0x1f3   : > { %881 = vst.msk [vmem:[#allocation2 + $0x110] sm:$0xff] %vm849_vm0, %v848_v2  ;;  %1885 = vrot.lane.b32.xlu1 %v1793_v21, %s5650_s24  ;;  %v7071_v19 = vld [vmem:[#allocation2 + $0x100] sm:$0xff]  ;;  %1057 = vst.msk [vmem:[#allocation2 + $0x120] sm:$0xff] %vm849_vm0, %v1055_v13  ;;  %v2153_v27 = vpop.permute.xlu1 %2152 }
 0x1f4   : > { %2246 = vst.msk [vmem:[#allocation3 + $0x8] sm:$0xff] %vm1925_vm2, %v2151_v16  ;;  %v2083_v9 = vld [vmem:[#allocation2 + $0xff] sm:$0xff]  ;;  %v2594_v57 = vld [vmem:[#allocation2 + $0x107] sm:$0xff]  ;;  %2247 = vst.msk [vmem:[#allocation3 + $0x30] sm:$0xff] %vm1925_vm2, %v2153_v27 }
 0x1f5   : > { %2052 = vst.msk [vmem:[#allocation3 + $0x4b8] sm:$0xff] %vm849_vm0, %v7069_v52  ;;  %v1700_v26 = vld [vmem:[#allocation2 + $0xff] sm:$0xff]  ;;  %2339 = vst.msk [vmem:[#allocation3 + $0x498] sm:$0xff] %vm849_vm0, %v7071_v19  ;;  %v2626_v56 = vmul.f32 %v6979_v45, %v2594_v57  ;;  %v1830_v1 = vpop.permute.xlu0 %1829  ;;  %v2116_v10 = vmul.f32 %v7025_v53, %v2594_v57  ;;  %v7093_v13 = vld [vmem:[#allocation2 + $0x108] sm:$0xff] }
 0x1f6   : > { %2208 = vrot.lane.b32.xlu0 %v2083_v9, %s5650_s24  ;;  %1764 = vst.msk [vmem:[#allocation3 + $0x4d8] sm:$0xff] %vm849_vm0, %v1700_v26  ;;  %2657 = vst.msk [vmem:[#allocation3 + $0x450] sm:$0xff] %vm849_vm0, %v1700_v26  ;;  %v2881_v7 = vld [vmem:[#allocation2 + $0x101] sm:$0xff]  ;;  %v1795_v45 = vld [vmem:[#allocation2 + $0xf8] sm:$0xff] }
 0x1f7   : > { %v1989_v50 = vld [vmem:[#allocation2 + $0x101] sm:$0xff]  ;;  %v2913_v2 = vmul.f32 %v6974_v4, %v2881_v7  ;;  %1887 = vrot.lane.b32.xlu1 %v1794_v47, %s5650_s24  ;;  %1926 = vst.msk [vmem:[#allocation3] sm:$0xff] %vm1925_vm2, %v1830_v1  ;;  %v1832_v4 = vpop.permute.xlu1 %1831 }
 0x1f8   : > { %v2021_v21 = vmul.f32 %v7080_v37, %v1989_v50  ;;  %v3079_v16 = vld [vmem:[#allocation3 + $0x408] sm:$0xff]  ;;  %v7097_v9 = vmul.f32 %v7035_v39, %v1989_v50  ;;  %2340 = vst.msk [vmem:[#allocation3 + $0x4c0] sm:$0xff] %vm849_vm0, %v7093_v13  ;;  %2658 = vst.msk [vmem:[#allocation3 + $0x478] sm:$0xff] %vm849_vm0, %v2626_v56  ;;  %v3142_v26 = vld [vmem:[%s7986_s5 + $0x100] sm:$0xff] }
 0x1f9   : > { %2945 = vst.msk [vmem:[#allocation3 + $0x458] sm:$0xff] %vm849_vm0, %v2913_v2  ;;  %5010 = vmatmul.mubr.msk.f32.gmra.mrb[88].mxu0 %vm849_vm0, %v3079_v16  ;;  %v3143_v27 = vld [vmem:[%s7986_s5 + $0x108] sm:$0xff]  ;;  %v3084_v2 = vld [vmem:[#allocation3 + $0x430] sm:$0xff]  ;;  %v2155_v56 = vpop.permute.xlu0 %2154 }
 0x1fa   : > { %2210 = vrot.lane.b32.xlu0 %v2116_v10, %s5650_s24  ;;  %2053 = vst.msk [vmem:[#allocation3 + $0x4e0] sm:$0xff] %vm849_vm0, %v2021_v21  ;;  %v2882_v47 = vld [vmem:[#allocation2 + $0x109] sm:$0xff]  ;;  %v2883_v7 = vld [vmem:[#allocation2 + $0x111] sm:$0xff]  ;;  %5012 = vmatprep.mubr.msk.f32.mxu0 %vm849_vm0, %v3084_v2  ;;  %v2885_v16 = vld [vmem:[#allocation2 + $0x121] sm:$0xff] }
 0x1fb   : > { %1927 = vst.msk [vmem:[#allocation3 + $0x28] sm:$0xff] %vm1925_vm2, %v1832_v4  ;;  %v2596_v57 = vld [vmem:[#allocation2 + $0x117] sm:$0xff]  ;;  %1889 = vrot.lane.b32.xlu1 %v1795_v45, %s5650_s24  ;;  %v2915_v10 = vmul.f32 %v7035_v39, %v2883_v7  ;;  %2248 = vst.msk [vmem:[#allocation3 + $0x58] sm:$0xff] %vm1925_vm2, %v2155_v56  ;;  %v2085_v21 = vld [vmem:[#allocation2 + $0x10f] sm:$0xff]  ;;  %v2917_v7 = vmul.f32 %v7080_v37, %v2885_v16 }
 0x1fc   : > { %2946 = vst.msk [vmem:[#allocation3 + $0x480] sm:$0xff] %vm849_vm0, %v2882_v47  ;;  %v2628_v50 = vmul.f32 %v7025_v53, %v2596_v57  ;;  %v2951_v1 = vld [vmem:[#allocation3 + $0x8] sm:$0xff]  ;;  %v7119_v4 = vld [vmem:[#allocation2 + $0x110] sm:$0xff]  ;;  %v1834_v53 = vpop.permute.xlu1 %1833  ;;  %v5182_v47 = vpack.c.bf16 %v3143_v27, %v3142_v26  ;;  %v1796_v57 = vld [vmem:[#allocation2 + $0x100] sm:$0xff] }
 0x1fd   : > { %3349 = vmatprep.mubr.f32.mxu1 %v2951_v1  ;;  %v3144_v45 = vld [vmem:[%s7986_s5 + $0x110] sm:$0xff]  ;;  %v3145_v39 = vld [vmem:[%s7986_s5 + $0x118] sm:$0xff]  ;;  %2947 = vst.msk [vmem:[#allocation3 + $0x4a8] sm:$0xff] %vm849_vm0, %v2915_v10  ;;  %2341 = vst.msk [vmem:[#allocation3 + $0x4e8] sm:$0xff] %vm849_vm0, %v7119_v4 }
 0x1fe   : > { %2660 = vst.msk [vmem:[#allocation3 + $0x4c8] sm:$0xff] %vm849_vm0, %v2628_v50  ;;  %2212 = vrot.lane.b32.xlu0 %v2085_v21, %s5650_s24  ;;  %v2884_v50 = vld [vmem:[#allocation2 + $0x119] sm:$0xff]  ;;  %v2595_v26 = vld [vmem:[#allocation2 + $0x10f] sm:$0xff]  ;;  %v2157_v27 = vpop.permute.xlu0 %2156  ;;  %2949 = vst.msk [vmem:[#allocation3 + $0x4f8] sm:$0xff] %vm849_vm0, %v2917_v7 }
 0x1ff   : > { %1928 = vst.msk [vmem:[#allocation3 + $0x50] sm:$0xff] %vm1925_vm2, %v1834_v53  ;;  %1891 = vrot.lane.b32.xlu1 %v1796_v57, %s5650_s24  ;;  %v2950_v2 = vld [vmem:[#allocation3] sm:$0xff]  ;;  %v2597_v56 = vld [vmem:[#allocation2 + $0x11f] sm:$0xff]  ;;  %2249 = vst.msk [vmem:[#allocation3 + $0x80] sm:$0xff] %vm1925_vm2, %v2157_v27  ;;  %v5185_v53 = vpack.c.bf16 %v3145_v39, %v3144_v45 }
 0x200   : > { %2948 = vst.msk [vmem:[#allocation3 + $0x4d0] sm:$0xff] %vm849_vm0, %v2884_v50  ;;  %2659 = vst.msk [vmem:[#allocation3 + $0x4a0] sm:$0xff] %vm849_vm0, %v2595_v26  ;;  %3350 = vmatmul.mubr.f32.vlgmr.msra.gmra.mrb[8].mxu1 %v2950_v2  ;;  %v3089_v1 = vld [vmem:[#allocation3 + $0x458] sm:$0xff]  ;;  %v2956_v21 = vld [vmem:[#allocation3 + $0x30] sm:$0xff]  ;;  %v1836_v16 = vpop.permute.xlu1 %1835  ;;  %v8080_v26 = vmov 0.0|0.0  }
 0x201   : > { %2661 = vst.msk [vmem:[#allocation3 + $0x4f0] sm:$0xff] %vm849_vm0, %v2597_v56  ;;  %5183 = vmatpush1.bf16.msra.mxu1 %v5182_v47  ;;  %5013 = vmatmul.mubr.msk.f32.gmra.mrb[90].mxu0 %vm849_vm0, %v3089_v1  ;;  %v2662_v10 = vld [vmem:[#allocation2 + $0x28] sm:$0xff]  ;;  %v3146_v57 = vld [vmem:[%s7986_s5 + $0x120] sm:$0xff]  ;;  %v2663_v2 = vld [vmem:[#allocation2 + $0x30] sm:$0xff] }
 0x202   : > { %2726 = vrot.lane.b32.xlu0 %v2662_v10, %s5650_s24  ;;  %3354 = vmatprep.mubr.f32.mxu1 %v2956_v21  ;;  %1929 = vst.msk [vmem:[#allocation3 + $0x78] sm:$0xff] %vm1925_vm2, %v1836_v16  ;;  %v3147_v47 = vld [vmem:[%s7986_s5 + $0x128] sm:$0xff]  ;;  %v2159_v50 = vpop.permute.xlu0 %2158  ;;  %v2955_v45 = vld [vmem:[#allocation3 + $0x28] sm:$0xff] }
 0x203   : > { %v3094_v7 = vld [vmem:[#allocation3 + $0x480] sm:$0xff]  ;;  %2438 = vrot.lane.b32.xlu1 %v6321_v63, %s5650_s24  ;;  %v2961_v39 = vld [vmem:[#allocation3 + $0x58] sm:$0xff]  ;;  %2250 = vst.msk [vmem:[#allocation3 + $0xa8] sm:$0xff] %vm1925_vm2, %v2159_v50  ;;  %5184 = vmatprep.subr.bf16.mxu1 %v8080_v26  ;;  %v5188_v1 = vpack.c.bf16 %v3147_v47, %v3146_v57  ;;  %v3149_v10 = vld [vmem:[%s7986_s5 + $0x138] sm:$0xff] }
 0x204   : > { %5015 = vmatprep.mubr.msk.f32.mxu0 %vm849_vm0, %v3094_v7  ;;  %3355 = vmatmul.mubr.f32.gmra.mrb[10].mxu1 %v2955_v45  ;;  %v3099_v27 = vld [vmem:[#allocation3 + $0x4a8] sm:$0xff]  ;;  %v1838_v56 = vpop.permute.xlu1 %1837  ;;  %v3148_v63 = vld [vmem:[%s7986_s5 + $0x130] sm:$0xff] }
 0x205   : > { %3359 = vmatprep.mubr.f32.mxu1 %v2961_v39  ;;  %5186 = vmatpush1.bf16.msra.mxu1 %v5185_v53  ;;  %1930 = vst.msk [vmem:[#allocation3 + $0xa0] sm:$0xff] %vm1925_vm2, %v1838_v56  ;;  %v2664_v57 = vld [vmem:[#allocation2 + $0x38] sm:$0xff]  ;;  %v5191_v50 = vpack.c.bf16 %v3149_v10, %v3148_v63  ;;  %v3109_v45 = vld [vmem:[#allocation3 + $0x4f8] sm:$0xff] }
 0x206   : > { %2728 = vrot.lane.b32.xlu0 %v2663_v2, %s5650_s24  ;;  %5016 = vmatmul.mubr.msk.f32.gmra.mrb[92].mxu0 %vm849_vm0, %v3099_v27  ;;  %v2161_v16 = vpop.permute.xlu0 %2160  ;;  %v2960_v53 = vld [vmem:[#allocation3 + $0x50] sm:$0xff]  ;;  %v2966_v7 = vld [vmem:[#allocation3 + $0x80] sm:$0xff]  ;;  %v3151_v39 = vld [vmem:[%s7986_s5 + $0x148] sm:$0xff] }
 0x207   : > { %v3104_v21 = vld [vmem:[#allocation3 + $0x4d0] sm:$0xff]  ;;  %2440 = vrot.lane.b32.xlu1 %v6349_v22, %s5650_s24  ;;  %5187 = vmatprep.subr.bf16.mxu1 %v8080_v26  ;;  %2251 = vst.msk [vmem:[#allocation3 + $0xd0] sm:$0xff] %vm1925_vm2, %v2161_v16 }
 0x208   : > { %3360 = vmatmul.mubr.f32.gmra.mrb[12].mxu1 %v2960_v53  ;;  %5018 = vmatprep.mubr.msk.f32.mxu0 %vm849_vm0, %v3104_v21  ;;  %v1840_v47 = vpop.permute.xlu1 %1839  ;;  %v3150_v22 = vld [vmem:[%s7986_s5 + $0x140] sm:$0xff]  ;;  %v3153_v21 = vld [vmem:[%s7986_s5 + $0x158] sm:$0xff] }
 0x209   : > { %3364 = vmatprep.mubr.f32.mxu1 %v2966_v7  ;;  %5189 = vmatpush1.bf16.msra.mxu1 %v5188_v1  ;;  %1931 = vst.msk [vmem:[#allocation3 + $0xc8] sm:$0xff] %vm1925_vm2, %v1840_v47  ;;  %v2965_v2 = vld [vmem:[#allocation3 + $0x78] sm:$0xff]  ;;  %v2665_v1 = vld [vmem:[#allocation2 + $0x40] sm:$0xff]  ;;  %v5194_v10 = vpack.c.bf16 %v3151_v39, %v3150_v22 }
 0x20a   : > { %2730 = vrot.lane.b32.xlu0 %v2664_v57, %s5650_s24  ;;  %5190 = vmatprep.subr.bf16.mxu1 %v8080_v26  ;;  %v2163_v27 = vpop.permute.xlu0 %2162  ;;  %v2971_v56 = vld [vmem:[#allocation3 + $0xa8] sm:$0xff]  ;;  %v2666_v57 = vld [vmem:[#allocation2 + $0x48] sm:$0xff] }
 0x20b   : > { %2442 = vrot.lane.b32.xlu1 %v6370_v33, %s5650_s24  ;;  %5019 = vmatmul.mubr.msk.f32.gmra.mrb[94].mxu0 %vm849_vm0, %v3109_v45  ;;  %2252 = vst.msk [vmem:[#allocation3 + $0xf8] sm:$0xff] %vm1925_vm2, %v2163_v27  ;;  %v3152_v33 = vld [vmem:[%s7986_s5 + $0x150] sm:$0xff]  ;;  %v3155_v45 = vld [vmem:[%s7986_s5 + $0x168] sm:$0xff] }
 0x20c   : > { %3365 = vmatmul.mubr.f32.gmra.mrb[14].mxu1 %v2965_v2  ;;  %4180 = vmatprep.mubr.f32.mxu0 %v8079_v0  ;;  %v1842_v63 = vpop.permute.xlu1 %1841  ;;  %v2970_v53 = vld [vmem:[#allocation3 + $0xa0] sm:$0xff] }
 0x20d   : > { %3369 = vmatprep.mubr.f32.mxu1 %v2971_v56  ;;  %5192 = vmatpush1.bf16.msra.mxu1 %v5191_v50  ;;  %1932 = vst.msk [vmem:[#allocation3 + $0xf0] sm:$0xff] %vm1925_vm2, %v1842_v63  ;;  %v5197_v50 = vpack.c.bf16 %v3153_v21, %v3152_v33  ;;  %v2667_v2 = vld [vmem:[#allocation2 + $0x50] sm:$0xff]  ;;  %v3157_v63 = vld [vmem:[%s7986_s5 + $0x178] sm:$0xff] }
 0x20e   : > { %2732 = vrot.lane.b32.xlu0 %v2665_v1, %s5650_s24  ;;  %5193 = vmatprep.subr.bf16.mxu1 %v8080_v26  ;;  %v2165_v16 = vpop.permute.xlu0 %2164  ;;  %v2976_v7 = vld [vmem:[#allocation3 + $0xd0] sm:$0xff] }
 0x20f   : > { %2444 = vrot.lane.b32.xlu1 %v6397_v61, %s5650_s24  ;;  %2253 = vst.msk [vmem:[#allocation3 + $0x120] sm:$0xff] %vm1925_vm2, %v2165_v16  ;;  %v3154_v61 = vld [vmem:[%s7986_s5 + $0x160] sm:$0xff]  ;;  %v2668_v16 = vld [vmem:[#allocation2 + $0x58] sm:$0xff] }
 0x210   : > { %3370 = vmatmul.mubr.f32.gmra.mrb[16].mxu1 %v2970_v53  ;;  %v1844_v47 = vpop.permute.xlu1 %1843  ;;  %v2975_v39 = vld [vmem:[#allocation3 + $0xc8] sm:$0xff]  ;;  %v5200_v1 = vpack.c.bf16 %v3155_v45, %v3154_v61  ;;  %v2669_v45 = vld [vmem:[#allocation2 + $0x60] sm:$0xff] }
 0x211   : > { %3374 = vmatprep.mubr.f32.mxu1 %v2976_v7  ;;  %5195 = vmatpush1.bf16.msra.mxu1 %v5194_v10  ;;  %1933 = vst.msk [vmem:[#allocation3 + $0x118] sm:$0xff] %vm1925_vm2, %v1844_v47 }
 0x212   : > { %2734 = vrot.lane.b32.xlu0 %v2666_v57, %s5650_s24  ;;  %5196 = vmatprep.subr.bf16.mxu1 %v8080_v26  ;;  %v2167_v22 = vpop.permute.xlu0 %2166  ;;  %v2981_v27 = vld [vmem:[#allocation3 + $0xf8] sm:$0xff] }
 0x213   : > { %2446 = vrot.lane.b32.xlu1 %v6420_v12, %s5650_s24  ;;  %2254 = vst.msk [vmem:[#allocation3 + $0x148] sm:$0xff] %vm1925_vm2, %v2167_v22  ;;  %v3156_v12 = vld [vmem:[%s7986_s5 + $0x170] sm:$0xff]  ;;  %v3159_v57 = vld [vmem:[%s7986_s5 + $0x188] sm:$0xff] }
 0x214   : > { %3375 = vmatmul.mubr.f32.gmra.mrb[18].mxu1 %v2975_v39  ;;  %v1846_v56 = vpop.permute.xlu1 %1845  ;;  %v2980_v33 = vld [vmem:[#allocation3 + $0xf0] sm:$0xff]  ;;  %v5203_v7 = vpack.c.bf16 %v3157_v63, %v3156_v12  ;;  %v2670_v12 = vld [vmem:[#allocation2 + $0x68] sm:$0xff] }
 0x215   : > { %3379 = vmatprep.mubr.f32.mxu1 %v2981_v27  ;;  %5198 = vmatpush1.bf16.msra.mxu1 %v5197_v50  ;;  %1934 = vst.msk [vmem:[#allocation3 + $0x140] sm:$0xff] %vm1925_vm2, %v1846_v56  ;;  %v3161_v27 = vld [vmem:[%s7986_s5 + $0x198] sm:$0xff] }
 0x216   : > { %2736 = vrot.lane.b32.xlu0 %v2667_v2, %s5650_s24  ;;  %5199 = vmatprep.subr.bf16.mxu1 %v8080_v26  ;;  %v2169_v10 = vpop.permute.xlu0 %2168  ;;  %v2986_v21 = vld [vmem:[#allocation3 + $0x120] sm:$0xff] }
 0x217   : > { %2448 = vrot.lane.b32.xlu1 %v6447_v8, %s5650_s24  ;;  %2255 = vst.msk [vmem:[#allocation3 + $0x170] sm:$0xff] %vm1925_vm2, %v2169_v10  ;;  %v3158_v8 = vld [vmem:[%s7986_s5 + $0x180] sm:$0xff] }
 0x218   : > { %3380 = vmatmul.mubr.f32.gmra.mrb[20].mxu1 %v2980_v33  ;;  %v1848_v53 = vpop.permute.xlu1 %1847  ;;  %v2985_v50 = vld [vmem:[#allocation3 + $0x118] sm:$0xff]  ;;  %v5206_v39 = vpack.c.bf16 %v3159_v57, %v3158_v8 }
 0x219   : > { %3384 = vmatprep.mubr.f32.mxu1 %v2986_v21  ;;  %5201 = vmatpush1.bf16.msra.mxu1 %v5200_v1  ;;  %1935 = vst.msk [vmem:[#allocation3 + $0x168] sm:$0xff] %vm1925_vm2, %v1848_v53  ;;  %v3163_v33 = vld [vmem:[%s7986_s5 + $0x1a8] sm:$0xff] }
 0x21a   : > { %2738 = vrot.lane.b32.xlu0 %v2668_v16, %s5650_s24  ;;  %5202 = vmatprep.subr.bf16.mxu1 %v8080_v26  ;;  %v2991_v61 = vld [vmem:[#allocation3 + $0x148] sm:$0xff] }
 0x21b   : > { %v2171_v47 = vpop.permute.xlu0 %2170  ;;  %2450 = vrot.lane.b32.xlu1 %v6471_v54, %s5650_s24  ;;  %v3160_v54 = vld [vmem:[%s7986_s5 + $0x190] sm:$0xff] }
 0x21c   : > { %2256 = vst.msk [vmem:[#allocation3 + $0x198] sm:$0xff] %vm1925_vm2, %v2171_v47  ;;  %3385 = vmatmul.mubr.f32.gmra.mrb[22].mxu1 %v2985_v50  ;;  %v1850_v22 = vpop.permute.xlu1 %1849  ;;  %v2990_v56 = vld [vmem:[#allocation3 + $0x140] sm:$0xff]  ;;  %v5209_v10 = vpack.c.bf16 %v3161_v27, %v3160_v54  ;;  %v3165_v47 = vld [vmem:[%s7986_s5 + $0x1b8] sm:$0xff]  ;;  %v3167_v27 = vld [vmem:[%s7986_s5 + $0x1c8] sm:$0xff] }
 0x21d   : > { %3389 = vmatprep.mubr.f32.mxu1 %v2991_v61  ;;  %5204 = vmatpush1.bf16.msra.mxu1 %v5203_v7  ;;  %1936 = vst.msk [vmem:[#allocation3 + $0x190] sm:$0xff] %vm1925_vm2, %v1850_v22  ;;  %v2671_v7 = vld [vmem:[#allocation2 + $0x70] sm:$0xff]  ;;  %v2672_v22 = vld [vmem:[#allocation2 + $0x78] sm:$0xff] }
 0x21e   : > { %2740 = vrot.lane.b32.xlu0 %v2669_v45, %s5650_s24  ;;  %5205 = vmatprep.subr.bf16.mxu1 %v8080_v26  ;;  %v2996_v1 = vld [vmem:[#allocation3 + $0x170] sm:$0xff] }
 0x21f   : > { %v2173_v2 = vpop.permute.xlu0 %2172  ;;  %2452 = vrot.lane.b32.xlu1 %v6498_v43, %s5650_s24  ;;  %v3162_v43 = vld [vmem:[%s7986_s5 + $0x1a0] sm:$0xff] }
 0x220   : > { %2257 = vst.msk [vmem:[#allocation3 + $0x1c0] sm:$0xff] %vm1925_vm2, %v2173_v2  ;;  %3390 = vmatmul.mubr.f32.gmra.mrb[24].mxu1 %v2990_v56  ;;  %v1852_v63 = vpop.permute.xlu1 %1851  ;;  %v2995_v16 = vld [vmem:[#allocation3 + $0x168] sm:$0xff]  ;;  %v5212_v57 = vpack.c.bf16 %v3163_v33, %v3162_v43 }
 0x221   : > { %3394 = vmatprep.mubr.f32.mxu1 %v2996_v1  ;;  %5207 = vmatpush1.bf16.msra.mxu1 %v5206_v39  ;;  %1937 = vst.msk [vmem:[#allocation3 + $0x1b8] sm:$0xff] %vm1925_vm2, %v1852_v63  ;;  %v3169_v43 = vld [vmem:[%s7986_s5 + $0x1d8] sm:$0xff] }
 0x222   : > { %2742 = vrot.lane.b32.xlu0 %v2670_v12, %s5650_s24  ;;  %5208 = vmatprep.subr.bf16.mxu1 %v8080_v26  ;;  %v2673_v12 = vld [vmem:[#allocation2 + $0x80] sm:$0xff] }
 0x223   : > { %v2175_v21 = vpop.permute.xlu0 %2174  ;;  %2454 = vrot.lane.b32.xlu1 %v6522_v31, %s5650_s24  ;;  %v3001_v53 = vld [vmem:[#allocation3 + $0x198] sm:$0xff]  ;;  %v3164_v31 = vld [vmem:[%s7986_s5 + $0x1b0] sm:$0xff] }
 0x224   : > { %2258 = vst.msk [vmem:[#allocation3 + $0x1e8] sm:$0xff] %vm1925_vm2, %v2175_v21  ;;  %3395 = vmatmul.mubr.f32.gmra.mrb[26].mxu1 %v2995_v16  ;;  %v1854_v8 = vpop.permute.xlu1 %1853  ;;  %v3000_v61 = vld [vmem:[#allocation3 + $0x190] sm:$0xff]  ;;  %v5215_v54 = vpack.c.bf16 %v3165_v47, %v3164_v31 }
 0x225   : > { %3399 = vmatprep.mubr.f32.mxu1 %v3001_v53  ;;  %5210 = vmatpush1.bf16.msra.mxu1 %v5209_v10  ;;  %1938 = vst.msk [vmem:[#allocation3 + $0x1e0] sm:$0xff] %vm1925_vm2, %v1854_v8  ;;  %v2674_v53 = vld [vmem:[#allocation2 + $0x88] sm:$0xff] }
 0x226   : > { %2744 = vrot.lane.b32.xlu0 %v2671_v7, %s5650_s24  ;;  %5211 = vmatprep.subr.bf16.mxu1 %v8080_v26 }
 0x227   : > { %v2177_v50 = vpop.permute.xlu0 %2176  ;;  %2456 = vrot.lane.b32.xlu1 %v6549_v17, %s5650_s24  ;;  %v3006_v45 = vld [vmem:[#allocation3 + $0x1c0] sm:$0xff]  ;;  %v3166_v17 = vld [vmem:[%s7986_s5 + $0x1c0] sm:$0xff] }
 0x228   : > { %2259 = vst.msk [vmem:[#allocation3 + $0x210] sm:$0xff] %vm1925_vm2, %v2177_v50  ;;  %3400 = vmatmul.mubr.f32.gmra.mrb[28].mxu1 %v3000_v61  ;;  %v1856_v39 = vpop.permute.xlu1 %1855  ;;  %v3005_v56 = vld [vmem:[#allocation3 + $0x1b8] sm:$0xff]  ;;  %v5218_v10 = vpack.c.bf16 %v3167_v27, %v3166_v17  ;;  %v2675_v61 = vld [vmem:[#allocation2 + $0x90] sm:$0xff] }
 0x229   : > { %3404 = vmatprep.mubr.f32.mxu1 %v3006_v45  ;;  %5213 = vmatpush1.bf16.msra.mxu1 %v5212_v57  ;;  %1939 = vst.msk [vmem:[#allocation3 + $0x208] sm:$0xff] %vm1925_vm2, %v1856_v39  ;;  %v3171_v57 = vld [vmem:[%s7986_s5 + $0x1e8] sm:$0xff]  ;;  %v3173_v39 = vld [vmem:[%s7986_s5 + $0x1f8] sm:$0xff] }
 0x22a   : > { %2746 = vrot.lane.b32.xlu0 %v2672_v22, %s5650_s24  ;;  %5214 = vmatprep.subr.bf16.mxu1 %v8080_v26 }
 0x22b   : > { %v2179_v2 = vpop.permute.xlu0 %2178  ;;  %2458 = vrot.lane.b32.xlu1 %v6573_v14, %s5650_s24  ;;  %v3011_v1 = vld [vmem:[#allocation3 + $0x1e8] sm:$0xff]  ;;  %v3168_v14 = vld [vmem:[%s7986_s5 + $0x1d0] sm:$0xff] }
 0x22c   : > { %2260 = vst.msk [vmem:[#allocation3 + $0x238] sm:$0xff] %vm1925_vm2, %v2179_v2  ;;  %3405 = vmatmul.mubr.f32.gmra.mrb[30].mxu1 %v3005_v56  ;;  %v1858_v63 = vpop.permute.xlu1 %1857  ;;  %v3010_v21 = vld [vmem:[#allocation3 + $0x1e0] sm:$0xff]  ;;  %v5221_v8 = vpack.c.bf16 %v3169_v43, %v3168_v14 }
 0x22d   : > { %3409 = vmatprep.mubr.f32.mxu1 %v3011_v1  ;;  %5216 = vmatpush1.bf16.msra.mxu1 %v5215_v54  ;;  %1940 = vst.msk [vmem:[#allocation3 + $0x230] sm:$0xff] %vm1925_vm2, %v1858_v63 }
 0x22e   : > { %2748 = vrot.lane.b32.xlu0 %v2673_v12, %s5650_s24  ;;  %5217 = vmatprep.subr.bf16.mxu1 %v8080_v26 }
 0x22f   : > { %v2181_v33 = vpop.permute.xlu0 %2180  ;;  %2460 = vrot.lane.b32.xlu1 %v6600_v60, %s5650_s24  ;;  %v3016_v16 = vld [vmem:[#allocation3 + $0x210] sm:$0xff] }
 0x230   : > { %2261 = vst.msk [vmem:[#allocation3 + $0x260] sm:$0xff] %vm1925_vm2, %v2181_v33  ;;  %3410 = vmatmul.mubr.f32.gmra.mrb[32].mxu1 %v3010_v21  ;;  %v1860_v7 = vpop.permute.xlu1 %1859  ;;  %v3170_v60 = vld [vmem:[%s7986_s5 + $0x1e0] sm:$0xff]  ;;  %v3015_v47 = vld [vmem:[#allocation3 + $0x208] sm:$0xff] }
 0x231   : > { %3414 = vmatprep.mubr.f32.mxu1 %v3016_v16  ;;  %5219 = vmatpush1.bf16.msra.mxu1 %v5218_v10  ;;  %1941 = vst.msk [vmem:[#allocation3 + $0x258] sm:$0xff] %vm1925_vm2, %v1860_v7  ;;  %v5224_v22 = vpack.c.bf16 %v3171_v57, %v3170_v60 }
 0x232   : > { %2750 = vrot.lane.b32.xlu0 %v2674_v53, %s5650_s24  ;;  %5220 = vmatprep.subr.bf16.mxu1 %v8080_v26 }
 0x233   : > { %v2183_v31 = vpop.permute.xlu0 %2182  ;;  %2462 = vrot.lane.b32.xlu1 %v6624_v41, %s5650_s24  ;;  %v3021_v50 = vld [vmem:[#allocation3 + $0x238] sm:$0xff]  ;;  %v3172_v41 = vld [vmem:[%s7986_s5 + $0x1f0] sm:$0xff] }
 0x234   : > { %2262 = vst.msk [vmem:[#allocation3 + $0x288] sm:$0xff] %vm1925_vm2, %v2183_v31  ;;  %3415 = vmatmul.mubr.f32.gmra.mrb[34].mxu1 %v3015_v47  ;;  %v1862_v45 = vpop.permute.xlu1 %1861  ;;  %v3020_v17 = vld [vmem:[#allocation3 + $0x230] sm:$0xff]  ;;  %v5227_v56 = vpack.c.bf16 %v3173_v39, %v3172_v41 }
 0x235   : > { %3419 = vmatprep.mubr.f32.mxu1 %v3021_v50  ;;  %5222 = vmatpush1.bf16.msra.mxu1 %v5221_v8  ;;  %1942 = vst.msk [vmem:[#allocation3 + $0x280] sm:$0xff] %vm1925_vm2, %v1862_v45 }
 0x236   : > { %2752 = vrot.lane.b32.xlu0 %v2675_v61, %s5650_s24  ;;  %5223 = vmatprep.subr.bf16.mxu1 %v8080_v26 }
 0x237   : > { %v2185_v54 = vpop.permute.xlu0 %2184  ;;  %2464 = vrot.lane.b32.xlu1 %v6651_v6, %s5650_s24  ;;  %v3026_v27 = vld [vmem:[#allocation3 + $0x260] sm:$0xff] }
 0x238   : > { %2263 = vst.msk [vmem:[#allocation3 + $0x2b0] sm:$0xff] %vm1925_vm2, %v2185_v54  ;;  %3420 = vmatmul.mubr.f32.gmra.mrb[36].mxu1 %v3020_v17  ;;  %v1864_v2 = vpop.permute.xlu1 %1863  ;;  %v3025_v6 = vld [vmem:[#allocation3 + $0x258] sm:$0xff] }
 0x239   : > { %3424 = vmatprep.mubr.f32.mxu1 %v3026_v27  ;;  %5225 = vmatpush1.bf16.msra.mxu1 %v5224_v22  ;;  %1943 = vst.msk [vmem:[#allocation3 + $0x2a8] sm:$0xff] %vm1925_vm2, %v1864_v2 }
 0x23a   : > { %2754 = vrot.lane.b32.xlu0 %v6704_v11, %s5650_s24  ;;  %5226 = vmatprep.subr.bf16.mxu1 %v8080_v26 }
 0x23b   : > { %v2187_v1 = vpop.permute.xlu0 %2186  ;;  %2466 = vrot.lane.b32.xlu1 %v6675_v38, %s5650_s24  ;;  %v3031_v12 = vld [vmem:[#allocation3 + $0x288] sm:$0xff] }
 0x23c   : > { %2264 = vst.msk [vmem:[#allocation3 + $0x2d8] sm:$0xff] %vm1925_vm2, %v2187_v1  ;;  %3425 = vmatmul.mubr.f32.gmra.mrb[38].mxu1 %v3025_v6  ;;  %v1866_v63 = vpop.permute.xlu1 %1865  ;;  %v3030_v26 = vld [vmem:[#allocation3 + $0x280] sm:$0xff] }
 0x23d   : > { %3429 = vmatprep.mubr.f32.mxu1 %v3031_v12  ;;  %5228 = vmatpush1.bf16.msra.mxu1 %v5227_v56  ;;  %1944 = vst.msk [vmem:[#allocation3 + $0x2d0] sm:$0xff] %vm1925_vm2, %v1866_v63 }
 0x23e   : > { %2756 = vrot.lane.b32.xlu0 %v6736_v32, %s5650_s24 }
 0x23f   : > { %v2189_v11 = vpop.permute.xlu0 %2188  ;;  %2468 = vrot.lane.b32.xlu1 %v6709_v15, %s5650_s24  ;;  %v3036_v10 = vld [vmem:[#allocation3 + $0x2b0] sm:$0xff] }
 0x240   : > { %2265 = vst.msk [vmem:[#allocation3 + $0x300] sm:$0xff] %vm1925_vm2, %v2189_v11  ;;  %3430 = vmatmul.mubr.f32.gmra.mrb[40].mxu1 %v3030_v26  ;;  %v1868_v38 = vpop.permute.xlu1 %1867  ;;  %v3035_v32 = vld [vmem:[#allocation3 + $0x2a8] sm:$0xff] }
 0x241   : > { %3434 = vmatprep.mubr.f32.mxu1 %v3036_v10  ;;  %1945 = vst.msk [vmem:[#allocation3 + $0x2f8] sm:$0xff] %vm1925_vm2, %v1868_v38  ;;  %v2692_v38 = vld [vmem:[#allocation2 + $0x118] sm:$0xff] }
 0x242   : > { %2758 = vrot.lane.b32.xlu0 %v6761_v18, %s5650_s24 }
 0x243   : > { %v2191_v14 = vpop.permute.xlu0 %2190  ;;  %2470 = vrot.lane.b32.xlu1 %v6734_v30, %s5650_s24  ;;  %v3041_v43 = vld [vmem:[#allocation3 + $0x2d8] sm:$0xff] }
 0x244   : > { %2266 = vst.msk [vmem:[#allocation3 + $0x328] sm:$0xff] %vm1925_vm2, %v2191_v14  ;;  %3435 = vmatmul.mubr.f32.gmra.mrb[42].mxu1 %v3035_v32  ;;  %v1870_v15 = vpop.permute.xlu1 %1869  ;;  %v3040_v18 = vld [vmem:[#allocation3 + $0x2d0] sm:$0xff] }
 0x245   : > { %3439 = vmatprep.mubr.f32.mxu1 %v3041_v43  ;;  %1946 = vst.msk [vmem:[#allocation3 + $0x320] sm:$0xff] %vm1925_vm2, %v1870_v15  ;;  %v2372_v43 = vld [vmem:[#allocation2 + $0x109] sm:$0xff] }
 0x246   : > { %2760 = vrot.lane.b32.xlu0 %v6793_v25, %s5650_s24 }
 0x247   : > { %2472 = vrot.lane.b32.xlu1 %v6766_v3, %s5650_s24  ;;  %v3046_v21 = vld [vmem:[#allocation3 + $0x300] sm:$0xff] }
 0x248   : > { %v2193_v33 = vpop.permute.xlu0 %2192  ;;  %3440 = vmatmul.mubr.f32.gmra.mrb[44].mxu1 %v3040_v18  ;;  %v1872_v30 = vpop.permute.xlu1 %1871  ;;  %v3045_v25 = vld [vmem:[#allocation3 + $0x2f8] sm:$0xff] }
 0x249   : > { %2267 = vst.msk [vmem:[#allocation3 + $0x350] sm:$0xff] %vm1925_vm2, %v2193_v33  ;;  %3444 = vmatprep.mubr.f32.mxu1 %v3046_v21  ;;  %1947 = vst.msk [vmem:[#allocation3 + $0x348] sm:$0xff] %vm1925_vm2, %v1872_v30  ;;  %v2693_v33 = vld [vmem:[#allocation2 + $0x120] sm:$0xff]  ;;  %v3993_v30 = vld [vmem:[%s7988_s7 + $0x8] sm:$0xff] }
 0x24a   : > { %2762 = vrot.lane.b32.xlu0 %v6818_v59, %s5650_s24 }
 0x24b   : > { %2474 = vrot.lane.b32.xlu1 %v6791_v24, %s5650_s24  ;;  %v3051_v53 = vld [vmem:[#allocation3 + $0x328] sm:$0xff] }
 0x24c   : > { %v2195_v16 = vpop.permute.xlu0 %2194  ;;  %3445 = vmatmul.mubr.f32.gmra.mrb[46].mxu1 %v3045_v25  ;;  %v1874_v3 = vpop.permute.xlu1 %1873  ;;  %v3050_v59 = vld [vmem:[#allocation3 + $0x320] sm:$0xff] }
 0x24d   : > { %2268 = vst.msk [vmem:[#allocation3 + $0x378] sm:$0xff] %vm1925_vm2, %v2195_v16  ;;  %3449 = vmatprep.mubr.f32.mxu1 %v3051_v53  ;;  %1948 = vst.msk [vmem:[#allocation3 + $0x370] sm:$0xff] %vm1925_vm2, %v1874_v3  ;;  %v3995_v16 = vld [vmem:[%s7988_s7 + $0x18] sm:$0xff] }
 0x24e   : > { %2764 = vrot.lane.b32.xlu0 %v6850_v23, %s5650_s24 }
 0x24f   : > { %2476 = vrot.lane.b32.xlu1 %v6823_v28, %s5650_s24 }
 0x250   : > { %v2197_v7 = vpop.permute.xlu0 %2196  ;;  %v3056_v8 = vld [vmem:[#allocation3 + $0x350] sm:$0xff]  ;;  %3450 = vmatmul.mubr.f32.gmra.mrb[48].mxu1 %v3050_v59  ;;  %v1876_v24 = vpop.permute.xlu1 %1875  ;;  %v3055_v23 = vld [vmem:[#allocation3 + $0x348] sm:$0xff]  ;;  %v5245_v59 = vpack.c.bf16 %v3995_v16, %v3993_v30 }
 0x251   : > { %2269 = vst.msk [vmem:[#allocation3 + $0x3a0] sm:$0xff] %vm1925_vm2, %v2197_v7  ;;  %3454 = vmatprep.mubr.f32.mxu1 %v3056_v8  ;;  %1949 = vst.msk [vmem:[#allocation3 + $0x398] sm:$0xff] %vm1925_vm2, %v1876_v24  ;;  %v3992_v8 = vld [vmem:[%s7988_s7] sm:$0xff]  ;;  %v3994_v24 = vld [vmem:[%s7988_s7 + $0x10] sm:$0xff] }
 0x252   : > { %2766 = vrot.lane.b32.xlu0 %v6875_v5, %s5650_s24  ;;  %5246 = vmatprep.subr.bf16.mxu0 %v5245_v59 }
 0x253   : > { %2478 = vrot.lane.b32.xlu1 %v6848_v55, %s5650_s24 }
 0x254   : > { %v2199_v60 = vpop.permute.xlu0 %2198  ;;  %v3061_v57 = vld [vmem:[#allocation3 + $0x378] sm:$0xff]  ;;  %3455 = vmatmul.mubr.f32.gmra.mrb[50].mxu1 %v3055_v23  ;;  %v3060_v5 = vld [vmem:[#allocation3 + $0x370] sm:$0xff] }
 0x255   : > { %2270 = vst.msk [vmem:[#allocation3 + $0x3c8] sm:$0xff] %vm1925_vm2, %v2199_v60  ;;  %v1878_v28 = vpop.permute.xlu1 %1877  ;;  %3459 = vmatprep.mubr.f32.mxu1 %v3061_v57  ;;  %v5247_v60 = vpack.c.bf16 %v3994_v24, %v3992_v8  ;;  %v3997_v23 = vld [vmem:[%s7988_s7 + $0x28] sm:$0xff]  ;;  %v3996_v57 = vld [vmem:[%s7988_s7 + $0x20] sm:$0xff] }
 0x256   : > { %2768 = vrot.lane.b32.xlu0 %v6907_v46, %s5650_s24  ;;  %1950 = vst.msk [vmem:[#allocation3 + $0x3c0] sm:$0xff] %vm1925_vm2, %v1878_v28 }
 0x257   : > { %2480 = vrot.lane.b32.xlu1 %v6880_v42, %s5650_s24  ;;  %5248 = vmatpush1.bf16.msra.mxu0 %v5247_v60 }
 0x258   : > { %v2201_v31 = vpop.permute.xlu0 %2200  ;;  %v3066_v47 = vld [vmem:[#allocation3 + $0x3a0] sm:$0xff]  ;;  %3460 = vmatmul.mubr.f32.gmra.mrb[52].mxu1 %v3060_v5  ;;  %v3065_v46 = vld [vmem:[#allocation3 + $0x398] sm:$0xff] }
 0x259   : > { %2271 = vst.msk [vmem:[#allocation3 + $0x3f0] sm:$0xff] %vm1925_vm2, %v2201_v31  ;;  %v1880_v55 = vpop.permute.xlu1 %1879  ;;  %3464 = vmatprep.mubr.f32.mxu1 %v3066_v47  ;;  %v3998_v31 = vld [vmem:[%s7988_s7 + $0x30] sm:$0xff]  ;;  %v4001_v5 = vld [vmem:[%s7988_s7 + $0x48] sm:$0xff]  ;;  %v4003_v47 = vld [vmem:[%s7988_s7 + $0x58] sm:$0xff] }
 0x25a   : > { %2770 = vrot.lane.b32.xlu0 %v6932_v20, %s5650_s24  ;;  %1951 = vst.msk [vmem:[#allocation3 + $0x3e8] sm:$0xff] %vm1925_vm2, %v1880_v55 }
 0x25b   : > { %2482 = vrot.lane.b32.xlu1 %v6905_v40, %s5650_s24 }
 0x25c   : > { %v2203_v50 = vpop.permute.xlu0 %2202  ;;  %v3071_v61 = vld [vmem:[#allocation3 + $0x3c8] sm:$0xff]  ;;  %3465 = vmatmul.mubr.f32.gmra.mrb[54].mxu1 %v3065_v46  ;;  %v5251_v46 = vpack.c.bf16 %v3998_v31, %v3996_v57 }
 0x25d   : > { %2272 = vst.msk [vmem:[#allocation3 + $0x418] sm:$0xff] %vm1925_vm2, %v2203_v50  ;;  %v1882_v42 = vpop.permute.xlu1 %1881  ;;  %3469 = vmatprep.mubr.f32.mxu1 %v3071_v61  ;;  %v3070_v20 = vld [vmem:[#allocation3 + $0x3c0] sm:$0xff] }
 0x25e   : > { %2772 = vrot.lane.b32.xlu0 %v6964_v62, %s5650_s24  ;;  %1952 = vst.msk [vmem:[#allocation3 + $0x410] sm:$0xff] %vm1925_vm2, %v1882_v42  ;;  %v5253_v42 = vpack.c.bf16 %v4003_v47, %v4001_v5 }
 0x25f   : > { %2484 = vrot.lane.b32.xlu1 %v6937_v29, %s5650_s24 }
 0x260   : > { %v2205_v45 = vpop.permute.xlu0 %2204  ;;  %v3076_v22 = vld [vmem:[#allocation3 + $0x3f0] sm:$0xff]  ;;  %3470 = vmatmul.mubr.f32.gmra.mrb[56].mxu1 %v3070_v20  ;;  %v4002_v20 = vld [vmem:[%s7988_s7 + $0x50] sm:$0xff] }
 0x261   : > { %2273 = vst.msk [vmem:[#allocation3 + $0x440] sm:$0xff] %vm1925_vm2, %v2205_v45  ;;  %v1884_v40 = vpop.permute.xlu1 %1883  ;;  %3474 = vmatprep.mubr.f32.mxu1 %v3076_v22  ;;  %v3075_v62 = vld [vmem:[#allocation3 + $0x3e8] sm:$0xff]  ;;  %v4000_v45 = vld [vmem:[%s7988_s7 + $0x40] sm:$0xff]  ;;  %v4005_v22 = vld [vmem:[%s7988_s7 + $0x68] sm:$0xff] }
 0x262   : > { %2774 = vrot.lane.b32.xlu0 %v6989_v49, %s5650_s24  ;;  %1953 = vst.msk [vmem:[#allocation3 + $0x438] sm:$0xff] %vm1925_vm2, %v1884_v40  ;;  %v4007_v40 = vld [vmem:[%s7988_s7 + $0x78] sm:$0xff] }
 0x263   : > { %2486 = vrot.lane.b32.xlu1 %v6962_v58, %s5650_s24 }
 0x264   : > { %v2207_v41 = vpop.permute.xlu0 %2206  ;;  %v3081_v39 = vld [vmem:[#allocation3 + $0x418] sm:$0xff]  ;;  %3475 = vmatmul.mubr.f32.gmra.mrb[58].mxu1 %v3075_v62 }
 0x265   : > { %2274 = vst.msk [vmem:[#allocation3 + $0x468] sm:$0xff] %vm1925_vm2, %v2207_v41  ;;  %v1886_v29 = vpop.permute.xlu1 %1885  ;;  %3479 = vmatprep.mubr.f32.mxu1 %v3081_v39  ;;  %v3080_v49 = vld [vmem:[#allocation3 + $0x410] sm:$0xff] }
 0x266   : > { %2776 = vrot.lane.b32.xlu0 %v7020_v34, %s5650_s24  ;;  %1954 = vst.msk [vmem:[#allocation3 + $0x460] sm:$0xff] %vm1925_vm2, %v1886_v29 }
 0x267   : > { %2488 = vrot.lane.b32.xlu1 %v6994_v35, %s5650_s24 }
 0x268   : > { %v2209_v54 = vpop.permute.xlu0 %2208  ;;  %v3086_v17 = vld [vmem:[#allocation3 + $0x440] sm:$0xff]  ;;  %3480 = vmatmul.mubr.f32.gmra.mrb[60].mxu1 %v3080_v49 }
 0x269   : > { %2275 = vst.msk [vmem:[#allocation3 + $0x490] sm:$0xff] %vm1925_vm2, %v2209_v54  ;;  %v1888_v58 = vpop.permute.xlu1 %1887  ;;  %3484 = vmatprep.mubr.f32.mxu1 %v3086_v17  ;;  %v3085_v34 = vld [vmem:[#allocation3 + $0x438] sm:$0xff]  ;;  %v5255_v54 = vpack.c.bf16 %v4002_v20, %v4000_v45 }
 0x26a   : > { %2778 = vrot.lane.b32.xlu0 %v7046_v48, %s5650_s24  ;;  %1955 = vst.msk [vmem:[#allocation3 + $0x488] sm:$0xff] %vm1925_vm2, %v1888_v58  ;;  %v5257_v58 = vpack.c.bf16 %v4007_v40, %v4005_v22 }
 0x26b   : > { %2490 = vrot.lane.b32.xlu1 %v7018_v44, %s5650_s24 }
 0x26c   : > { %v2211_v27 = vpop.permute.xlu0 %2210  ;;  %v3091_v2 = vld [vmem:[#allocation3 + $0x468] sm:$0xff]  ;;  %3485 = vmatmul.mubr.f32.gmra.mrb[62].mxu1 %v3085_v34  ;;  %v7393_v35 = vpop.f32.mrb[64].mxu0  ;;  %v4006_v34 = vld [vmem:[%s7988_s7 + $0x70] sm:$0xff] }
 0x26d   : > { %2276 = vst.msk [vmem:[#allocation3 + $0x4b8] sm:$0xff] %vm1925_vm2, %v2211_v27  ;;  %v7395_v56 = vpop.f32.mrb[65].mxu0  ;;  %v1890_v1 = vpop.permute.xlu1 %1889  ;;  %3489 = vmatprep.mubr.f32.mxu1 %v3091_v2  ;;  %v3090_v44 = vld [vmem:[#allocation3 + $0x460] sm:$0xff]  ;;  %v4004_v27 = vld [vmem:[%s7988_s7 + $0x60] sm:$0xff] }
 0x26e   : > { %2780 = vrot.lane.b32.xlu0 %v7071_v19, %s5650_s24  ;;  %1956 = vst.msk [vmem:[#allocation3 + $0x4b0] sm:$0xff] %vm1925_vm2, %v1890_v1 }
 0x26f   : > { %2492 = vrot.lane.b32.xlu1 %v7051_v51, %s5650_s24 }
 0x270   : > { %v2213_v48 = vpop.permute.xlu0 %2212  ;;  %v3096_v6 = vld [vmem:[#allocation3 + $0x490] sm:$0xff]  ;;  %3490 = vmatmul.mubr.f32.gmra.mrb[64].mxu1 %v3090_v44  ;;  %v5259_v44 = vpack.c.bf16 %v4006_v34, %v4004_v27 }
 0x271   : > { %2277 = vst.msk [vmem:[#allocation3 + $0x4e0] sm:$0xff] %vm1925_vm2, %v2213_v48  ;;  %v1892_v12 = vpop.permute.xlu1 %1891  ;;  %3494 = vmatprep.mubr.f32.mxu1 %v3096_v6  ;;  %v3095_v19 = vld [vmem:[#allocation3 + $0x488] sm:$0xff] }
 0x272   : > { %2782 = vrot.lane.b32.xlu0 %v7093_v13, %s5650_s24  ;;  %1957 = vst.msk [vmem:[#allocation3 + $0x4d8] sm:$0xff] %vm1925_vm2, %v1892_v12 }
 0x273   : > { %2494 = vrot.lane.b32.xlu1 %v7069_v52, %s5650_s24 }
 0x274   : > { %v3101_v63 = vld [vmem:[#allocation3 + $0x4b8] sm:$0xff]  ;;  %v2727_v11 = vpop.permute.xlu0 %2726  ;;  %3495 = vmatmul.mubr.f32.gmra.mrb[66].mxu1 %v3095_v19  ;;  %v7408_v51 = vpop.f32.mrb[66].mxu0 }
 0x275   : > { %2822 = vst.msk [vmem:[#allocation3 + $0x18] sm:$0xff] %vm1925_vm2, %v2727_v11  ;;  %v7411_v26 = vpop.f32.mrb[67].mxu0  ;;  %v2439_v10 = vpop.permute.xlu1 %2438  ;;  %3499 = vmatprep.mubr.f32.mxu1 %v3101_v63  ;;  %v3100_v52 = vld [vmem:[#allocation3 + $0x4b0] sm:$0xff] }
 0x276   : > { %2784 = vrot.lane.b32.xlu0 %v7119_v4, %s5650_s24  ;;  %2534 = vst.msk [vmem:[#allocation3 + $0x10] sm:$0xff] %vm1925_vm2, %v2439_v10  ;;  %v2373_v4 = vld [vmem:[#allocation2 + $0x111] sm:$0xff] }
 0x277   : > { %2496 = vrot.lane.b32.xlu1 %v7097_v9, %s5650_s24  ;;  %v2405_v3 = vmul.f32 %v7080_v37, %v2373_v4  ;;  %v3999_v37 = vld [vmem:[%s7988_s7 + $0x38] sm:$0xff] }
 0x278   : > { %v3106_v13 = vld [vmem:[#allocation3 + $0x4e0] sm:$0xff]  ;;  %v2729_v14 = vpop.permute.xlu0 %2728  ;;  %3500 = vmatmul.mubr.f32.gmra.mrb[68].mxu1 %v3100_v52  ;;  %v5249_v28 = vpack.c.bf16 %v3999_v37, %v3997_v23 }
 0x279   : > { %2823 = vst.msk [vmem:[#allocation3 + $0x40] sm:$0xff] %vm1925_vm2, %v2729_v14  ;;  %v2441_v32 = vpop.permute.xlu1 %2440  ;;  %3504 = vmatprep.mubr.f32.mxu1 %v3106_v13  ;;  %v3105_v15 = vld [vmem:[#allocation3 + $0x4d8] sm:$0xff] }
 0x27a   : > { %2535 = vst.msk [vmem:[#allocation3 + $0x38] sm:$0xff] %vm1925_vm2, %v2441_v32  ;;  %2786 = vrot.lane.b32.xlu0 %v2692_v38, %s5650_s24  ;;  %5250 = vmatprep.subr.bf16.mxu0 %v5249_v28 }
 0x27b   : > { %2498 = vrot.lane.b32.xlu1 %v2372_v43, %s5650_s24  ;;  %5252 = vmatpush1.bf16.msra.mxu0 %v5251_v46 }
 0x27c   : > { %v2731_v9 = vpop.permute.xlu0 %2730  ;;  %3505 = vmatmul.mubr.f32.gmra.mrb[70].mxu1 %v3105_v15  ;;  %v2953_v21 = vld [vmem:[#allocation3 + $0x18] sm:$0xff]  ;;  %5254 = vmatprep.subr.bf16.mxu0 %v5253_v42 }
 0x27d   : > { %v7422_v18 = vpop.f32.mrb[68].mxu0  ;;  %2824 = vst.msk [vmem:[#allocation3 + $0x68] sm:$0xff] %vm1925_vm2, %v2731_v9  ;;  %v2443_v53 = vpop.permute.xlu1 %2442  ;;  %3574 = vmatprep.mubr.f32.mxu1 %v2953_v21  ;;  %v2952_v7 = vld [vmem:[#allocation3 + $0x10] sm:$0xff] }
 0x27e   : > { %v7431_v25 = vpop.f32.mrb[69].mxu0  ;;  %2536 = vst.msk [vmem:[#allocation3 + $0x60] sm:$0xff] %vm1925_vm2, %v2443_v53  ;;  %2788 = vrot.lane.b32.xlu0 %v2693_v33, %s5650_s24 }
 0x27f   : > { %2500 = vrot.lane.b32.xlu1 %v2405_v3, %s5650_s24  ;;  %5256 = vmatpush1.bf16.msra.mxu0 %v5255_v54 }
 0x280   : > { %v2733_v55 = vpop.permute.xlu0 %2732  ;;  %3575 = vmatmul.mubr.f32.vlgmr.msra.gmra.mrb[8].mxu1 %v2952_v7  ;;  %v2958_v50 = vld [vmem:[#allocation3 + $0x40] sm:$0xff]  ;;  %5258 = vmatprep.subr.bf16.mxu0 %v5257_v58 }
 0x281   : > { %2825 = vst.msk [vmem:[#allocation3 + $0x90] sm:$0xff] %vm1925_vm2, %v2733_v55  ;;  %v2445_v61 = vpop.permute.xlu1 %2444  ;;  %3579 = vmatprep.mubr.f32.mxu1 %v2958_v50  ;;  %v2957_v41 = vld [vmem:[#allocation3 + $0x38] sm:$0xff] }
 0x282   : > { %2537 = vst.msk [vmem:[#allocation3 + $0x88] sm:$0xff] %vm1925_vm2, %v2445_v61 }
 0x283   : > { %v7475_v39 = vpop.f32.mrb[70].mxu0  ;;  %5260 = vmatpush1.bf16.msra.mxu0 %v5259_v44 }
 0x284   : > { %v2735_v62 = vpop.permute.xlu0 %2734  ;;  %3580 = vmatmul.mubr.f32.gmra.mrb[10].mxu1 %v2957_v41  ;;  %v2963_v29 = vld [vmem:[#allocation3 + $0x68] sm:$0xff]  ;;  %v7478_v49 = vpop.f32.mrb[71].mxu0 }
 0x285   : > { %2826 = vst.msk [vmem:[#allocation3 + $0xb8] sm:$0xff] %vm1925_vm2, %v2735_v62  ;;  %v2447_v17 = vpop.permute.xlu1 %2446  ;;  %3584 = vmatprep.mubr.f32.mxu1 %v2963_v29  ;;  %v2962_v2 = vld [vmem:[#allocation3 + $0x60] sm:$0xff] }
 0x286   : > { %2538 = vst.msk [vmem:[#allocation3 + $0xb0] sm:$0xff] %vm1925_vm2, %v2447_v17 }
 0x288   : > { %v2737_v1 = vpop.permute.xlu0 %2736  ;;  %3585 = vmatmul.mubr.f32.gmra.mrb[12].mxu1 %v2962_v2  ;;  %v2968_v48 = vld [vmem:[#allocation3 + $0x90] sm:$0xff] }
 0x289   : > { %2827 = vst.msk [vmem:[#allocation3 + $0xe0] sm:$0xff] %vm1925_vm2, %v2737_v1  ;;  %v2449_v6 = vpop.permute.xlu1 %2448  ;;  %3589 = vmatprep.mubr.f32.mxu1 %v2968_v48  ;;  %v2967_v12 = vld [vmem:[#allocation3 + $0x88] sm:$0xff] }
 0x28a   : > { %2539 = vst.msk [vmem:[#allocation3 + $0xd8] sm:$0xff] %vm1925_vm2, %v2449_v6 }
 0x28b   : > { %v7489_v63 = vpop.f32.mrb[72].mxu0 }
 0x28c   : > { %v2739_v19 = vpop.permute.xlu0 %2738  ;;  %3590 = vmatmul.mubr.f32.gmra.mrb[14].mxu1 %v2967_v12  ;;  %v2973_v11 = vld [vmem:[#allocation3 + $0xb8] sm:$0xff]  ;;  %v7492_v10 = vpop.f32.mrb[73].mxu0 }
 0x28d   : > { %2828 = vst.msk [vmem:[#allocation3 + $0x108] sm:$0xff] %vm1925_vm2, %v2739_v19  ;;  %v2451_v52 = vpop.permute.xlu1 %2450  ;;  %3594 = vmatprep.mubr.f32.mxu1 %v2973_v11  ;;  %v2972_v13 = vld [vmem:[#allocation3 + $0xb0] sm:$0xff] }
 0x28e   : > { %2540 = vst.msk [vmem:[#allocation3 + $0x100] sm:$0xff] %vm1925_vm2, %v2451_v52 }
 0x290   : > { %v2741_v38 = vpop.permute.xlu0 %2740  ;;  %3595 = vmatmul.mubr.f32.gmra.mrb[16].mxu1 %v2972_v13  ;;  %v2978_v14 = vld [vmem:[#allocation3 + $0xe0] sm:$0xff] }
 0x291   : > { %2829 = vst.msk [vmem:[#allocation3 + $0x130] sm:$0xff] %vm1925_vm2, %v2741_v38  ;;  %v2453_v32 = vpop.permute.xlu1 %2452  ;;  %3599 = vmatprep.mubr.f32.mxu1 %v2978_v14  ;;  %v2977_v43 = vld [vmem:[#allocation3 + $0xd8] sm:$0xff] }
 0x292   : > { %2541 = vst.msk [vmem:[#allocation3 + $0x128] sm:$0xff] %vm1925_vm2, %v2453_v32 }
 0x294   : > { %v2743_v4 = vpop.permute.xlu0 %2742  ;;  %3600 = vmatmul.mubr.f32.gmra.mrb[18].mxu1 %v2977_v43  ;;  %v2983_v33 = vld [vmem:[#allocation3 + $0x108] sm:$0xff] }
 0x295   : > { %v7497_v15 = vpop.f32.mrb[74].mxu0  ;;  %2830 = vst.msk [vmem:[#allocation3 + $0x158] sm:$0xff] %vm1925_vm2, %v2743_v4  ;;  %v2455_v21 = vpop.permute.xlu1 %2454  ;;  %3604 = vmatprep.mubr.f32.mxu1 %v2983_v33  ;;  %v2982_v30 = vld [vmem:[#allocation3 + $0x100] sm:$0xff] }
 0x296   : > { %v7500_v9 = vpop.f32.mrb[75].mxu0  ;;  %2542 = vst.msk [vmem:[#allocation3 + $0x150] sm:$0xff] %vm1925_vm2, %v2455_v21 }
 0x298   : > { %v2745_v16 = vpop.permute.xlu0 %2744  ;;  %3605 = vmatmul.mubr.f32.gmra.mrb[20].mxu1 %v2982_v30  ;;  %v2988_v53 = vld [vmem:[#allocation3 + $0x130] sm:$0xff] }
 0x299   : > { %2831 = vst.msk [vmem:[#allocation3 + $0x180] sm:$0xff] %vm1925_vm2, %v2745_v16  ;;  %v2457_v3 = vpop.permute.xlu1 %2456  ;;  %3609 = vmatprep.mubr.f32.mxu1 %v2988_v53  ;;  %v2987_v7 = vld [vmem:[#allocation3 + $0x128] sm:$0xff] }
 0x29a   : > { %2543 = vst.msk [vmem:[#allocation3 + $0x178] sm:$0xff] %vm1925_vm2, %v2457_v3 }
 0x29c   : > { %v2747_v59 = vpop.permute.xlu0 %2746  ;;  %3610 = vmatmul.mubr.f32.gmra.mrb[22].mxu1 %v2987_v7  ;;  %v7505_v8 = vpop.f32.mrb[76].mxu0  ;;  %v2993_v24 = vld [vmem:[#allocation3 + $0x158] sm:$0xff] }
 0x29d   : > { %2832 = vst.msk [vmem:[#allocation3 + $0x1a8] sm:$0xff] %vm1925_vm2, %v2747_v59  ;;  %v7508_v60 = vpop.f32.mrb[77].mxu0  ;;  %v2459_v23 = vpop.permute.xlu1 %2458  ;;  %3614 = vmatprep.mubr.f32.mxu1 %v2993_v24  ;;  %v2992_v37 = vld [vmem:[#allocation3 + $0x150] sm:$0xff] }
 0x29e   : > { %2544 = vst.msk [vmem:[#allocation3 + $0x1a0] sm:$0xff] %vm1925_vm2, %v2459_v23 }
 0x2a0   : > { %v2749_v57 = vpop.permute.xlu0 %2748  ;;  %3615 = vmatmul.mubr.f32.gmra.mrb[24].mxu1 %v2992_v37  ;;  %v2998_v28 = vld [vmem:[#allocation3 + $0x180] sm:$0xff] }
 0x2a1   : > { %2833 = vst.msk [vmem:[#allocation3 + $0x1d0] sm:$0xff] %vm1925_vm2, %v2749_v57  ;;  %v2461_v31 = vpop.permute.xlu1 %2460  ;;  %3619 = vmatprep.mubr.f32.mxu1 %v2998_v28  ;;  %v2997_v5 = vld [vmem:[#allocation3 + $0x178] sm:$0xff] }
 0x2a2   : > { %2545 = vst.msk [vmem:[#allocation3 + $0x1c8] sm:$0xff] %vm1925_vm2, %v2461_v31 }
 0x2a4   : > { %v2751_v47 = vpop.permute.xlu0 %2750  ;;  %3620 = vmatmul.mubr.f32.gmra.mrb[26].mxu1 %v2997_v5  ;;  %v7513_v55 = vpop.f32.mrb[78].mxu0  ;;  %v3003_v50 = vld [vmem:[#allocation3 + $0x1a8] sm:$0xff] }
 0x2a5   : > { %2834 = vst.msk [vmem:[#allocation3 + $0x1f8] sm:$0xff] %vm1925_vm2, %v2751_v47  ;;  %v7516_v46 = vpop.f32.mrb[79].mxu0  ;;  %v2463_v61 = vpop.permute.xlu1 %2462  ;;  %3624 = vmatprep.mubr.f32.mxu1 %v3003_v50  ;;  %v3002_v42 = vld [vmem:[#allocation3 + $0x1a0] sm:$0xff] }
 0x2a6   : > { %2546 = vst.msk [vmem:[#allocation3 + $0x1f0] sm:$0xff] %vm1925_vm2, %v2463_v61 }
 0x2a8   : > { %v2753_v45 = vpop.permute.xlu0 %2752  ;;  %3625 = vmatmul.mubr.f32.gmra.mrb[28].mxu1 %v3002_v42  ;;  %v3008_v20 = vld [vmem:[#allocation3 + $0x1d0] sm:$0xff] }
 0x2a9   : > { %2835 = vst.msk [vmem:[#allocation3 + $0x220] sm:$0xff] %vm1925_vm2, %v2753_v45  ;;  %v2465_v22 = vpop.permute.xlu1 %2464  ;;  %3629 = vmatprep.mubr.f32.mxu1 %v3008_v20  ;;  %v3007_v40 = vld [vmem:[#allocation3 + $0x1c8] sm:$0xff] }
 0x2aa   : > { %2547 = vst.msk [vmem:[#allocation3 + $0x218] sm:$0xff] %vm1925_vm2, %v2465_v22 }
 0x2ac   : > { %v2755_v41 = vpop.permute.xlu0 %2754  ;;  %3630 = vmatmul.mubr.f32.gmra.mrb[30].mxu1 %v3007_v40  ;;  %v7521_v62 = vpop.f32.mrb[80].mxu0  ;;  %v3013_v29 = vld [vmem:[#allocation3 + $0x1f8] sm:$0xff] }
 0x2ad   : > { %2836 = vst.msk [vmem:[#allocation3 + $0x248] sm:$0xff] %vm1925_vm2, %v2755_v41  ;;  %v7524_v54 = vpop.f32.mrb[81].mxu0  ;;  %v2467_v17 = vpop.permute.xlu1 %2466  ;;  %3634 = vmatprep.mubr.f32.mxu1 %v3013_v29  ;;  %v3012_v58 = vld [vmem:[#allocation3 + $0x1f0] sm:$0xff] }
 0x2ae   : > { %2548 = vst.msk [vmem:[#allocation3 + $0x240] sm:$0xff] %vm1925_vm2, %v2467_v17 }
 0x2b0   : > { %v2757_v27 = vpop.permute.xlu0 %2756  ;;  %3635 = vmatmul.mubr.f32.gmra.mrb[32].mxu1 %v3012_v58  ;;  %v3018_v34 = vld [vmem:[#allocation3 + $0x220] sm:$0xff] }
 0x2b1   : > { %2837 = vst.msk [vmem:[#allocation3 + $0x270] sm:$0xff] %vm1925_vm2, %v2757_v27  ;;  %v2469_v2 = vpop.permute.xlu1 %2468  ;;  %3639 = vmatprep.mubr.f32.mxu1 %v3018_v34  ;;  %v3017_v1 = vld [vmem:[#allocation3 + $0x218] sm:$0xff] }
 0x2b2   : > { %2549 = vst.msk [vmem:[#allocation3 + $0x268] sm:$0xff] %vm1925_vm2, %v2469_v2 }
 0x2b4   : > { %v2759_v48 = vpop.permute.xlu0 %2758  ;;  %3640 = vmatmul.mubr.f32.gmra.mrb[34].mxu1 %v3017_v1  ;;  %v3023_v6 = vld [vmem:[#allocation3 + $0x248] sm:$0xff] }
 0x2b5   : > { %v7529_v44 = vpop.f32.mrb[82].mxu0  ;;  %2838 = vst.msk [vmem:[#allocation3 + $0x298] sm:$0xff] %vm1925_vm2, %v2759_v48  ;;  %v2471_v19 = vpop.permute.xlu1 %2470  ;;  %3644 = vmatprep.mubr.f32.mxu1 %v3023_v6  ;;  %v3022_v11 = vld [vmem:[#allocation3 + $0x240] sm:$0xff] }
 0x2b6   : > { %v7532_v12 = vpop.f32.mrb[83].mxu0  ;;  %2550 = vst.msk [vmem:[#allocation3 + $0x290] sm:$0xff] %vm1925_vm2, %v2471_v19 }
 0x2b8   : > { %v2761_v52 = vpop.permute.xlu0 %2760  ;;  %3645 = vmatmul.mubr.f32.gmra.mrb[36].mxu1 %v3022_v11  ;;  %v3028_v13 = vld [vmem:[#allocation3 + $0x270] sm:$0xff] }
 0x2b9   : > { %2839 = vst.msk [vmem:[#allocation3 + $0x2c0] sm:$0xff] %vm1925_vm2, %v2761_v52  ;;  %v2473_v38 = vpop.permute.xlu1 %2472  ;;  %3649 = vmatprep.mubr.f32.mxu1 %v3028_v13  ;;  %v3027_v14 = vld [vmem:[#allocation3 + $0x268] sm:$0xff] }
 0x2ba   : > { %2551 = vst.msk [vmem:[#allocation3 + $0x2b8] sm:$0xff] %vm1925_vm2, %v2473_v38 }
 0x2bc   : > { %v2763_v32 = vpop.permute.xlu0 %2762  ;;  %3650 = vmatmul.mubr.f32.gmra.mrb[38].mxu1 %v3027_v14  ;;  %v7537_v43 = vpop.f32.mrb[84].mxu0  ;;  %v3033_v4 = vld [vmem:[#allocation3 + $0x298] sm:$0xff] }
 0x2bd   : > { %2840 = vst.msk [vmem:[#allocation3 + $0x2e8] sm:$0xff] %vm1925_vm2, %v2763_v32  ;;  %v7540_v33 = vpop.f32.mrb[85].mxu0  ;;  %v2475_v21 = vpop.permute.xlu1 %2474  ;;  %3654 = vmatprep.mubr.f32.mxu1 %v3033_v4  ;;  %v3032_v30 = vld [vmem:[#allocation3 + $0x290] sm:$0xff] }
 0x2be   : > { %2552 = vst.msk [vmem:[#allocation3 + $0x2e0] sm:$0xff] %vm1925_vm2, %v2475_v21 }
 0x2c0   : > { %v2765_v16 = vpop.permute.xlu0 %2764  ;;  %3655 = vmatmul.mubr.f32.gmra.mrb[40].mxu1 %v3032_v30  ;;  %v3038_v53 = vld [vmem:[#allocation3 + $0x2c0] sm:$0xff] }
 0x2c1   : > { %2841 = vst.msk [vmem:[#allocation3 + $0x310] sm:$0xff] %vm1925_vm2, %v2765_v16  ;;  %v2477_v3 = vpop.permute.xlu1 %2476  ;;  %3659 = vmatprep.mubr.f32.mxu1 %v3038_v53  ;;  %v3037_v7 = vld [vmem:[#allocation3 + $0x2b8] sm:$0xff] }
 0x2c2   : > { %2553 = vst.msk [vmem:[#allocation3 + $0x308] sm:$0xff] %vm1925_vm2, %v2477_v3 }
 0x2c4   : > { %v2767_v59 = vpop.permute.xlu0 %2766  ;;  %3660 = vmatmul.mubr.f32.gmra.mrb[42].mxu1 %v3037_v7  ;;  %v7545_v24 = vpop.f32.mrb[86].mxu0  ;;  %v3043_v23 = vld [vmem:[#allocation3 + $0x2e8] sm:$0xff] }
 0x2c5   : > { %2842 = vst.msk [vmem:[#allocation3 + $0x338] sm:$0xff] %vm1925_vm2, %v2767_v59  ;;  %v7548_v37 = vpop.f32.mrb[87].mxu0  ;;  %v2479_v57 = vpop.permute.xlu1 %2478  ;;  %3664 = vmatprep.mubr.f32.mxu1 %v3043_v23  ;;  %v3042_v28 = vld [vmem:[#allocation3 + $0x2e0] sm:$0xff] }
 0x2c6   : > { %2554 = vst.msk [vmem:[#allocation3 + $0x330] sm:$0xff] %vm1925_vm2, %v2479_v57 }
 0x2c8   : > { %v2769_v31 = vpop.permute.xlu0 %2768  ;;  %3665 = vmatmul.mubr.f32.gmra.mrb[44].mxu1 %v3042_v28  ;;  %v3048_v5 = vld [vmem:[#allocation3 + $0x310] sm:$0xff] }
 0x2c9   : > { %2843 = vst.msk [vmem:[#allocation3 + $0x360] sm:$0xff] %vm1925_vm2, %v2769_v31  ;;  %v2481_v47 = vpop.permute.xlu1 %2480  ;;  %3669 = vmatprep.mubr.f32.mxu1 %v3048_v5  ;;  %v3047_v50 = vld [vmem:[#allocation3 + $0x308] sm:$0xff] }
 0x2ca   : > { %2555 = vst.msk [vmem:[#allocation3 + $0x358] sm:$0xff] %vm1925_vm2, %v2481_v47 }
 0x2cc   : > { %v2771_v61 = vpop.permute.xlu0 %2770  ;;  %3670 = vmatmul.mubr.f32.gmra.mrb[46].mxu1 %v3047_v50  ;;  %v7553_v42 = vpop.f32.mrb[88].mxu0  ;;  %v3053_v45 = vld [vmem:[#allocation3 + $0x338] sm:$0xff] }
 0x2cd   : > { %2844 = vst.msk [vmem:[#allocation3 + $0x388] sm:$0xff] %vm1925_vm2, %v2771_v61  ;;  %v7556_v20 = vpop.f32.mrb[89].mxu0  ;;  %v2483_v22 = vpop.permute.xlu1 %2482  ;;  %3674 = vmatprep.mubr.f32.mxu1 %v3053_v45  ;;  %v3052_v40 = vld [vmem:[#allocation3 + $0x330] sm:$0xff] }
 0x2ce   : > { %2556 = vst.msk [vmem:[#allocation3 + $0x380] sm:$0xff] %vm1925_vm2, %v2483_v22 }
 0x2d0   : > { %v2773_v41 = vpop.permute.xlu0 %2772  ;;  %3675 = vmatmul.mubr.f32.gmra.mrb[48].mxu1 %v3052_v40  ;;  %v3058_v29 = vld [vmem:[#allocation3 + $0x360] sm:$0xff] }
 0x2d1   : > { %2845 = vst.msk [vmem:[#allocation3 + $0x3b0] sm:$0xff] %vm1925_vm2, %v2773_v41  ;;  %v2485_v17 = vpop.permute.xlu1 %2484  ;;  %3679 = vmatprep.mubr.f32.mxu1 %v3058_v29  ;;  %v3057_v58 = vld [vmem:[#allocation3 + $0x358] sm:$0xff] }
 0x2d2   : > { %2557 = vst.msk [vmem:[#allocation3 + $0x3a8] sm:$0xff] %vm1925_vm2, %v2485_v17 }
 0x2d4   : > { %v2775_v27 = vpop.permute.xlu0 %2774  ;;  %3680 = vmatmul.mubr.f32.gmra.mrb[50].mxu1 %v3057_v58  ;;  %v7561_v34 = vpop.f32.mrb[90].mxu0  ;;  %v3063_v2 = vld [vmem:[#allocation3 + $0x388] sm:$0xff] }
 0x2d5   : > { %2846 = vst.msk [vmem:[#allocation3 + $0x3d8] sm:$0xff] %vm1925_vm2, %v2775_v27  ;;  %v7564_v1 = vpop.f32.mrb[91].mxu0  ;;  %v2487_v48 = vpop.permute.xlu1 %2486  ;;  %3684 = vmatprep.mubr.f32.mxu1 %v3063_v2  ;;  %v3062_v6 = vld [vmem:[#allocation3 + $0x380] sm:$0xff] }
 0x2d6   : > { %2558 = vst.msk [vmem:[#allocation3 + $0x3d0] sm:$0xff] %vm1925_vm2, %v2487_v48 }
 0x2d8   : > { %v2777_v19 = vpop.permute.xlu0 %2776  ;;  %3685 = vmatmul.mubr.f32.gmra.mrb[52].mxu1 %v3062_v6  ;;  %v3068_v11 = vld [vmem:[#allocation3 + $0x3b0] sm:$0xff] }
 0x2d9   : > { %2847 = vst.msk [vmem:[#allocation3 + $0x400] sm:$0xff] %vm1925_vm2, %v2777_v19  ;;  %v2489_v52 = vpop.permute.xlu1 %2488  ;;  %3689 = vmatprep.mubr.f32.mxu1 %v3068_v11  ;;  %v7568_v13 = vpop.f32.mrb[92].mxu0  ;;  %v3067_v14 = vld [vmem:[#allocation3 + $0x3a8] sm:$0xff] }
 0x2da   : > { %2559 = vst.msk [vmem:[#allocation3 + $0x3f8] sm:$0xff] %vm1925_vm2, %v2489_v52  ;;  %v7571_v38 = vpop.f32.mrb[93].mxu0  ;;  %v7592_v52 = vld [vmem:[%s7987_s6] ss:$0 sm:$0xff] }
 0x2dc   : > { %v2779_v32 = vpop.permute.xlu0 %2778  ;;  %3690 = vmatmul.mubr.f32.gmra.mrb[54].mxu1 %v3067_v14  ;;  %v3073_v4 = vld [vmem:[#allocation3 + $0x3d8] sm:$0xff] }
 0x2dd   : > { %2848 = vst.msk [vmem:[#allocation3 + $0x428] sm:$0xff] %vm1925_vm2, %v2779_v32  ;;  %v2491_v21 = vpop.permute.xlu1 %2490  ;;  %3694 = vmatprep.mubr.f32.mxu1 %v3073_v4  ;;  %v3072_v30 = vld [vmem:[#allocation3 + $0x3d0] sm:$0xff] }
 0x2de   : > { %2560 = vst.msk [vmem:[#allocation3 + $0x420] sm:$0xff] %vm1925_vm2, %v2491_v21  ;;  %v7575_v16 = vpop.f32.mrb[94].mxu0 }
 0x2df   : > { %v7577_v7 = vpop.f32.mrb[95].mxu0 }
 0x2e0   : > { %v2781_v53 = vpop.permute.xlu0 %2780  ;;  %3695 = vmatmul.mubr.f32.gmra.mrb[56].mxu1 %v3072_v30  ;;  %v3078_v3 = vld [vmem:[#allocation3 + $0x400] sm:$0xff] }
 0x2e1   : > { %2849 = vst.msk [vmem:[#allocation3 + $0x450] sm:$0xff] %vm1925_vm2, %v2781_v53  ;;  %v2493_v59 = vpop.permute.xlu1 %2492  ;;  %3699 = vmatprep.mubr.f32.mxu1 %v3078_v3  ;;  %v3077_v23 = vld [vmem:[#allocation3 + $0x3f8] sm:$0xff] }
 0x2e2   : > { %2561 = vst.msk [vmem:[#allocation3 + $0x448] sm:$0xff] %vm1925_vm2, %v2493_v59 }
 0x2e4   : > { %v2783_v57 = vpop.permute.xlu0 %2782  ;;  %3700 = vmatmul.mubr.f32.gmra.mrb[58].mxu1 %v3077_v23  ;;  %v3083_v28 = vld [vmem:[#allocation3 + $0x428] sm:$0xff] }
 0x2e5   : > { %2850 = vst.msk [vmem:[#allocation3 + $0x478] sm:$0xff] %vm1925_vm2, %v2783_v57  ;;  %v2495_v31 = vpop.permute.xlu1 %2494  ;;  %3704 = vmatprep.mubr.f32.mxu1 %v3083_v28  ;;  %v3082_v5 = vld [vmem:[#allocation3 + $0x420] sm:$0xff] }
 0x2e6   : > { %2562 = vst.msk [vmem:[#allocation3 + $0x470] sm:$0xff] %vm1925_vm2, %v2495_v31 }
 0x2e8   : > { %v2785_v47 = vpop.permute.xlu0 %2784  ;;  %3705 = vmatmul.mubr.f32.gmra.mrb[60].mxu1 %v3082_v5  ;;  %v3088_v50 = vld [vmem:[#allocation3 + $0x450] sm:$0xff] }
 0x2e9   : > { %2851 = vst.msk [vmem:[#allocation3 + $0x4a0] sm:$0xff] %vm1925_vm2, %v2785_v47  ;;  %v2497_v61 = vpop.permute.xlu1 %2496  ;;  %3709 = vmatprep.mubr.f32.mxu1 %v3088_v50  ;;  %v3087_v45 = vld [vmem:[#allocation3 + $0x448] sm:$0xff] }
 0x2ea   : > { %2563 = vst.msk [vmem:[#allocation3 + $0x498] sm:$0xff] %vm1925_vm2, %v2497_v61 }
 0x2ec   : > { %3710 = vmatmul.mubr.f32.gmra.mrb[62].mxu1 %v3087_v45  ;;  %v2787_v22 = vpop.permute.xlu0 %2786  ;;  %v3093_v40 = vld [vmem:[#allocation3 + $0x478] sm:$0xff] }
 0x2ed   : > { %2852 = vst.msk [vmem:[#allocation3 + $0x4c8] sm:$0xff] %vm1925_vm2, %v2787_v22  ;;  %v2499_v41 = vpop.permute.xlu1 %2498  ;;  %3714 = vmatprep.mubr.f32.mxu1 %v3093_v40  ;;  %v3092_v29 = vld [vmem:[#allocation3 + $0x470] sm:$0xff] }
 0x2ee   : > { %2564 = vst.msk [vmem:[#allocation3 + $0x4c0] sm:$0xff] %vm1925_vm2, %v2499_v41 }
 0x2f0   : > { %3715 = vmatmul.mubr.f32.gmra.mrb[64].mxu1 %v3092_v29  ;;  %v2789_v17 = vpop.permute.xlu0 %2788  ;;  %v3098_v58 = vld [vmem:[#allocation3 + $0x4a0] sm:$0xff] }
 0x2f1   : > { %2853 = vst.msk [vmem:[#allocation3 + $0x4f0] sm:$0xff] %vm1925_vm2, %v2789_v17  ;;  %v2501_v27 = vpop.permute.xlu1 %2500  ;;  %3719 = vmatprep.mubr.f32.mxu1 %v3098_v58  ;;  %v3097_v2 = vld [vmem:[#allocation3 + $0x498] sm:$0xff] }
 0x2f2   : > { %2565 = vst.msk [vmem:[#allocation3 + $0x4e8] sm:$0xff] %vm1925_vm2, %v2501_v27 }
 0x2f4   : > { %3720 = vmatmul.mubr.f32.gmra.mrb[66].mxu1 %v3097_v2  ;;  %v3103_v48 = vld [vmem:[#allocation3 + $0x4c8] sm:$0xff] }
 0x2f5   : > { %3724 = vmatprep.mubr.f32.mxu1 %v3103_v48  ;;  %v3102_v6 = vld [vmem:[#allocation3 + $0x4c0] sm:$0xff] }
 0x2f8   : > { %3725 = vmatmul.mubr.f32.gmra.mrb[68].mxu1 %v3102_v6  ;;  %v3108_v19 = vld [vmem:[#allocation3 + $0x4f0] sm:$0xff] }
 0x2f9   : > { %3729 = vmatprep.mubr.f32.mxu1 %v3108_v19  ;;  %v3107_v11 = vld [vmem:[#allocation3 + $0x4e8] sm:$0xff] }
 0x2fc   : > { %3730 = vmatmul.mubr.f32.gmra.mrb[70].mxu1 %v3107_v11 }
 0x353   : > { %v3576_v14 = vpop.f32.mrb[8].mxu1 }
 0x354   : > { %v5261_v32 = vadd.f32 %v7592_v52, %v3576_v14  ;;  %v3578_v4 = vpop.f32.mrb[9].mxu1 }
 0x356   : > { %v3802_v21 = vadd.f32 %v5261_v32, %v7395_v56 }
 0x357   : > { %v3581_v30 = vpop.f32.mrb[10].mxu1 }
 0x358   : > { %v3960_v53 = vmax.f32 %v3802_v21, 0.0  ;;  %v5262_v3 = vadd.f32 %v7592_v52, %v3581_v30  ;;  %v3583_v59 = vpop.f32.mrb[11].mxu1 }
 0x35a   : > { %v3807_v23 = vadd.f32 %v5262_v3, %v7393_v35  ;;  %4798 = vmatmul.mubr.msk.f32.vlgmr.msra.gmra.mrb[96].mxu0 %vm849_vm0, %v3960_v53 }
 0x35b   : > { %v3586_v57 = vpop.f32.mrb[12].mxu1  ;;  %4186 = vmatprep.mubr.f32.mxu0 %v8079_v0 }
 0x35c   : > { %v3961_v28 = vmax.f32 %v3807_v23, 0.0  ;;  %v5263_v31 = vadd.f32 %v7592_v52, %v3586_v57  ;;  %v3588_v5 = vpop.f32.mrb[13].mxu1 }
 0x35e   : > { %v3812_v47 = vadd.f32 %v5263_v31, %v7411_v26  ;;  %4799 = vmatmul.mubr.msk.f32.gmra.mrb[98].mxu0 %vm849_vm0, %v3961_v28 }
 0x35f   : > { %v3591_v56 = vpop.f32.mrb[14].mxu1  ;;  %4192 = vmatprep.mubr.f32.mxu0 %v8079_v0 }
 0x360   : > { %v3962_v50 = vmax.f32 %v3812_v47, 0.0  ;;  %v5264_v61 = vadd.f32 %v7592_v52, %v3591_v56  ;;  %v3593_v35 = vpop.f32.mrb[15].mxu1 }
 0x362   : > { %v3817_v45 = vadd.f32 %v5264_v61, %v7408_v51  ;;  %4800 = vmatmul.mubr.msk.f32.gmra.mrb[100].mxu0 %vm849_vm0, %v3962_v50 }
 0x363   : > { %v3596_v22 = vpop.f32.mrb[16].mxu1  ;;  %4198 = vmatprep.mubr.f32.mxu0 %v8079_v0 }
 0x364   : > { %v3963_v40 = vmax.f32 %v3817_v45, 0.0  ;;  %v5265_v41 = vadd.f32 %v7592_v52, %v3596_v22  ;;  %v3598_v26 = vpop.f32.mrb[17].mxu1 }
 0x366   : > { %v3822_v29 = vadd.f32 %v5265_v41, %v7431_v25  ;;  %4801 = vmatmul.mubr.msk.f32.gmra.mrb[102].mxu0 %vm849_vm0, %v3963_v40 }
 0x367   : > { %v3601_v17 = vpop.f32.mrb[18].mxu1  ;;  %4204 = vmatprep.mubr.f32.mxu0 %v8079_v0 }
 0x368   : > { %v3964_v58 = vmax.f32 %v3822_v29, 0.0  ;;  %v5266_v27 = vadd.f32 %v7592_v52, %v3601_v17  ;;  %v3603_v51 = vpop.f32.mrb[19].mxu1 }
 0x36a   : > { %v3827_v2 = vadd.f32 %v5266_v27, %v7422_v18  ;;  %4802 = vmatmul.mubr.msk.f32.gmra.mrb[104].mxu0 %vm849_vm0, %v3964_v58 }
 0x36b   : > { %v3606_v48 = vpop.f32.mrb[20].mxu1  ;;  %4210 = vmatprep.mubr.f32.mxu0 %v8079_v0 }
 0x36c   : > { %v3965_v6 = vmax.f32 %v3827_v2, 0.0  ;;  %v5267_v19 = vadd.f32 %v7592_v52, %v3606_v48  ;;  %v3608_v25 = vpop.f32.mrb[21].mxu1 }
 0x36e   : > { %v3832_v11 = vadd.f32 %v5267_v19, %v7478_v49  ;;  %4803 = vmatmul.mubr.msk.f32.gmra.mrb[106].mxu0 %vm849_vm0, %v3965_v6 }
 0x36f   : > { %v3611_v14 = vpop.f32.mrb[22].mxu1  ;;  %4216 = vmatprep.mubr.f32.mxu0 %v8079_v0 }
 0x370   : > { %v3966_v32 = vmax.f32 %v3832_v11, 0.0  ;;  %v5268_v4 = vadd.f32 %v7592_v52, %v3611_v14  ;;  %v3613_v18 = vpop.f32.mrb[23].mxu1 }
 0x372   : > { %v3837_v21 = vadd.f32 %v5268_v4, %v7475_v39  ;;  %4804 = vmatmul.mubr.msk.f32.gmra.mrb[108].mxu0 %vm849_vm0, %v3966_v32 }
 0x373   : > { %v3616_v30 = vpop.f32.mrb[24].mxu1  ;;  %4222 = vmatprep.mubr.f32.mxu0 %v8079_v0 }
 0x374   : > { %v3967_v53 = vmax.f32 %v3837_v21, 0.0  ;;  %v5269_v3 = vadd.f32 %v7592_v52, %v3616_v30  ;;  %v3618_v49 = vpop.f32.mrb[25].mxu1 }
 0x376   : > { %v3842_v59 = vadd.f32 %v5269_v3, %v7492_v10  ;;  %4805 = vmatmul.mubr.msk.f32.gmra.mrb[110].mxu0 %vm849_vm0, %v3967_v53 }
 0x377   : > { %v3621_v23 = vpop.f32.mrb[26].mxu1  ;;  %4228 = vmatprep.mubr.f32.mxu0 %v8079_v0 }
 0x378   : > { %v3968_v57 = vmax.f32 %v3842_v59, 0.0  ;;  %v5270_v28 = vadd.f32 %v7592_v52, %v3621_v23  ;;  %v3623_v39 = vpop.f32.mrb[27].mxu1 }
 0x37a   : > { %v3847_v31 = vadd.f32 %v5270_v28, %v7489_v63  ;;  %4806 = vmatmul.mubr.msk.f32.gmra.mrb[112].mxu0 %vm849_vm0, %v3968_v57 }
 0x37b   : > { %v3626_v5 = vpop.f32.mrb[28].mxu1  ;;  %4234 = vmatprep.mubr.f32.mxu0 %v8079_v0 }
 0x37c   : > { %v3969_v47 = vmax.f32 %v3847_v31, 0.0  ;;  %v5271_v56 = vadd.f32 %v7592_v52, %v3626_v5  ;;  %v3628_v10 = vpop.f32.mrb[29].mxu1 }
 0x37e   : > { %v3852_v50 = vadd.f32 %v5271_v56, %v7500_v9  ;;  %4807 = vmatmul.mubr.msk.f32.gmra.mrb[114].mxu0 %vm849_vm0, %v3969_v47 }
 0x37f   : > { %v3631_v61 = vpop.f32.mrb[30].mxu1  ;;  %4240 = vmatprep.mubr.f32.mxu0 %v8079_v0 }
 0x380   : > { %v3970_v35 = vmax.f32 %v3852_v50, 0.0  ;;  %v5272_v45 = vadd.f32 %v7592_v52, %v3631_v61  ;;  %v3633_v63 = vpop.f32.mrb[31].mxu1 }
 0x382   : > { %v3857_v22 = vadd.f32 %v5272_v45, %v7497_v15  ;;  %4808 = vmatmul.mubr.msk.f32.gmra.mrb[116].mxu0 %vm849_vm0, %v3970_v35 }
 0x383   : > { %v3636_v40 = vpop.f32.mrb[32].mxu1  ;;  %4246 = vmatprep.mubr.f32.mxu0 %v8079_v0 }
 0x384   : > { %v3971_v41 = vmax.f32 %v3857_v22, 0.0  ;;  %v5273_v26 = vadd.f32 %v7592_v52, %v3636_v40  ;;  %v3638_v9 = vpop.f32.mrb[33].mxu1 }
 0x386   : > { %v3862_v29 = vadd.f32 %v5273_v26, %v7508_v60  ;;  %4809 = vmatmul.mubr.msk.f32.gmra.mrb[118].mxu0 %vm849_vm0, %v3971_v41 }
 0x387   : > { %v3641_v17 = vpop.f32.mrb[34].mxu1  ;;  %4252 = vmatprep.mubr.f32.mxu0 %v8079_v0 }
 0x388   : > { %v3972_v58 = vmax.f32 %v3862_v29, 0.0  ;;  %v5274_v27 = vadd.f32 %v7592_v52, %v3641_v17  ;;  %v3643_v15 = vpop.f32.mrb[35].mxu1 }
 0x38a   : > { %v3867_v51 = vadd.f32 %v5274_v27, %v7505_v8  ;;  %4810 = vmatmul.mubr.msk.f32.gmra.mrb[120].mxu0 %vm849_vm0, %v3972_v58 }
 0x38b   : > { %v3646_v2 = vpop.f32.mrb[36].mxu1  ;;  %4258 = vmatprep.mubr.f32.mxu0 %v8079_v0 }
 0x38c   : > { %v3973_v48 = vmax.f32 %v3867_v51, 0.0  ;;  %v5275_v6 = vadd.f32 %v7592_v52, %v3646_v2  ;;  %v3648_v60 = vpop.f32.mrb[37].mxu1 }
 0x38e   : > { %v3872_v19 = vadd.f32 %v5275_v6, %v7516_v46  ;;  %4811 = vmatmul.mubr.msk.f32.gmra.mrb[122].mxu0 %vm849_vm0, %v3973_v48 }
 0x38f   : > { %v3651_v25 = vpop.f32.mrb[38].mxu1  ;;  %4264 = vmatprep.mubr.f32.mxu0 %v8079_v0 }
 0x390   : > { %v3974_v11 = vmax.f32 %v3872_v19, 0.0  ;;  %v5276_v14 = vadd.f32 %v7592_v52, %v3651_v25  ;;  %v3653_v8 = vpop.f32.mrb[39].mxu1 }
 0x392   : > { %v3877_v32 = vadd.f32 %v5276_v14, %v7513_v55  ;;  %4812 = vmatmul.mubr.msk.f32.gmra.mrb[124].mxu0 %vm849_vm0, %v3974_v11 }
 0x393   : > { %v3656_v4 = vpop.f32.mrb[40].mxu1  ;;  %4270 = vmatprep.mubr.f32.mxu0 %v8079_v0 }
 0x394   : > { %v3975_v18 = vmax.f32 %v3877_v32, 0.0  ;;  %v5277_v21 = vadd.f32 %v7592_v52, %v3656_v4  ;;  %v3658_v46 = vpop.f32.mrb[41].mxu1 }
 0x396   : > { %v3882_v30 = vadd.f32 %v5277_v21, %v7524_v54  ;;  %4813 = vmatmul.mubr.msk.f32.gmra.mrb[126].mxu0 %vm849_vm0, %v3975_v18 }
 0x397   : > { %v3661_v53 = vpop.f32.mrb[42].mxu1  ;;  %4276 = vmatprep.mubr.f32.mxu0 %v8079_v0 }
 0x398   : > { %v3976_v3 = vmax.f32 %v3882_v30, 0.0  ;;  %v5278_v49 = vadd.f32 %v7592_v52, %v3661_v53  ;;  %v3663_v55 = vpop.f32.mrb[43].mxu1 }
 0x39a   : > { %v3887_v59 = vadd.f32 %v5278_v49, %v7521_v62  ;;  %4814 = vmatmul.mubr.msk.f32.gmra.mrb[128].mxu0 %vm849_vm0, %v3976_v3 }
 0x39b   : > { %v3666_v23 = vpop.f32.mrb[44].mxu1  ;;  %4282 = vmatprep.mubr.f32.mxu0 %v8079_v0 }
 0x39c   : > { %v3977_v57 = vmax.f32 %v3887_v59, 0.0  ;;  %v5279_v28 = vadd.f32 %v7592_v52, %v3666_v23  ;;  %v3668_v54 = vpop.f32.mrb[45].mxu1 }
 0x39e   : > { %v3892_v39 = vadd.f32 %v5279_v28, %v7532_v12  ;;  %4815 = vmatmul.mubr.msk.f32.gmra.mrb[130].mxu0 %vm849_vm0, %v3977_v57 }
 0x39f   : > { %v3671_v31 = vpop.f32.mrb[46].mxu1  ;;  %4288 = vmatprep.mubr.f32.mxu0 %v8079_v0 }
 0x3a0   : > { %v3978_v5 = vmax.f32 %v3892_v39, 0.0  ;;  %v5280_v47 = vadd.f32 %v7592_v52, %v3671_v31  ;;  %v3673_v62 = vpop.f32.mrb[47].mxu1 }
 0x3a2   : > { %v3897_v56 = vadd.f32 %v5280_v47, %v7529_v44  ;;  %4816 = vmatmul.mubr.msk.f32.gmra.mrb[132].mxu0 %vm849_vm0, %v3978_v5 }
 0x3a3   : > { %v3676_v10 = vpop.f32.mrb[48].mxu1  ;;  %4294 = vmatprep.mubr.f32.mxu0 %v8079_v0 }
 0x3a4   : > { %v3979_v50 = vmax.f32 %v3897_v56, 0.0  ;;  %v5281_v61 = vadd.f32 %v7592_v52, %v3676_v10  ;;  %v3678_v12 = vpop.f32.mrb[49].mxu1 }
 0x3a6   : > { %v3902_v35 = vadd.f32 %v5281_v61, %v7540_v33  ;;  %4817 = vmatmul.mubr.msk.f32.gmra.mrb[134].mxu0 %vm849_vm0, %v3979_v50  ;;  %v4008_v61 = vld [vmem:[%s7989_s8] sm:$0x3] }
 0x3a7   : > { %v3681_v45 = vpop.f32.mrb[50].mxu1  ;;  %4300 = vmatprep.mubr.f32.mxu0 %v8079_v0 }
 0x3a8   : > { %v3980_v63 = vmax.f32 %v3902_v35, 0.0  ;;  %v5282_v22 = vadd.f32 %v7592_v52, %v3681_v45  ;;  %v3683_v44 = vpop.f32.mrb[51].mxu1 }
 0x3aa   : > { %v3907_v40 = vadd.f32 %v5282_v22, %v7537_v43  ;;  %4818 = vmatmul.mubr.msk.f32.gmra.mrb[136].mxu0 %vm849_vm0, %v3980_v63  ;;  %v5432_v22 = vld [vmem:[%s5962_s17] sm:$0xff] }
 0x3ab   : > { %v3686_v41 = vpop.f32.mrb[52].mxu1  ;;  %4306 = vmatprep.mubr.f32.mxu0 %v8079_v0 }
 0x3ac   : > { %v3981_v26 = vmax.f32 %v3907_v40, 0.0  ;;  %v5283_v9 = vadd.f32 %v7592_v52, %v3686_v41  ;;  %v3688_v33 = vpop.f32.mrb[53].mxu1  ;;  %v5433_v40 = vld [vmem:[%s5962_s17 + $0x8] sm:$0xff] }
 0x3ae   : > { %v3912_v29 = vadd.f32 %v5283_v9, %v7548_v37  ;;  %4819 = vmatmul.mubr.msk.f32.gmra.mrb[138].mxu0 %vm849_vm0, %v3981_v26 }
 0x3af   : > { %v3691_v17 = vpop.f32.mrb[54].mxu1  ;;  %4312 = vmatprep.mubr.f32.mxu0 %v8079_v0 }
 0x3b0   : > { %v3982_v58 = vmax.f32 %v3912_v29, 0.0  ;;  %v5284_v27 = vadd.f32 %v7592_v52, %v3691_v17  ;;  %v3693_v43 = vpop.f32.mrb[55].mxu1 }
 0x3b1   : > { %v5435_v43 = vld [vmem:[%s5962_s17 + $0x18] sm:$0xff] }
 0x3b2   : > { %v3917_v15 = vadd.f32 %v5284_v27, %v7545_v24  ;;  %4820 = vmatmul.mubr.msk.f32.gmra.mrb[140].mxu0 %vm849_vm0, %v3982_v58  ;;  %v5434_v58 = vld [vmem:[%s5962_s17 + $0x10] sm:$0xff] }
 0x3b3   : > { %v3696_v51 = vpop.f32.mrb[56].mxu1  ;;  %4318 = vmatprep.mubr.f32.mxu0 %v8079_v0 }
 0x3b4   : > { %v3983_v2 = vmax.f32 %v3917_v15, 0.0  ;;  %v5285_v48 = vadd.f32 %v7592_v52, %v3696_v51  ;;  %v3698_v37 = vpop.f32.mrb[57].mxu1 }
 0x3b6   : > { %v3922_v6 = vadd.f32 %v5285_v48, %v7556_v20  ;;  %4821 = vmatmul.mubr.msk.f32.gmra.mrb[142].mxu0 %vm849_vm0, %v3983_v2 }
 0x3b7   : > { %v3701_v60 = vpop.f32.mrb[58].mxu1  ;;  %4324 = vmatprep.mubr.f32.mxu0 %v8079_v0 }
 0x3b8   : > { %v3984_v19 = vmax.f32 %v3922_v6, 0.0  ;;  %v5286_v25 = vadd.f32 %v7592_v52, %v3701_v60  ;;  %v3703_v24 = vpop.f32.mrb[59].mxu1 }
 0x3b9   : > { %v5437_v24 = vld [vmem:[%s5962_s17 + $0x28] sm:$0xff] }
 0x3ba   : > { %v3927_v11 = vadd.f32 %v5286_v25, %v7553_v42  ;;  %4822 = vmatmul.mubr.msk.f32.gmra.mrb[144].mxu0 %vm849_vm0, %v3984_v19  ;;  %v5436_v19 = vld [vmem:[%s5962_s17 + $0x20] sm:$0xff] }
 0x3bb   : > { %v3706_v14 = vpop.f32.mrb[60].mxu1  ;;  %4330 = vmatprep.mubr.f32.mxu0 %v8079_v0 }
 0x3bc   : > { %v3985_v8 = vmax.f32 %v3927_v11, 0.0  ;;  %v5287_v32 = vadd.f32 %v7592_v52, %v3706_v14  ;;  %v3708_v20 = vpop.f32.mrb[61].mxu1 }
 0x3be   : > { %v3932_v4 = vadd.f32 %v5287_v32, %v7564_v1  ;;  %4823 = vmatmul.mubr.msk.f32.gmra.mrb[146].mxu0 %vm849_vm0, %v3985_v8 }
 0x3bf   : > { %v3711_v18 = vpop.f32.mrb[62].mxu1  ;;  %4336 = vmatprep.mubr.f32.mxu0 %v8079_v0 }
 0x3c0   : > { %v3986_v21 = vmax.f32 %v3932_v4, 0.0  ;;  %v5288_v46 = vadd.f32 %v7592_v52, %v3711_v18  ;;  %v3713_v42 = vpop.f32.mrb[63].mxu1 }
 0x3c1   : > { %v5439_v42 = vld [vmem:[%s5962_s17 + $0x38] sm:$0xff] }
 0x3c2   : > { %v3937_v30 = vadd.f32 %v5288_v46, %v7561_v34  ;;  %4824 = vmatmul.mubr.msk.f32.gmra.mrb[148].mxu0 %vm849_vm0, %v3986_v21  ;;  %v5438_v21 = vld [vmem:[%s5962_s17 + $0x30] sm:$0xff] }
 0x3c3   : > { %v3716_v53 = vpop.f32.mrb[64].mxu1  ;;  %4342 = vmatprep.mubr.f32.mxu0 %v8079_v0 }
 0x3c4   : > { %v3987_v3 = vmax.f32 %v3937_v30, 0.0  ;;  %v5289_v49 = vadd.f32 %v7592_v52, %v3716_v53  ;;  %v3718_v1 = vpop.f32.mrb[65].mxu1 }
 0x3c6   : > { %v3942_v55 = vadd.f32 %v5289_v49, %v7571_v38  ;;  %4825 = vmatmul.mubr.msk.f32.gmra.mrb[150].mxu0 %vm849_vm0, %v3987_v3 }
 0x3c7   : > { %v3721_v59 = vpop.f32.mrb[66].mxu1  ;;  %4348 = vmatprep.mubr.f32.mxu0 %v8079_v0 }
 0x3c8   : > { %v3988_v23 = vmax.f32 %v3942_v55, 0.0  ;;  %v5290_v57 = vadd.f32 %v7592_v52, %v3721_v59  ;;  %v3723_v34 = vpop.f32.mrb[67].mxu1 }
 0x3c9   : > { %v5441_v34 = vld [vmem:[%s5962_s17 + $0x48] sm:$0xff] }
 0x3ca   : > { %v3947_v28 = vadd.f32 %v5290_v57, %v7568_v13  ;;  %4826 = vmatmul.mubr.msk.f32.gmra.mrb[152].mxu0 %vm849_vm0, %v3988_v23  ;;  %v5440_v23 = vld [vmem:[%s5962_s17 + $0x40] sm:$0xff] }
 0x3cb   : > { %v3726_v54 = vpop.f32.mrb[68].mxu1  ;;  %4354 = vmatprep.mubr.f32.mxu0 %v8079_v0 }
 0x3cc   : > { %v3989_v39 = vmax.f32 %v3947_v28, 0.0  ;;  %v5291_v31 = vadd.f32 %v7592_v52, %v3726_v54  ;;  %v3728_v38 = vpop.f32.mrb[69].mxu1 }
 0x3ce   : > { %v3952_v5 = vadd.f32 %v5291_v31, %v7577_v7  ;;  %4827 = vmatmul.mubr.msk.f32.gmra.mrb[154].mxu0 %vm849_vm0, %v3989_v39  ;;  %v4012_v7 = vsub.s32 0, %v6208_v36 }
 0x3cf   : > { %v3731_v47 = vpop.f32.mrb[70].mxu1  ;;  %4360 = vmatprep.mubr.f32.mxu0 %v8079_v0 }
 0x3d0   : > { %v3990_v62 = vmax.f32 %v3952_v5, 0.0  ;;  %v5292_v13 = vadd.f32 %v7592_v52, %v3731_v47  ;;  %v3733_v56 = vpop.f32.mrb[71].mxu1  ;;  %v4016_v52 = vsub.s32 1, %v6208_v36  ;;  %v7726_v12 = vrot.slane %v4008_v61, %v4012_v7 }
 0x3d1   : > { %v5443_v56 = vld [vmem:[%s5962_s17 + $0x58] sm:$0xff] }
 0x3d2   : > { %v3957_v10 = vadd.f32 %v5292_v13, %v7575_v16  ;;  %4828 = vmatmul.mubr.msk.f32.gmra.mrb[156].mxu0 %vm849_vm0, %v3990_v62  ;;  %v7728_v35 = vrot.slane %v4008_v61, %v4016_v52  ;;  %v5442_v62 = vld [vmem:[%s5962_s17 + $0x50] sm:$0xff] }
 0x3d3   : > { %4366 = vmatprep.mubr.f32.mxu0 %v8079_v0 }
 0x3d4   : > { %v3991_v50 = vmax.f32 %v3957_v10, 0.0 }
 0x3d6   : > { %4829 = vmatmul.mubr.msk.f32.gmra.mrb[158].mxu0 %vm849_vm0, %v3991_v50 }
 0x42d   : > { %v4182_v16 = vpop.f32.mrb[96].mxu0 }
 0x42e   : > { %v4183_v0 = vadd.f32 %v4182_v16, %v7726_v12  ;;  %v4184_v45 = vpop.f32.mrb[97].mxu0 }
 0x42f   : > { %v4185_v63 = vadd.f32 %v4184_v45, %v7728_v35  ;;  %v5444_v45 = vld [vmem:[%s5962_s17 + $0x60] sm:$0xff] }
 0x430   : > { %v4373_v44 = vadd.f32 %v5432_v22, %v4183_v0  ;;  %v5445_v22 = vld [vmem:[%s5962_s17 + $0x68] sm:$0xff] }
 0x431   : > { %v4374_v41 = vadd.f32 %v5433_v40, %v4185_v63  ;;  %v4188_v26 = vpop.f32.mrb[98].mxu0 }
 0x432   : > { %v4437_v9 = vmax.f32 %v4373_v44, 0.0  ;;  %v4189_v36 = vadd.f32 %v4188_v26, %v7726_v12  ;;  %v4190_v33 = vpop.f32.mrb[99].mxu0 }
 0x433   : > { %v4438_v29 = vmax.f32 %v4374_v41, 0.0  ;;  %v4191_v17 = vadd.f32 %v4190_v33, %v7728_v35 }
 0x434   : > { %4501 = vst [vmem:[%s7737_s29] sm:$0xff] %v4437_v9  ;;  %v4375_v27 = vadd.f32 %v5434_v58, %v4189_v36  ;;  %v5447_v58 = vld [vmem:[%s5962_s17 + $0x78] sm:$0xff] }
 0x435   : > { %4502 = vst [vmem:[%s7737_s29 + $0x8] sm:$0xff] %v4438_v29  ;;  %v4376_v15 = vadd.f32 %v5435_v43, %v4191_v17  ;;  %v4194_v51 = vpop.f32.mrb[100].mxu0  ;;  %v5446_v29 = vld [vmem:[%s5962_s17 + $0x70] sm:$0xff] }
 0x436   : > { %v4439_v2 = vmax.f32 %v4375_v27, 0.0  ;;  %v4195_v48 = vadd.f32 %v4194_v51, %v7726_v12  ;;  %v4196_v37 = vpop.f32.mrb[101].mxu0 }
 0x437   : > { %v4440_v6 = vmax.f32 %v4376_v15, 0.0  ;;  %v4197_v60 = vadd.f32 %v4196_v37, %v7728_v35 }
 0x438   : > { %4503 = vst [vmem:[%s7737_s29 + $0x10] sm:$0xff] %v4439_v2  ;;  %v4377_v25 = vadd.f32 %v5436_v19, %v4195_v48  ;;  %v5449_v19 = vld [vmem:[%s5962_s17 + $0x88] sm:$0xff] }
 0x439   : > { %4504 = vst [vmem:[%s7737_s29 + $0x18] sm:$0xff] %v4440_v6  ;;  %v4378_v11 = vadd.f32 %v5437_v24, %v4197_v60  ;;  %v4200_v14 = vpop.f32.mrb[102].mxu0  ;;  %v5448_v6 = vld [vmem:[%s5962_s17 + $0x80] sm:$0xff] }
 0x43a   : > { %v4441_v8 = vmax.f32 %v4377_v25, 0.0  ;;  %v4201_v32 = vadd.f32 %v4200_v14, %v7726_v12  ;;  %v4202_v20 = vpop.f32.mrb[103].mxu0 }
 0x43b   : > { %v4442_v4 = vmax.f32 %v4378_v11, 0.0  ;;  %v4203_v18 = vadd.f32 %v4202_v20, %v7728_v35 }
 0x43c   : > { %4505 = vst [vmem:[%s7737_s29 + $0x20] sm:$0xff] %v4441_v8  ;;  %v4379_v46 = vadd.f32 %v5438_v21, %v4201_v32  ;;  %v5451_v21 = vld [vmem:[%s5962_s17 + $0x98] sm:$0xff] }
 0x43d   : > { %4506 = vst [vmem:[%s7737_s29 + $0x28] sm:$0xff] %v4442_v4  ;;  %v4380_v30 = vadd.f32 %v5439_v42, %v4203_v18  ;;  %v4206_v53 = vpop.f32.mrb[104].mxu0  ;;  %v5450_v4 = vld [vmem:[%s5962_s17 + $0x90] sm:$0xff] }
 0x43e   : > { %v4443_v3 = vmax.f32 %v4379_v46, 0.0  ;;  %v4207_v49 = vadd.f32 %v4206_v53, %v7726_v12  ;;  %v4208_v1 = vpop.f32.mrb[105].mxu0 }
 0x43f   : > { %v4444_v55 = vmax.f32 %v4380_v30, 0.0  ;;  %v4209_v59 = vadd.f32 %v4208_v1, %v7728_v35 }
 0x440   : > { %4507 = vst [vmem:[%s7737_s29 + $0x30] sm:$0xff] %v4443_v3  ;;  %v4381_v57 = vadd.f32 %v5440_v23, %v4207_v49  ;;  %v5453_v23 = vld [vmem:[%s5962_s17 + $0xa8] sm:$0xff] }
 0x441   : > { %4508 = vst [vmem:[%s7737_s29 + $0x38] sm:$0xff] %v4444_v55  ;;  %v4382_v28 = vadd.f32 %v5441_v34, %v4209_v59  ;;  %v4212_v54 = vpop.f32.mrb[106].mxu0  ;;  %v5452_v55 = vld [vmem:[%s5962_s17 + $0xa0] sm:$0xff] }
 0x442   : > { %v4445_v39 = vmax.f32 %v4381_v57, 0.0  ;;  %v4213_v31 = vadd.f32 %v4212_v54, %v7726_v12  ;;  %v4214_v38 = vpop.f32.mrb[107].mxu0 }
 0x443   : > { %v4446_v5 = vmax.f32 %v4382_v28, 0.0  ;;  %v4215_v47 = vadd.f32 %v4214_v38, %v7728_v35 }
 0x444   : > { %4509 = vst [vmem:[%s7737_s29 + $0x40] sm:$0xff] %v4445_v39  ;;  %v4383_v13 = vadd.f32 %v5442_v62, %v4213_v31  ;;  %v5455_v62 = vld [vmem:[%s5962_s17 + $0xb8] sm:$0xff] }
 0x445   : > { %4510 = vst [vmem:[%s7737_s29 + $0x48] sm:$0xff] %v4446_v5  ;;  %v4384_v10 = vadd.f32 %v5443_v56, %v4215_v47  ;;  %v4218_v50 = vpop.f32.mrb[108].mxu0  ;;  %v5454_v5 = vld [vmem:[%s5962_s17 + $0xb0] sm:$0xff] }
 0x446   : > { %v4447_v7 = vmax.f32 %v4383_v13, 0.0  ;;  %v4219_v61 = vadd.f32 %v4218_v50, %v7726_v12  ;;  %v4220_v52 = vpop.f32.mrb[109].mxu0 }
 0x447   : > { %v4448_v16 = vmax.f32 %v4384_v10, 0.0  ;;  %v4221_v0 = vadd.f32 %v4220_v52, %v7728_v35 }
 0x448   : > { %4511 = vst [vmem:[%s7737_s29 + $0x50] sm:$0xff] %v4447_v7  ;;  %v4385_v63 = vadd.f32 %v5444_v45, %v4219_v61  ;;  %v5457_v45 = vld [vmem:[%s5962_s17 + $0xc8] sm:$0xff] }
 0x449   : > { %4512 = vst [vmem:[%s7737_s29 + $0x58] sm:$0xff] %v4448_v16  ;;  %v4386_v44 = vadd.f32 %v5445_v22, %v4221_v0  ;;  %v4224_v40 = vpop.f32.mrb[110].mxu0  ;;  %v5456_v16 = vld [vmem:[%s5962_s17 + $0xc0] sm:$0xff] }
 0x44a   : > { %v4449_v41 = vmax.f32 %v4385_v63, 0.0  ;;  %v4225_v26 = vadd.f32 %v4224_v40, %v7726_v12  ;;  %v4226_v9 = vpop.f32.mrb[111].mxu0 }
 0x44b   : > { %v4450_v36 = vmax.f32 %v4386_v44, 0.0  ;;  %v4227_v33 = vadd.f32 %v4226_v9, %v7728_v35 }
 0x44c   : > { %4513 = vst [vmem:[%s7737_s29 + $0x60] sm:$0xff] %v4449_v41  ;;  %v4387_v17 = vadd.f32 %v5446_v29, %v4225_v26  ;;  %v5459_v29 = vld [vmem:[%s5962_s17 + $0xd8] sm:$0xff] }
 0x44d   : > { %4514 = vst [vmem:[%s7737_s29 + $0x68] sm:$0xff] %v4450_v36  ;;  %v4388_v27 = vadd.f32 %v5447_v58, %v4227_v33  ;;  %v4230_v43 = vpop.f32.mrb[112].mxu0  ;;  %v5458_v36 = vld [vmem:[%s5962_s17 + $0xd0] sm:$0xff] }
 0x44e   : > { %v4451_v15 = vmax.f32 %v4387_v17, 0.0  ;;  %v4231_v51 = vadd.f32 %v4230_v43, %v7726_v12  ;;  %v4232_v2 = vpop.f32.mrb[113].mxu0 }
 0x44f   : > { %v4452_v48 = vmax.f32 %v4388_v27, 0.0  ;;  %v4233_v37 = vadd.f32 %v4232_v2, %v7728_v35 }
 0x450   : > { %4515 = vst [vmem:[%s7737_s29 + $0x70] sm:$0xff] %v4451_v15  ;;  %v4389_v60 = vadd.f32 %v5448_v6, %v4231_v51  ;;  %v5461_v6 = vld [vmem:[%s5962_s17 + $0xe8] sm:$0xff] }
 0x451   : > { %4516 = vst [vmem:[%s7737_s29 + $0x78] sm:$0xff] %v4452_v48  ;;  %v4390_v25 = vadd.f32 %v5449_v19, %v4233_v37  ;;  %v4236_v24 = vpop.f32.mrb[114].mxu0  ;;  %v5460_v48 = vld [vmem:[%s5962_s17 + $0xe0] sm:$0xff] }
 0x452   : > { %v4453_v11 = vmax.f32 %v4389_v60, 0.0  ;;  %v4237_v14 = vadd.f32 %v4236_v24, %v7726_v12  ;;  %v4238_v8 = vpop.f32.mrb[115].mxu0 }
 0x453   : > { %v4454_v32 = vmax.f32 %v4390_v25, 0.0  ;;  %v4239_v20 = vadd.f32 %v4238_v8, %v7728_v35 }
 0x454   : > { %4517 = vst [vmem:[%s7737_s29 + $0x80] sm:$0xff] %v4453_v11  ;;  %v4391_v18 = vadd.f32 %v5450_v4, %v4237_v14  ;;  %v5463_v4 = vld [vmem:[%s5962_s17 + $0xf8] sm:$0xff] }
 0x455   : > { %4518 = vst [vmem:[%s7737_s29 + $0x88] sm:$0xff] %v4454_v32  ;;  %v4392_v46 = vadd.f32 %v5451_v21, %v4239_v20  ;;  %v4242_v42 = vpop.f32.mrb[116].mxu0  ;;  %v5462_v32 = vld [vmem:[%s5962_s17 + $0xf0] sm:$0xff] }
 0x456   : > { %v4455_v30 = vmax.f32 %v4391_v18, 0.0  ;;  %v4243_v53 = vadd.f32 %v4242_v42, %v7726_v12  ;;  %v4244_v3 = vpop.f32.mrb[117].mxu0 }
 0x457   : > { %v4456_v49 = vmax.f32 %v4392_v46, 0.0  ;;  %v4245_v1 = vadd.f32 %v4244_v3, %v7728_v35 }
 0x458   : > { %4519 = vst [vmem:[%s7737_s29 + $0x90] sm:$0xff] %v4455_v30  ;;  %v4393_v59 = vadd.f32 %v5452_v55, %v4243_v53  ;;  %v5465_v55 = vld [vmem:[%s5962_s17 + $0x108] sm:$0xff] }
 0x459   : > { %4520 = vst [vmem:[%s7737_s29 + $0x98] sm:$0xff] %v4456_v49  ;;  %v4394_v57 = vadd.f32 %v5453_v23, %v4245_v1  ;;  %v4248_v34 = vpop.f32.mrb[118].mxu0  ;;  %v5464_v49 = vld [vmem:[%s5962_s17 + $0x100] sm:$0xff] }
 0x45a   : > { %v4457_v28 = vmax.f32 %v4393_v59, 0.0  ;;  %v4249_v54 = vadd.f32 %v4248_v34, %v7726_v12  ;;  %v4250_v39 = vpop.f32.mrb[119].mxu0 }
 0x45b   : > { %v4458_v31 = vmax.f32 %v4394_v57, 0.0  ;;  %v4251_v38 = vadd.f32 %v4250_v39, %v7728_v35 }
 0x45c   : > { %4521 = vst [vmem:[%s7737_s29 + $0xa0] sm:$0xff] %v4457_v28  ;;  %v4395_v47 = vadd.f32 %v5454_v5, %v4249_v54  ;;  %v5467_v5 = vld [vmem:[%s5962_s17 + $0x118] sm:$0xff] }
 0x45d   : > { %4522 = vst [vmem:[%s7737_s29 + $0xa8] sm:$0xff] %v4458_v31  ;;  %v4396_v13 = vadd.f32 %v5455_v62, %v4251_v38  ;;  %v4254_v56 = vpop.f32.mrb[120].mxu0  ;;  %v5466_v31 = vld [vmem:[%s5962_s17 + $0x110] sm:$0xff] }
 0x45e   : > { %v4459_v10 = vmax.f32 %v4395_v47, 0.0  ;;  %v4255_v50 = vadd.f32 %v4254_v56, %v7726_v12  ;;  %v4256_v7 = vpop.f32.mrb[121].mxu0 }
 0x45f   : > { %v4460_v61 = vmax.f32 %v4396_v13, 0.0  ;;  %v4257_v52 = vadd.f32 %v4256_v7, %v7728_v35 }
 0x460   : > { %4523 = vst [vmem:[%s7737_s29 + $0xb0] sm:$0xff] %v4459_v10  ;;  %v4397_v0 = vadd.f32 %v5456_v16, %v4255_v50  ;;  %v5469_v16 = vld [vmem:[%s5962_s17 + $0x128] sm:$0xff] }
 0x461   : > { %4524 = vst [vmem:[%s7737_s29 + $0xb8] sm:$0xff] %v4460_v61  ;;  %v4398_v63 = vadd.f32 %v5457_v45, %v4257_v52  ;;  %v4260_v22 = vpop.f32.mrb[122].mxu0  ;;  %v5468_v61 = vld [vmem:[%s5962_s17 + $0x120] sm:$0xff] }
 0x462   : > { %v4461_v44 = vmax.f32 %v4397_v0, 0.0  ;;  %v4261_v40 = vadd.f32 %v4260_v22, %v7726_v12  ;;  %v4262_v41 = vpop.f32.mrb[123].mxu0 }
 0x463   : > { %v4462_v26 = vmax.f32 %v4398_v63, 0.0  ;;  %v4263_v9 = vadd.f32 %v4262_v41, %v7728_v35 }
 0x464   : > { %4525 = vst [vmem:[%s7737_s29 + $0xc0] sm:$0xff] %v4461_v44  ;;  %v4399_v33 = vadd.f32 %v5458_v36, %v4261_v40  ;;  %v5471_v36 = vld [vmem:[%s5962_s17 + $0x138] sm:$0xff] }
 0x465   : > { %4526 = vst [vmem:[%s7737_s29 + $0xc8] sm:$0xff] %v4462_v26  ;;  %v4400_v17 = vadd.f32 %v5459_v29, %v4263_v9  ;;  %v4266_v58 = vpop.f32.mrb[124].mxu0  ;;  %v5470_v26 = vld [vmem:[%s5962_s17 + $0x130] sm:$0xff] }
 0x466   : > { %v4463_v27 = vmax.f32 %v4399_v33, 0.0  ;;  %v4267_v43 = vadd.f32 %v4266_v58, %v7726_v12  ;;  %v4268_v15 = vpop.f32.mrb[125].mxu0 }
 0x467   : > { %v4464_v51 = vmax.f32 %v4400_v17, 0.0  ;;  %v4269_v2 = vadd.f32 %v4268_v15, %v7728_v35 }
 0x468   : > { %4527 = vst [vmem:[%s7737_s29 + $0xd0] sm:$0xff] %v4463_v27  ;;  %v4401_v37 = vadd.f32 %v5460_v48, %v4267_v43  ;;  %v5473_v48 = vld [vmem:[%s5962_s17 + $0x148] sm:$0xff] }
 0x469   : > { %4528 = vst [vmem:[%s7737_s29 + $0xd8] sm:$0xff] %v4464_v51  ;;  %v4402_v60 = vadd.f32 %v5461_v6, %v4269_v2  ;;  %v4272_v19 = vpop.f32.mrb[126].mxu0  ;;  %v5472_v51 = vld [vmem:[%s5962_s17 + $0x140] sm:$0xff] }
 0x46a   : > { %v4465_v25 = vmax.f32 %v4401_v37, 0.0  ;;  %v4273_v24 = vadd.f32 %v4272_v19, %v7726_v12  ;;  %v4274_v11 = vpop.f32.mrb[127].mxu0 }
 0x46b   : > { %v4466_v14 = vmax.f32 %v4402_v60, 0.0  ;;  %v4275_v8 = vadd.f32 %v4274_v11, %v7728_v35 }
 0x46c   : > { %4529 = vst [vmem:[%s7737_s29 + $0xe0] sm:$0xff] %v4465_v25  ;;  %v4403_v20 = vadd.f32 %v5462_v32, %v4273_v24  ;;  %v5475_v32 = vld [vmem:[%s5962_s17 + $0x158] sm:$0xff] }
 0x46d   : > { %4530 = vst [vmem:[%s7737_s29 + $0xe8] sm:$0xff] %v4466_v14  ;;  %v4404_v18 = vadd.f32 %v5463_v4, %v4275_v8  ;;  %v4278_v21 = vpop.f32.mrb[128].mxu0  ;;  %v5474_v14 = vld [vmem:[%s5962_s17 + $0x150] sm:$0xff] }
 0x46e   : > { %v4467_v46 = vmax.f32 %v4403_v20, 0.0  ;;  %v4279_v42 = vadd.f32 %v4278_v21, %v7726_v12  ;;  %v4280_v30 = vpop.f32.mrb[129].mxu0 }
 0x46f   : > { %v4468_v53 = vmax.f32 %v4404_v18, 0.0  ;;  %v4281_v3 = vadd.f32 %v4280_v30, %v7728_v35 }
 0x470   : > { %4531 = vst [vmem:[%s7737_s29 + $0xf0] sm:$0xff] %v4467_v46  ;;  %v4405_v1 = vadd.f32 %v5464_v49, %v4279_v42  ;;  %v5477_v49 = vld [vmem:[%s5962_s17 + $0x168] sm:$0xff] }
 0x471   : > { %4532 = vst [vmem:[%s7737_s29 + $0xf8] sm:$0xff] %v4468_v53  ;;  %v4406_v59 = vadd.f32 %v5465_v55, %v4281_v3  ;;  %v4284_v23 = vpop.f32.mrb[130].mxu0  ;;  %v5476_v53 = vld [vmem:[%s5962_s17 + $0x160] sm:$0xff] }
 0x472   : > { %v4469_v57 = vmax.f32 %v4405_v1, 0.0  ;;  %v4285_v34 = vadd.f32 %v4284_v23, %v7726_v12  ;;  %v4286_v28 = vpop.f32.mrb[131].mxu0 }
 0x473   : > { %v4470_v54 = vmax.f32 %v4406_v59, 0.0  ;;  %v4287_v39 = vadd.f32 %v4286_v28, %v7728_v35 }
 0x474   : > { %4533 = vst [vmem:[%s7737_s29 + $0x100] sm:$0xff] %v4469_v57  ;;  %v4407_v38 = vadd.f32 %v5466_v31, %v4285_v34  ;;  %v5479_v31 = vld [vmem:[%s5962_s17 + $0x178] sm:$0xff] }
 0x475   : > { %4534 = vst [vmem:[%s7737_s29 + $0x108] sm:$0xff] %v4470_v54  ;;  %v4408_v47 = vadd.f32 %v5467_v5, %v4287_v39  ;;  %v4290_v62 = vpop.f32.mrb[132].mxu0  ;;  %v5478_v54 = vld [vmem:[%s5962_s17 + $0x170] sm:$0xff] }
 0x476   : > { %v4471_v13 = vmax.f32 %v4407_v38, 0.0  ;;  %v4291_v56 = vadd.f32 %v4290_v62, %v7726_v12  ;;  %v4292_v10 = vpop.f32.mrb[133].mxu0 }
 0x477   : > { %v4472_v50 = vmax.f32 %v4408_v47, 0.0  ;;  %v4293_v7 = vadd.f32 %v4292_v10, %v7728_v35 }
 0x478   : > { %4535 = vst [vmem:[%s7737_s29 + $0x110] sm:$0xff] %v4471_v13  ;;  %v4409_v52 = vadd.f32 %v5468_v61, %v4291_v56  ;;  %v5481_v61 = vld [vmem:[%s5962_s17 + $0x188] sm:$0xff] }
 0x479   : > { %4536 = vst [vmem:[%s7737_s29 + $0x118] sm:$0xff] %v4472_v50  ;;  %v4410_v0 = vadd.f32 %v5469_v16, %v4293_v7  ;;  %v4296_v45 = vpop.f32.mrb[134].mxu0  ;;  %v5480_v50 = vld [vmem:[%s5962_s17 + $0x180] sm:$0xff] }
 0x47a   : > { %v4473_v63 = vmax.f32 %v4409_v52, 0.0  ;;  %v4297_v22 = vadd.f32 %v4296_v45, %v7726_v12  ;;  %v4298_v44 = vpop.f32.mrb[135].mxu0 }
 0x47b   : > { %v4474_v40 = vmax.f32 %v4410_v0, 0.0  ;;  %v4299_v41 = vadd.f32 %v4298_v44, %v7728_v35 }
 0x47c   : > { %4537 = vst [vmem:[%s7737_s29 + $0x120] sm:$0xff] %v4473_v63  ;;  %v4411_v9 = vadd.f32 %v5470_v26, %v4297_v22  ;;  %v5483_v26 = vld [vmem:[%s5962_s17 + $0x198] sm:$0xff] }
 0x47d   : > { %4538 = vst [vmem:[%s7737_s29 + $0x128] sm:$0xff] %v4474_v40  ;;  %v4412_v33 = vadd.f32 %v5471_v36, %v4299_v41  ;;  %v4302_v29 = vpop.f32.mrb[136].mxu0  ;;  %v5482_v40 = vld [vmem:[%s5962_s17 + $0x190] sm:$0xff] }
 0x47e   : > { %v4475_v17 = vmax.f32 %v4411_v9, 0.0  ;;  %v4303_v58 = vadd.f32 %v4302_v29, %v7726_v12  ;;  %v4304_v27 = vpop.f32.mrb[137].mxu0 }
 0x47f   : > { %v4476_v43 = vmax.f32 %v4412_v33, 0.0  ;;  %v4305_v15 = vadd.f32 %v4304_v27, %v7728_v35 }
 0x480   : > { %4539 = vst [vmem:[%s7737_s29 + $0x130] sm:$0xff] %v4475_v17  ;;  %v4413_v2 = vadd.f32 %v5472_v51, %v4303_v58  ;;  %v5485_v51 = vld [vmem:[%s5962_s17 + $0x1a8] sm:$0xff] }
 0x481   : > { %4540 = vst [vmem:[%s7737_s29 + $0x138] sm:$0xff] %v4476_v43  ;;  %v4414_v37 = vadd.f32 %v5473_v48, %v4305_v15  ;;  %v4308_v6 = vpop.f32.mrb[138].mxu0  ;;  %v5484_v43 = vld [vmem:[%s5962_s17 + $0x1a0] sm:$0xff] }
 0x482   : > { %v4477_v60 = vmax.f32 %v4413_v2, 0.0  ;;  %v4309_v19 = vadd.f32 %v4308_v6, %v7726_v12  ;;  %v4310_v25 = vpop.f32.mrb[139].mxu0 }
 0x483   : > { %v4478_v24 = vmax.f32 %v4414_v37, 0.0  ;;  %v4311_v11 = vadd.f32 %v4310_v25, %v7728_v35 }
 0x484   : > { %4541 = vst [vmem:[%s7737_s29 + $0x140] sm:$0xff] %v4477_v60  ;;  %v4415_v8 = vadd.f32 %v5474_v14, %v4309_v19  ;;  %v5487_v14 = vld [vmem:[%s5962_s17 + $0x1b8] sm:$0xff] }
 0x485   : > { %4542 = vst [vmem:[%s7737_s29 + $0x148] sm:$0xff] %v4478_v24  ;;  %v4416_v20 = vadd.f32 %v5475_v32, %v4311_v11  ;;  %v4314_v4 = vpop.f32.mrb[140].mxu0  ;;  %v5486_v24 = vld [vmem:[%s5962_s17 + $0x1b0] sm:$0xff] }
 0x486   : > { %v4479_v18 = vmax.f32 %v4415_v8, 0.0  ;;  %v4315_v21 = vadd.f32 %v4314_v4, %v7726_v12  ;;  %v4316_v46 = vpop.f32.mrb[141].mxu0 }
 0x487   : > { %v4480_v42 = vmax.f32 %v4416_v20, 0.0  ;;  %v4317_v30 = vadd.f32 %v4316_v46, %v7728_v35 }
 0x488   : > { %4543 = vst [vmem:[%s7737_s29 + $0x150] sm:$0xff] %v4479_v18  ;;  %v4417_v3 = vadd.f32 %v5476_v53, %v4315_v21  ;;  %v5489_v53 = vld [vmem:[%s5962_s17 + $0x1c8] sm:$0xff] }
 0x489   : > { %4544 = vst [vmem:[%s7737_s29 + $0x158] sm:$0xff] %v4480_v42  ;;  %v4418_v1 = vadd.f32 %v5477_v49, %v4317_v30  ;;  %v4320_v55 = vpop.f32.mrb[142].mxu0  ;;  %v5488_v42 = vld [vmem:[%s5962_s17 + $0x1c0] sm:$0xff] }
 0x48a   : > { %v4481_v59 = vmax.f32 %v4417_v3, 0.0  ;;  %v4321_v23 = vadd.f32 %v4320_v55, %v7726_v12  ;;  %v4322_v57 = vpop.f32.mrb[143].mxu0 }
 0x48b   : > { %v4482_v34 = vmax.f32 %v4418_v1, 0.0  ;;  %v4323_v28 = vadd.f32 %v4322_v57, %v7728_v35 }
 0x48c   : > { %4545 = vst [vmem:[%s7737_s29 + $0x160] sm:$0xff] %v4481_v59  ;;  %v4419_v39 = vadd.f32 %v5478_v54, %v4321_v23  ;;  %v5491_v54 = vld [vmem:[%s5962_s17 + $0x1d8] sm:$0xff] }
 0x48d   : > { %4546 = vst [vmem:[%s7737_s29 + $0x168] sm:$0xff] %v4482_v34  ;;  %v4420_v38 = vadd.f32 %v5479_v31, %v4323_v28  ;;  %v4326_v5 = vpop.f32.mrb[144].mxu0  ;;  %v5490_v34 = vld [vmem:[%s5962_s17 + $0x1d0] sm:$0xff] }
 0x48e   : > { %v4483_v47 = vmax.f32 %v4419_v39, 0.0  ;;  %v4327_v62 = vadd.f32 %v4326_v5, %v7726_v12  ;;  %v4328_v13 = vpop.f32.mrb[145].mxu0 }
 0x48f   : > { %v4484_v56 = vmax.f32 %v4420_v38, 0.0  ;;  %v4329_v10 = vadd.f32 %v4328_v13, %v7728_v35 }
 0x490   : > { %4547 = vst [vmem:[%s7737_s29 + $0x170] sm:$0xff] %v4483_v47  ;;  %v4421_v7 = vadd.f32 %v5480_v50, %v4327_v62  ;;  %v5493_v50 = vld [vmem:[%s5962_s17 + $0x1e8] sm:$0xff] }
 0x491   : > { %4548 = vst [vmem:[%s7737_s29 + $0x178] sm:$0xff] %v4484_v56  ;;  %v4422_v52 = vadd.f32 %v5481_v61, %v4329_v10  ;;  %v4332_v16 = vpop.f32.mrb[146].mxu0  ;;  %v5492_v56 = vld [vmem:[%s5962_s17 + $0x1e0] sm:$0xff] }
 0x492   : > { %v4485_v0 = vmax.f32 %v4421_v7, 0.0  ;;  %v4333_v45 = vadd.f32 %v4332_v16, %v7726_v12  ;;  %v4334_v63 = vpop.f32.mrb[147].mxu0 }
 0x493   : > { %v4486_v22 = vmax.f32 %v4422_v52, 0.0  ;;  %v4335_v44 = vadd.f32 %v4334_v63, %v7728_v35 }
 0x494   : > { %4549 = vst [vmem:[%s7737_s29 + $0x180] sm:$0xff] %v4485_v0  ;;  %v4423_v41 = vadd.f32 %v5482_v40, %v4333_v45  ;;  %v5495_v40 = vld [vmem:[%s5962_s17 + $0x1f8] sm:$0xff] }
 0x495   : > { %4550 = vst [vmem:[%s7737_s29 + $0x188] sm:$0xff] %v4486_v22  ;;  %v4424_v9 = vadd.f32 %v5483_v26, %v4335_v44  ;;  %v4338_v36 = vpop.f32.mrb[148].mxu0  ;;  %v5494_v22 = vld [vmem:[%s5962_s17 + $0x1f0] sm:$0xff]  ;;  %s5651_s17 = smov [#allocation9]  }
 0x496   : > { %v4487_v33 = vmax.f32 %v4423_v41, 0.0  ;;  %v4339_v29 = vadd.f32 %v4338_v36, %v7726_v12  ;;  %v4340_v17 = vpop.f32.mrb[149].mxu0  ;;  %s5560_s26 = sshll.u32 %s5651_s17, 4  ;;  %s5561_s26 = int_to_ptr.vmem [resolvable:$false] %s5560_s26 }
 0x497   : > { %v4488_v58 = vmax.f32 %v4424_v9, 0.0  ;;  %v4341_v27 = vadd.f32 %v4340_v17, %v7728_v35  ;;  %s5562_s23 = scalar_lea.vmem %s5561_s26, 16384  ;;  %p5563_p10 = scmp.lt.s32.totalorder %s7930_s27, %s5561_s26 }
 0x498   : > { %4551 = vst [vmem:[%s7737_s29 + $0x190] sm:$0xff] %v4487_v33  ;;  %v4425_v15 = vadd.f32 %v5484_v43, %v4339_v29  ;;  %p5564_p9 = scmp.lt.s32.totalorder %s5562_s23, %s5556_s28 }
 0x499   : > { %4552 = vst [vmem:[%s7737_s29 + $0x198] sm:$0xff] %v4488_v58  ;;  %v4426_v2 = vadd.f32 %v5485_v51, %v4341_v27  ;;  %v4344_v48 = vpop.f32.mrb[150].mxu0 }
 0x49a   : > { %v4489_v37 = vmax.f32 %v4425_v15, 0.0  ;;  %v4345_v6 = vadd.f32 %v4344_v48, %v7726_v12  ;;  %v4346_v60 = vpop.f32.mrb[151].mxu0  ;;  %p5565_p11 = por %p5564_p9, %p5563_p10 }
 0x49b   : > { %v4490_v19 = vmax.f32 %v4426_v2, 0.0  ;;  %v4347_v25 = vadd.f32 %v4346_v60, %v7728_v35 }
 0x49c   : > { %4553 = vst [vmem:[%s7737_s29 + $0x1a0] sm:$0xff] %v4489_v37  ;;  %v4427_v11 = vadd.f32 %v5486_v24, %v4345_v6  ;;  %p5566_p1 = pnand %p5565_p11, %p5559_p7 }
 0x49d   : > { %4554 = vst [vmem:[%s7737_s29 + $0x1a8] sm:$0xff] %v4490_v19  ;;  %v4428_v8 = vadd.f32 %v5487_v14, %v4347_v25  ;;  %v4350_v32 = vpop.f32.mrb[152].mxu0 }
 0x49e   : > { %v4491_v20 = vmax.f32 %v4427_v11, 0.0  ;;  %v4351_v4 = vadd.f32 %v4350_v32, %v7726_v12  ;;  %v4352_v18 = vpop.f32.mrb[153].mxu0 }
 0x49f   : > { %v4492_v21 = vmax.f32 %v4428_v8, 0.0  ;;  %v4353_v46 = vadd.f32 %v4352_v18, %v7728_v35 }
 0x4a0   : > { %4555 = vst [vmem:[%s7737_s29 + $0x1b0] sm:$0xff] %v4491_v20  ;;  %v4429_v30 = vadd.f32 %v5488_v42, %v4351_v4 }
 0x4a1   : > { %4556 = vst [vmem:[%s7737_s29 + $0x1b8] sm:$0xff] %v4492_v21  ;;  %v4430_v3 = vadd.f32 %v5489_v53, %v4353_v46  ;;  %v4356_v49 = vpop.f32.mrb[154].mxu0 }
 0x4a2   : > { %v4493_v1 = vmax.f32 %v4429_v30, 0.0  ;;  %v4357_v55 = vadd.f32 %v4356_v49, %v7726_v12  ;;  %v4358_v59 = vpop.f32.mrb[155].mxu0 }
 0x4a3   : > { %v4494_v23 = vmax.f32 %v4430_v3, 0.0  ;;  %v4359_v57 = vadd.f32 %v4358_v59, %v7728_v35 }
 0x4a4   : > { %4557 = vst [vmem:[%s7737_s29 + $0x1c0] sm:$0xff] %v4493_v1  ;;  %v4431_v28 = vadd.f32 %v5490_v34, %v4357_v55 }
 0x4a5   : > { %4558 = vst [vmem:[%s7737_s29 + $0x1c8] sm:$0xff] %v4494_v23  ;;  %v4432_v39 = vadd.f32 %v5491_v54, %v4359_v57  ;;  %v4362_v31 = vpop.f32.mrb[156].mxu0 }
 0x4a6   : > { %v4495_v38 = vmax.f32 %v4431_v28, 0.0  ;;  %v4363_v5 = vadd.f32 %v4362_v31, %v7726_v12  ;;  %v4364_v47 = vpop.f32.mrb[157].mxu0 }
 0x4a7   : > { %v4496_v62 = vmax.f32 %v4432_v39, 0.0  ;;  %v4365_v13 = vadd.f32 %v4364_v47, %v7728_v35 }
 0x4a8   : > { %4559 = vst [vmem:[%s7737_s29 + $0x1d0] sm:$0xff] %v4495_v38  ;;  %v4433_v10 = vadd.f32 %v5492_v56, %v4363_v5 }
 0x4a9   : > { %4560 = vst [vmem:[%s7737_s29 + $0x1d8] sm:$0xff] %v4496_v62  ;;  %v4434_v7 = vadd.f32 %v5493_v50, %v4365_v13  ;;  %v4368_v61 = vpop.f32.mrb[158].mxu0 }
 0x4aa   : > { %v4497_v52 = vmax.f32 %v4433_v10, 0.0  ;;  %v4369_v16 = vadd.f32 %v4368_v61, %v7726_v12  ;;  %v4370_v0 = vpop.f32.mrb[159].mxu0 }
 0x4ab   : > { %v4498_v45 = vmax.f32 %v4434_v7, 0.0  ;;  %v4371_v63 = vadd.f32 %v4370_v0, %v7728_v35 }
 0x4ac   : > { %4561 = vst [vmem:[%s7737_s29 + $0x1e0] sm:$0xff] %v4497_v52  ;;  %v4435_v44 = vadd.f32 %v5494_v22, %v4369_v16 }
 0x4ad   : > { %4562 = vst [vmem:[%s7737_s29 + $0x1e8] sm:$0xff] %v4498_v45  ;;  %v4436_v41 = vadd.f32 %v5495_v40, %v4371_v63 }
 0x4ae   : > { %v4499_v26 = vmax.f32 %v4435_v44, 0.0 }
 0x4af   : > { %v4500_v12 = vmax.f32 %v4436_v41, 0.0 }
 0x4b0   : > { %4563 = vst [vmem:[%s7737_s29 + $0x1f0] sm:$0xff] %v4499_v26 }
 0x4b1   : > { %4564 = vst [vmem:[%s7737_s29 + $0x1f8] sm:$0xff] %v4500_v12 }
 0x4b2   : > { %5569 = shalt.err (!%p5566_p1)
}
 0x4b3   : > { %s5570_s16 = scalar_lea.hbm %s7928_s19, 8192  ;;  %s5574_s25 = scalar_lea.hbm %s7990_s9, 16384 }
 0x4b4   : > { %p5571_p6 = scmp.ne.s32.totalorder %s7928_s19, %s5570_s16  ;;  %p5575_p4 = scmp.lt.u32.totalorder %s7928_s19, %s7990_s9 }
 0x4b5   : > { %p5576_p8 = scmp.lt.u32.totalorder %s5574_s25, %s5570_s16  ;;  %p5578_p3 = scmp.lt.u32.totalorder %s5570_s16, %s7928_s19 }
 0x4b6   : > { %p5572_p2 = pnand %p5571_p6, %p8081_p12 }
 0x4b7   : > { %p5577_p0 = por %p5576_p8, %p5575_p4 }
 0x4b8   : > { %p5573_p5 = pneg %p5572_p2 }
 0x4b9   : > { %p5579_p13 = por %p5578_p3, %p5577_p0 }
 0x4bb   : > { %p5580_p7 = pnand %p5579_p13, %p5573_p5 }
 0x4bd   : > { %5583 = shalt.err (!%p5580_p7)
}
 0x4be   : > { %s5652_s11 = smov 256   ;;  %s5653_s20 = smov 16  }
 0x4bf   : > { %5361 = dma.vmem_to_hbm [thread:$0]  (%p8081_p12), %s7930_s27, 8192, %s7928_s19, %s4566_s12, %s5652_s11, %s5652_s11, %s5653_s20  }
 0x4c0 PF: > { %s8082_s21 = sld [smem:[#allocation16_spill]]  ;;  %s4597_s28 = sand.u32 1, %s5622_s30  }
 0x4c1   : > { %p8084_p9 = scmp.ge.s32.totalorder %s5642_s14, 2  ;;  %s4598_s17 = scalar_lea.sflag [#allocation6], %s4597_s28 }
 0x4c6   : > { %p8083_p10 = scmp.ne.s32.totalorder %s8082_s21, 0 }
 0x4c8   : > { %p5371_p11 = pnand %p8084_p9, %p8083_p10 }
 0x4ca   : > { %5617 = dma.done.wait (!%p5371_p11), %s4598_s17, 8192  }
 0x4cb   : > { %5619 = vsyncadd (!%p5371_p11), %s4598_s17, 4294959104  ;;  %s28_s14 = sadd.s32 1, %s5642_s14   ;;  %s8085_s26 = sld [smem:[#allocation13_spill]] }
 0x4cc   : > { %p25_p1 = scmp.ge.s32.totalorder %s28_s14, 4   ;;  %s8086_s11 = sld [smem:[#allocation15_spill]] }
 0x4cd   : > { %s8087_s22 = sld [smem:[#allocation14_spill]]  ;;  %s8088_s30 = smov %s5626_s10 }
 0x4ce   : > { %s8090_s12 = smov %s5638_s13  ;;  %27 = sbr.rel (!%p25_p1) target bundleno = 10 (0xa), region = 117 }
 0x4d1   : > { %s8089_s10 = smov %s8085_s26 }
 0x4d3   : > { %s8091_s13 = smov %s8087_s22 }
 0x4d5   :  { %4603 = vsyncpa [#allocation5], 1 }
 0x4d6   :  { %4605 = vsyncpa [#allocation5 + $0x1], 1 }
 0x4d7   :  { %4606 = vsyncpa [#allocation8], 1 }
 0x4d8   :  { %4608 = vsyncpa [#allocation8 + $0x1], 1 }
 0x4d9   :  { %4609 = vsyncpa [#allocation6], 1 }
 0x4da   :  { %4611 = vsyncpa [#allocation6 + $0x1], 1 }

</bundles_post_ra>
